<compile_context>
chip_gen: v7x
topology: tpu7x:2x2x1
jax: 0.10.0
libtpu: 0.0.40
codegen_flags: <defaults>
</compile_context>

<pallas_src>
import numpy as np
import jax
import jax.numpy as jnp
from jax import lax
from jax.experimental import pallas as pl
from jax.experimental.pallas import tpu as pltpu

KSIZE = 7
PAD = 3  # "same" padding for kernel_size = 7


def _make_kernel(H, W):
    HW = H * W
    P = PAD * W + PAD  # max |flat offset| of any conv tap

    def kernel(x_ref, w_ref, mask_ref, o_ref):
        # x_ref   : (TB, C, HW) input block, native dtype (VMEM)
        # w_ref   : (2*K*K,)    conv weights, f32 (SMEM -> scalar reads)
        # mask_ref: (K, HW)     0/1 column-validity mask per dx tap, f32 (VMEM)
        # o_ref   : (TB, C, HW) output block
        x = x_ref[...]
        TB = x.shape[0]

        # Channel-wise mean / max; keepdims keeps everything lane-dense so no
        # in-kernel reshape is ever needed.  Only these small planes are f32.
        avg = jnp.mean(x.astype(jnp.float32), axis=1, keepdims=True)  # (TB,1,HW)
        mx = jnp.max(x, axis=1, keepdims=True).astype(jnp.float32)    # (TB,1,HW)

        # Zero-pad once along the flattened (lane) axis; conv tap (dy, dx) then
        # becomes a static lane slice at offset (dy-PAD)*W + (dx-PAD), masked
        # for column wrap-around at row boundaries.
        avg_p = jnp.pad(avg, ((0, 0), (0, 0), (P, P)))
        mx_p = jnp.pad(mx, ((0, 0), (0, 0), (P, P)))

        mask_rows = [mask_ref[dx:dx + 1, :] for dx in range(KSIZE)]   # (1, HW)

        # 4 independent accumulators (avg/max x dy-parity) -> shorter VALU chain.
        acc = [jnp.zeros((TB, 1, HW), jnp.float32) for _ in range(4)]
        for dy in range(KSIZE):
            row_off = P + (dy - PAD) * W
            ia = 2 * (dy & 1)
            im = ia + 1
            for dx in range(KSIZE):
                off = row_off + (dx - PAD)
                m = mask_rows[dx]
                wa = w_ref[dy * KSIZE + dx]                  # avg-channel weight
                wm = w_ref[KSIZE * KSIZE + dy * KSIZE + dx]  # max-channel weight
                acc[ia] = acc[ia] + avg_p[:, :, off:off + HW] * (m * wa)
                acc[im] = acc[im] + mx_p[:, :, off:off + HW] * (m * wm)
        logits = (acc[0] + acc[1]) + (acc[2] + acc[3])

        att = jax.nn.sigmoid(logits)                         # (TB, 1, HW), f32
        # x * att + x  ==  x * (1 + att): saves a full C*HW-element VPU add.
        gate = (att + 1.0).astype(x.dtype)
        o_ref[...] = (x * gate).astype(o_ref.dtype)

    return kernel


def _pick_block_b(B, C, HW, itemsize):
    """Largest divisor of B whose double-buffered in+out block fits the VMEM
    budget, while keeping >= 2 grid steps (feeds both v7x TensorCores)."""
    budget = 24 * 1024 * 1024                       # conservative vs v7x 64 MiB
    per_b = 4 * C * HW * itemsize + 16 * HW * 4     # 2x(in+out) + f32 scratch
    cap = max(1, budget // max(per_b, 1))
    divisors = [d for d in range(1, B + 1) if B % d == 0]
    fitting = [d for d in divisors if d <= cap] or [1]
    tb = max(fitting)
    while B // tb < 2 and tb > 1:
        smaller = [d for d in fitting if d < tb]
        if not smaller:
            break
        tb = max(smaller)
    return tb


def spatial_attention(x, weight, *, block_b=None):
    """x: (B, C, H, W); weight: (1, 2, K, K) Conv2d weight (bias=False)."""
    B, C, H, W = x.shape
    HW = H * W

    x2 = x.reshape(B, C, HW)                        # lane-dense view (free, no cast)
    w_flat = weight.reshape(2 * KSIZE * KSIZE).astype(jnp.float32)

    # 0/1 column-validity masks for each dx tap of the flattened conv.
    col = np.arange(HW, dtype=np.int64) % W
    mask_np = np.stack(
        [((col + (dx - PAD) >= 0) & (col + (dx - PAD) < W)).astype(np.float32)
         for dx in range(KSIZE)], axis=0)           # (K, HW)
    masks = jnp.asarray(mask_np)

    TB = block_b if block_b is not None else _pick_block_b(B, C, HW, x.dtype.itemsize)
    assert B % TB == 0, "block_b must divide B"

    out2 = pl.pallas_call(
        _make_kernel(H, W),
        out_shape=jax.ShapeDtypeStruct((B, C, HW), x.dtype),
        grid_spec=pltpu.PrefetchScalarGridSpec(
            num_scalar_prefetch=0,
            grid=(B // TB,),
            in_specs=[
                pl.BlockSpec((TB, C, HW), lambda b: (b, 0, 0)),
                pl.BlockSpec(memory_space=pltpu.MemorySpace.SMEM),
                pl.BlockSpec((KSIZE, HW), lambda b: (0, 0)),
            ],
            out_specs=pl.BlockSpec((TB, C, HW), lambda b: (b, 0, 0)),
        ),
        compiler_params=pltpu.CompilerParams(
            dimension_semantics=("parallel",),
            vmem_limit_bytes=64 * 1024 * 1024,      # above 16/32 MiB scoped defaults
        ),
    )(x2, w_flat, masks)

    return out2.reshape(B, C, H, W)


def spatial_attention_ref(x, weight):
    """Pure-JAX reference matching the PyTorch forward."""
    avg = jnp.mean(x, axis=1, keepdims=True)
    mx = jnp.max(x, axis=1, keepdims=True)
    att_in = jnp.concatenate([avg, mx], axis=1)     # (B, 2, H, W)
    conv = lax.conv_general_dilated(
        att_in, weight,
        window_strides=(1, 1), padding=((PAD, PAD), (PAD, PAD)),
        dimension_numbers=("NCHW", "OIHW", "NCHW"))
    att = jax.nn.sigmoid(conv)                      # (B, 1, H, W)
    return x * att + x


if __name__ == "__main__":
    key = jax.random.PRNGKey(0)
    kx, kw = jax.random.split(key)

    B, C, H, W = 2, 4, 16, 16
    x = jax.random.normal(kx, (B, C, H, W), dtype=jnp.float32)

    # deterministic Conv2d(2, 1, 7, bias=False) weight, shape (out=1, in=2, 7, 7)
    fan_in = 2 * KSIZE * KSIZE
    bound = (1.0 / fan_in) ** 0.5
    weight = jax.random.uniform(
        kw, (1, 2, KSIZE, KSIZE), dtype=jnp.float32, minval=-bound, maxval=bound)

    out = spatial_attention(x, weight)
    out = jax.block_until_ready(out)

    ref = spatial_attention_ref(x, weight)
    assert out.shape == (B, C, H, W)
    assert jnp.allclose(out, ref, atol=1e-5, rtol=1e-5), "mismatch vs reference"

    print("KERNEL_OK")
</pallas_src>

<mosaic_0001>
module attributes {stable_mosaic.version = 11 : i64} {
  func.func @kernel(%arg0: i32, %arg1: memref<1x4x256xf32, #tpu.memory_space<vmem>>, %arg2: memref<98xf32, #tpu.memory_space<smem>>, %arg3: memref<7x256xf32, #tpu.memory_space<vmem>>, %arg4: memref<1x4x256xf32, #tpu.memory_space<vmem>>) attributes {dimension_semantics = [#tpu.dimension_semantics<parallel>], iteration_bounds = array<i64: 2>, scalar_prefetch = 0 : i64, scratch_operands = 0 : i64, tpu.core_type = #tpu.core_type<tc>, window_params = [{transform_indices = @transform_0, window_bounds = array<i64: 1, 4, 256>}, {transform_indices = @transform_1, window_bounds = array<i64: 98>}, {pipeline_mode = #tpu.pipeline_mode<synchronous>, transform_indices = @transform_2, window_bounds = array<i64: 7, 256>}, {transform_indices = @transform_3, window_bounds = array<i64: 1, 4, 256>}]} {
    %c0 = arith.constant 0 : index
    %c0_0 = arith.constant 0 : index
    %c0_1 = arith.constant 0 : index
    %0 = vector.load %arg1[%c0, %c0_0, %c0_1] : memref<1x4x256xf32, #tpu.memory_space<vmem>>, vector<1x4x256xf32>
    %cst = arith.constant dense<0.000000e+00> : vector<1x256xf32>
    %1 = vector.multi_reduction <add>, %0, %cst [1] : vector<1x4x256xf32> to vector<1x256xf32>
    %2 = vector.shape_cast %1 : vector<1x256xf32> to vector<1x1x256xf32>
    %cst_2 = arith.constant 4.000000e+00 : f32
    %3 = vector.broadcast %cst_2 : f32 to vector<1x1x256xf32>
    %4 = arith.divf %2, %3 : vector<1x1x256xf32>
    %cst_3 = arith.constant dense<0xFF800000> : vector<1x256xf32>
    %5 = vector.multi_reduction <maximumf>, %0, %cst_3 [1] : vector<1x4x256xf32> to vector<1x256xf32>
    %6 = vector.shape_cast %5 : vector<1x256xf32> to vector<1x1x256xf32>
    %c0_i32 = arith.constant 0 : i32
    %7 = arith.sitofp %c0_i32 : i32 to f32
    %8 = vector.broadcast %7 : f32 to vector<1x1x51xf32>
    %9 = tpu.concatenate %8, %4 in 2 : vector<1x1x51xf32>, vector<1x1x256xf32> -> vector<1x1x307xf32>
    %10 = vector.broadcast %7 : f32 to vector<1x1x51xf32>
    %11 = tpu.concatenate %9, %10 in 2 : vector<1x1x307xf32>, vector<1x1x51xf32> -> vector<1x1x358xf32>
    %c0_i32_4 = arith.constant 0 : i32
    %12 = arith.sitofp %c0_i32_4 : i32 to f32
    %13 = vector.broadcast %12 : f32 to vector<1x1x51xf32>
    %14 = tpu.concatenate %13, %6 in 2 : vector<1x1x51xf32>, vector<1x1x256xf32> -> vector<1x1x307xf32>
    %15 = vector.broadcast %12 : f32 to vector<1x1x51xf32>
    %16 = tpu.concatenate %14, %15 in 2 : vector<1x1x307xf32>, vector<1x1x51xf32> -> vector<1x1x358xf32>
    %c0_5 = arith.constant 0 : index
    %c0_6 = arith.constant 0 : index
    %17 = vector.load %arg3[%c0_5, %c0_6] : memref<7x256xf32, #tpu.memory_space<vmem>>, vector<1x256xf32>
    %c1 = arith.constant 1 : index
    %c0_7 = arith.constant 0 : index
    %18 = vector.load %arg3[%c1, %c0_7] : memref<7x256xf32, #tpu.memory_space<vmem>>, vector<1x256xf32>
    %c2 = arith.constant 2 : index
    %c0_8 = arith.constant 0 : index
    %19 = vector.load %arg3[%c2, %c0_8] : memref<7x256xf32, #tpu.memory_space<vmem>>, vector<1x256xf32>
    %c3 = arith.constant 3 : index
    %c0_9 = arith.constant 0 : index
    %20 = vector.load %arg3[%c3, %c0_9] : memref<7x256xf32, #tpu.memory_space<vmem>>, vector<1x256xf32>
    %c4 = arith.constant 4 : index
    %c0_10 = arith.constant 0 : index
    %21 = vector.load %arg3[%c4, %c0_10] : memref<7x256xf32, #tpu.memory_space<vmem>>, vector<1x256xf32>
    %c5 = arith.constant 5 : index
    %c0_11 = arith.constant 0 : index
    %22 = vector.load %arg3[%c5, %c0_11] : memref<7x256xf32, #tpu.memory_space<vmem>>, vector<1x256xf32>
    %c6 = arith.constant 6 : index
    %c0_12 = arith.constant 0 : index
    %23 = vector.load %arg3[%c6, %c0_12] : memref<7x256xf32, #tpu.memory_space<vmem>>, vector<1x256xf32>
    %cst_13 = arith.constant 0.000000e+00 : f32
    %24 = vector.broadcast %cst_13 : f32 to vector<1x1x256xf32>
    %cst_14 = arith.constant 0.000000e+00 : f32
    %25 = vector.broadcast %cst_14 : f32 to vector<1x1x256xf32>
    %cst_15 = arith.constant 0.000000e+00 : f32
    %26 = vector.broadcast %cst_15 : f32 to vector<1x1x256xf32>
    %cst_16 = arith.constant 0.000000e+00 : f32
    %27 = vector.broadcast %cst_16 : f32 to vector<1x1x256xf32>
    %c0_17 = arith.constant 0 : index
    %28 = memref.load %arg2[%c0_17] : memref<98xf32, #tpu.memory_space<smem>>
    %c49 = arith.constant 49 : index
    %29 = memref.load %arg2[%c49] : memref<98xf32, #tpu.memory_space<smem>>
    %30 = vector.extract_strided_slice %11 {offsets = [0, 0, 0], sizes = [1, 1, 256], strides = [1, 1, 1]} : vector<1x1x358xf32> to vector<1x1x256xf32>
    %31 = vector.broadcast %28 : f32 to vector<1x256xf32>
    %32 = arith.mulf %17, %31 : vector<1x256xf32>
    %33 = vector.shape_cast %32 : vector<1x256xf32> to vector<1x1x256xf32>
    %34 = arith.mulf %30, %33 : vector<1x1x256xf32>
    %35 = arith.addf %24, %34 : vector<1x1x256xf32>
    %36 = vector.extract_strided_slice %16 {offsets = [0, 0, 0], sizes = [1, 1, 256], strides = [1, 1, 1]} : vector<1x1x358xf32> to vector<1x1x256xf32>
    %37 = vector.broadcast %29 : f32 to vector<1x256xf32>
    %38 = arith.mulf %17, %37 : vector<1x256xf32>
    %39 = vector.shape_cast %38 : vector<1x256xf32> to vector<1x1x256xf32>
    %40 = arith.mulf %36, %39 : vector<1x1x256xf32>
    %41 = arith.addf %25, %40 : vector<1x1x256xf32>
    %c1_18 = arith.constant 1 : index
    %42 = memref.load %arg2[%c1_18] : memref<98xf32, #tpu.memory_space<smem>>
    %c50 = arith.constant 50 : index
    %43 = memref.load %arg2[%c50] : memref<98xf32, #tpu.memory_space<smem>>
    %44 = vector.extract_strided_slice %11 {offsets = [0, 0, 1], sizes = [1, 1, 256], strides = [1, 1, 1]} : vector<1x1x358xf32> to vector<1x1x256xf32>
    %45 = vector.broadcast %42 : f32 to vector<1x256xf32>
    %46 = arith.mulf %18, %45 : vector<1x256xf32>
    %47 = vector.shape_cast %46 : vector<1x256xf32> to vector<1x1x256xf32>
    %48 = arith.mulf %44, %47 : vector<1x1x256xf32>
    %49 = arith.addf %35, %48 : vector<1x1x256xf32>
    %50 = vector.extract_strided_slice %16 {offsets = [0, 0, 1], sizes = [1, 1, 256], strides = [1, 1, 1]} : vector<1x1x358xf32> to vector<1x1x256xf32>
    %51 = vector.broadcast %43 : f32 to vector<1x256xf32>
    %52 = arith.mulf %18, %51 : vector<1x256xf32>
    %53 = vector.shape_cast %52 : vector<1x256xf32> to vector<1x1x256xf32>
    %54 = arith.mulf %50, %53 : vector<1x1x256xf32>
    %55 = arith.addf %41, %54 : vector<1x1x256xf32>
    %c2_19 = arith.constant 2 : index
    %56 = memref.load %arg2[%c2_19] : memref<98xf32, #tpu.memory_space<smem>>
    %c51 = arith.constant 51 : index
    %57 = memref.load %arg2[%c51] : memref<98xf32, #tpu.memory_space<smem>>
    %58 = vector.extract_strided_slice %11 {offsets = [0, 0, 2], sizes = [1, 1, 256], strides = [1, 1, 1]} : vector<1x1x358xf32> to vector<1x1x256xf32>
    %59 = vector.broadcast %56 : f32 to vector<1x256xf32>
    %60 = arith.mulf %19, %59 : vector<1x256xf32>
    %61 = vector.shape_cast %60 : vector<1x256xf32> to vector<1x1x256xf32>
    %62 = arith.mulf %58, %61 : vector<1x1x256xf32>
    %63 = arith.addf %49, %62 : vector<1x1x256xf32>
    %64 = vector.extract_strided_slice %16 {offsets = [0, 0, 2], sizes = [1, 1, 256], strides = [1, 1, 1]} : vector<1x1x358xf32> to vector<1x1x256xf32>
    %65 = vector.broadcast %57 : f32 to vector<1x256xf32>
    %66 = arith.mulf %19, %65 : vector<1x256xf32>
    %67 = vector.shape_cast %66 : vector<1x256xf32> to vector<1x1x256xf32>
    %68 = arith.mulf %64, %67 : vector<1x1x256xf32>
    %69 = arith.addf %55, %68 : vector<1x1x256xf32>
    %c3_20 = arith.constant 3 : index
    %70 = memref.load %arg2[%c3_20] : memref<98xf32, #tpu.memory_space<smem>>
    %c52 = arith.constant 52 : index
    %71 = memref.load %arg2[%c52] : memref<98xf32, #tpu.memory_space<smem>>
    %72 = vector.extract_strided_slice %11 {offsets = [0, 0, 3], sizes = [1, 1, 256], strides = [1, 1, 1]} : vector<1x1x358xf32> to vector<1x1x256xf32>
    %73 = vector.broadcast %70 : f32 to vector<1x256xf32>
    %74 = arith.mulf %20, %73 : vector<1x256xf32>
    %75 = vector.shape_cast %74 : vector<1x256xf32> to vector<1x1x256xf32>
    %76 = arith.mulf %72, %75 : vector<1x1x256xf32>
    %77 = arith.addf %63, %76 : vector<1x1x256xf32>
    %78 = vector.extract_strided_slice %16 {offsets = [0, 0, 3], sizes = [1, 1, 256], strides = [1, 1, 1]} : vector<1x1x358xf32> to vector<1x1x256xf32>
    %79 = vector.broadcast %71 : f32 to vector<1x256xf32>
    %80 = arith.mulf %20, %79 : vector<1x256xf32>
    %81 = vector.shape_cast %80 : vector<1x256xf32> to vector<1x1x256xf32>
    %82 = arith.mulf %78, %81 : vector<1x1x256xf32>
    %83 = arith.addf %69, %82 : vector<1x1x256xf32>
    %c4_21 = arith.constant 4 : index
    %84 = memref.load %arg2[%c4_21] : memref<98xf32, #tpu.memory_space<smem>>
    %c53 = arith.constant 53 : index
    %85 = memref.load %arg2[%c53] : memref<98xf32, #tpu.memory_space<smem>>
    %86 = vector.extract_strided_slice %11 {offsets = [0, 0, 4], sizes = [1, 1, 256], strides = [1, 1, 1]} : vector<1x1x358xf32> to vector<1x1x256xf32>
    %87 = vector.broadcast %84 : f32 to vector<1x256xf32>
    %88 = arith.mulf %21, %87 : vector<1x256xf32>
    %89 = vector.shape_cast %88 : vector<1x256xf32> to vector<1x1x256xf32>
    %90 = arith.mulf %86, %89 : vector<1x1x256xf32>
    %91 = arith.addf %77, %90 : vector<1x1x256xf32>
    %92 = vector.extract_strided_slice %16 {offsets = [0, 0, 4], sizes = [1, 1, 256], strides = [1, 1, 1]} : vector<1x1x358xf32> to vector<1x1x256xf32>
    %93 = vector.broadcast %85 : f32 to vector<1x256xf32>
    %94 = arith.mulf %21, %93 : vector<1x256xf32>
    %95 = vector.shape_cast %94 : vector<1x256xf32> to vector<1x1x256xf32>
    %96 = arith.mulf %92, %95 : vector<1x1x256xf32>
    %97 = arith.addf %83, %96 : vector<1x1x256xf32>
    %c5_22 = arith.constant 5 : index
    %98 = memref.load %arg2[%c5_22] : memref<98xf32, #tpu.memory_space<smem>>
    %c54 = arith.constant 54 : index
    %99 = memref.load %arg2[%c54] : memref<98xf32, #tpu.memory_space<smem>>
    %100 = vector.extract_strided_slice %11 {offsets = [0, 0, 5], sizes = [1, 1, 256], strides = [1, 1, 1]} : vector<1x1x358xf32> to vector<1x1x256xf32>
    %101 = vector.broadcast %98 : f32 to vector<1x256xf32>
    %102 = arith.mulf %22, %101 : vector<1x256xf32>
    %103 = vector.shape_cast %102 : vector<1x256xf32> to vector<1x1x256xf32>
    %104 = arith.mulf %100, %103 : vector<1x1x256xf32>
    %105 = arith.addf %91, %104 : vector<1x1x256xf32>
    %106 = vector.extract_strided_slice %16 {offsets = [0, 0, 5], sizes = [1, 1, 256], strides = [1, 1, 1]} : vector<1x1x358xf32> to vector<1x1x256xf32>
    %107 = vector.broadcast %99 : f32 to vector<1x256xf32>
    %108 = arith.mulf %22, %107 : vector<1x256xf32>
    %109 = vector.shape_cast %108 : vector<1x256xf32> to vector<1x1x256xf32>
    %110 = arith.mulf %106, %109 : vector<1x1x256xf32>
    %111 = arith.addf %97, %110 : vector<1x1x256xf32>
    %c6_23 = arith.constant 6 : index
    %112 = memref.load %arg2[%c6_23] : memref<98xf32, #tpu.memory_space<smem>>
    %c55 = arith.constant 55 : index
    %113 = memref.load %arg2[%c55] : memref<98xf32, #tpu.memory_space<smem>>
    %114 = vector.extract_strided_slice %11 {offsets = [0, 0, 6], sizes = [1, 1, 256], strides = [1, 1, 1]} : vector<1x1x358xf32> to vector<1x1x256xf32>
    %115 = vector.broadcast %112 : f32 to vector<1x256xf32>
    %116 = arith.mulf %23, %115 : vector<1x256xf32>
    %117 = vector.shape_cast %116 : vector<1x256xf32> to vector<1x1x256xf32>
    %118 = arith.mulf %114, %117 : vector<1x1x256xf32>
    %119 = arith.addf %105, %118 : vector<1x1x256xf32>
    %120 = vector.extract_strided_slice %16 {offsets = [0, 0, 6], sizes = [1, 1, 256], strides = [1, 1, 1]} : vector<1x1x358xf32> to vector<1x1x256xf32>
    %121 = vector.broadcast %113 : f32 to vector<1x256xf32>
    %122 = arith.mulf %23, %121 : vector<1x256xf32>
    %123 = vector.shape_cast %122 : vector<1x256xf32> to vector<1x1x256xf32>
    %124 = arith.mulf %120, %123 : vector<1x1x256xf32>
    %125 = arith.addf %111, %124 : vector<1x1x256xf32>
    %c7 = arith.constant 7 : index
    %126 = memref.load %arg2[%c7] : memref<98xf32, #tpu.memory_space<smem>>
    %c56 = arith.constant 56 : index
    %127 = memref.load %arg2[%c56] : memref<98xf32, #tpu.memory_space<smem>>
    %128 = vector.extract_strided_slice %11 {offsets = [0, 0, 16], sizes = [1, 1, 256], strides = [1, 1, 1]} : vector<1x1x358xf32> to vector<1x1x256xf32>
    %129 = vector.broadcast %126 : f32 to vector<1x256xf32>
    %130 = arith.mulf %17, %129 : vector<1x256xf32>
    %131 = vector.shape_cast %130 : vector<1x256xf32> to vector<1x1x256xf32>
    %132 = arith.mulf %128, %131 : vector<1x1x256xf32>
    %133 = arith.addf %26, %132 : vector<1x1x256xf32>
    %134 = vector.extract_strided_slice %16 {offsets = [0, 0, 16], sizes = [1, 1, 256], strides = [1, 1, 1]} : vector<1x1x358xf32> to vector<1x1x256xf32>
    %135 = vector.broadcast %127 : f32 to vector<1x256xf32>
    %136 = arith.mulf %17, %135 : vector<1x256xf32>
    %137 = vector.shape_cast %136 : vector<1x256xf32> to vector<1x1x256xf32>
    %138 = arith.mulf %134, %137 : vector<1x1x256xf32>
    %139 = arith.addf %27, %138 : vector<1x1x256xf32>
    %c8 = arith.constant 8 : index
    %140 = memref.load %arg2[%c8] : memref<98xf32, #tpu.memory_space<smem>>
    %c57 = arith.constant 57 : index
    %141 = memref.load %arg2[%c57] : memref<98xf32, #tpu.memory_space<smem>>
    %142 = vector.extract_strided_slice %11 {offsets = [0, 0, 17], sizes = [1, 1, 256], strides = [1, 1, 1]} : vector<1x1x358xf32> to vector<1x1x256xf32>
    %143 = vector.broadcast %140 : f32 to vector<1x256xf32>
    %144 = arith.mulf %18, %143 : vector<1x256xf32>
    %145 = vector.shape_cast %144 : vector<1x256xf32> to vector<1x1x256xf32>
    %146 = arith.mulf %142, %145 : vector<1x1x256xf32>
    %147 = arith.addf %133, %146 : vector<1x1x256xf32>
    %148 = vector.extract_strided_slice %16 {offsets = [0, 0, 17], sizes = [1, 1, 256], strides = [1, 1, 1]} : vector<1x1x358xf32> to vector<1x1x256xf32>
    %149 = vector.broadcast %141 : f32 to vector<1x256xf32>
    %150 = arith.mulf %18, %149 : vector<1x256xf32>
    %151 = vector.shape_cast %150 : vector<1x256xf32> to vector<1x1x256xf32>
    %152 = arith.mulf %148, %151 : vector<1x1x256xf32>
    %153 = arith.addf %139, %152 : vector<1x1x256xf32>
    %c9 = arith.constant 9 : index
    %154 = memref.load %arg2[%c9] : memref<98xf32, #tpu.memory_space<smem>>
    %c58 = arith.constant 58 : index
    %155 = memref.load %arg2[%c58] : memref<98xf32, #tpu.memory_space<smem>>
    %156 = vector.extract_strided_slice %11 {offsets = [0, 0, 18], sizes = [1, 1, 256], strides = [1, 1, 1]} : vector<1x1x358xf32> to vector<1x1x256xf32>
    %157 = vector.broadcast %154 : f32 to vector<1x256xf32>
    %158 = arith.mulf %19, %157 : vector<1x256xf32>
    %159 = vector.shape_cast %158 : vector<1x256xf32> to vector<1x1x256xf32>
    %160 = arith.mulf %156, %159 : vector<1x1x256xf32>
    %161 = arith.addf %147, %160 : vector<1x1x256xf32>
    %162 = vector.extract_strided_slice %16 {offsets = [0, 0, 18], sizes = [1, 1, 256], strides = [1, 1, 1]} : vector<1x1x358xf32> to vector<1x1x256xf32>
    %163 = vector.broadcast %155 : f32 to vector<1x256xf32>
    %164 = arith.mulf %19, %163 : vector<1x256xf32>
    %165 = vector.shape_cast %164 : vector<1x256xf32> to vector<1x1x256xf32>
    %166 = arith.mulf %162, %165 : vector<1x1x256xf32>
    %167 = arith.addf %153, %166 : vector<1x1x256xf32>
    %c10 = arith.constant 10 : index
    %168 = memref.load %arg2[%c10] : memref<98xf32, #tpu.memory_space<smem>>
    %c59 = arith.constant 59 : index
    %169 = memref.load %arg2[%c59] : memref<98xf32, #tpu.memory_space<smem>>
    %170 = vector.extract_strided_slice %11 {offsets = [0, 0, 19], sizes = [1, 1, 256], strides = [1, 1, 1]} : vector<1x1x358xf32> to vector<1x1x256xf32>
    %171 = vector.broadcast %168 : f32 to vector<1x256xf32>
    %172 = arith.mulf %20, %171 : vector<1x256xf32>
    %173 = vector.shape_cast %172 : vector<1x256xf32> to vector<1x1x256xf32>
    %174 = arith.mulf %170, %173 : vector<1x1x256xf32>
    %175 = arith.addf %161, %174 : vector<1x1x256xf32>
    %176 = vector.extract_strided_slice %16 {offsets = [0, 0, 19], sizes = [1, 1, 256], strides = [1, 1, 1]} : vector<1x1x358xf32> to vector<1x1x256xf32>
    %177 = vector.broadcast %169 : f32 to vector<1x256xf32>
    %178 = arith.mulf %20, %177 : vector<1x256xf32>
    %179 = vector.shape_cast %178 : vector<1x256xf32> to vector<1x1x256xf32>
    %180 = arith.mulf %176, %179 : vector<1x1x256xf32>
    %181 = arith.addf %167, %180 : vector<1x1x256xf32>
    %c11 = arith.constant 11 : index
    %182 = memref.load %arg2[%c11] : memref<98xf32, #tpu.memory_space<smem>>
    %c60 = arith.constant 60 : index
    %183 = memref.load %arg2[%c60] : memref<98xf32, #tpu.memory_space<smem>>
    %184 = vector.extract_strided_slice %11 {offsets = [0, 0, 20], sizes = [1, 1, 256], strides = [1, 1, 1]} : vector<1x1x358xf32> to vector<1x1x256xf32>
    %185 = vector.broadcast %182 : f32 to vector<1x256xf32>
    %186 = arith.mulf %21, %185 : vector<1x256xf32>
    %187 = vector.shape_cast %186 : vector<1x256xf32> to vector<1x1x256xf32>
    %188 = arith.mulf %184, %187 : vector<1x1x256xf32>
    %189 = arith.addf %175, %188 : vector<1x1x256xf32>
    %190 = vector.extract_strided_slice %16 {offsets = [0, 0, 20], sizes = [1, 1, 256], strides = [1, 1, 1]} : vector<1x1x358xf32> to vector<1x1x256xf32>
    %191 = vector.broadcast %183 : f32 to vector<1x256xf32>
    %192 = arith.mulf %21, %191 : vector<1x256xf32>
    %193 = vector.shape_cast %192 : vector<1x256xf32> to vector<1x1x256xf32>
    %194 = arith.mulf %190, %193 : vector<1x1x256xf32>
    %195 = arith.addf %181, %194 : vector<1x1x256xf32>
    %c12 = arith.constant 12 : index
    %196 = memref.load %arg2[%c12] : memref<98xf32, #tpu.memory_space<smem>>
    %c61 = arith.constant 61 : index
    %197 = memref.load %arg2[%c61] : memref<98xf32, #tpu.memory_space<smem>>
    %198 = vector.extract_strided_slice %11 {offsets = [0, 0, 21], sizes = [1, 1, 256], strides = [1, 1, 1]} : vector<1x1x358xf32> to vector<1x1x256xf32>
    %199 = vector.broadcast %196 : f32 to vector<1x256xf32>
    %200 = arith.mulf %22, %199 : vector<1x256xf32>
    %201 = vector.shape_cast %200 : vector<1x256xf32> to vector<1x1x256xf32>
    %202 = arith.mulf %198, %201 : vector<1x1x256xf32>
    %203 = arith.addf %189, %202 : vector<1x1x256xf32>
    %204 = vector.extract_strided_slice %16 {offsets = [0, 0, 21], sizes = [1, 1, 256], strides = [1, 1, 1]} : vector<1x1x358xf32> to vector<1x1x256xf32>
    %205 = vector.broadcast %197 : f32 to vector<1x256xf32>
    %206 = arith.mulf %22, %205 : vector<1x256xf32>
    %207 = vector.shape_cast %206 : vector<1x256xf32> to vector<1x1x256xf32>
    %208 = arith.mulf %204, %207 : vector<1x1x256xf32>
    %209 = arith.addf %195, %208 : vector<1x1x256xf32>
    %c13 = arith.constant 13 : index
    %210 = memref.load %arg2[%c13] : memref<98xf32, #tpu.memory_space<smem>>
    %c62 = arith.constant 62 : index
    %211 = memref.load %arg2[%c62] : memref<98xf32, #tpu.memory_space<smem>>
    %212 = vector.extract_strided_slice %11 {offsets = [0, 0, 22], sizes = [1, 1, 256], strides = [1, 1, 1]} : vector<1x1x358xf32> to vector<1x1x256xf32>
    %213 = vector.broadcast %210 : f32 to vector<1x256xf32>
    %214 = arith.mulf %23, %213 : vector<1x256xf32>
    %215 = vector.shape_cast %214 : vector<1x256xf32> to vector<1x1x256xf32>
    %216 = arith.mulf %212, %215 : vector<1x1x256xf32>
    %217 = arith.addf %203, %216 : vector<1x1x256xf32>
    %218 = vector.extract_strided_slice %16 {offsets = [0, 0, 22], sizes = [1, 1, 256], strides = [1, 1, 1]} : vector<1x1x358xf32> to vector<1x1x256xf32>
    %219 = vector.broadcast %211 : f32 to vector<1x256xf32>
    %220 = arith.mulf %23, %219 : vector<1x256xf32>
    %221 = vector.shape_cast %220 : vector<1x256xf32> to vector<1x1x256xf32>
    %222 = arith.mulf %218, %221 : vector<1x1x256xf32>
    %223 = arith.addf %209, %222 : vector<1x1x256xf32>
    %c14 = arith.constant 14 : index
    %224 = memref.load %arg2[%c14] : memref<98xf32, #tpu.memory_space<smem>>
    %c63 = arith.constant 63 : index
    %225 = memref.load %arg2[%c63] : memref<98xf32, #tpu.memory_space<smem>>
    %226 = vector.extract_strided_slice %11 {offsets = [0, 0, 32], sizes = [1, 1, 256], strides = [1, 1, 1]} : vector<1x1x358xf32> to vector<1x1x256xf32>
    %227 = vector.broadcast %224 : f32 to vector<1x256xf32>
    %228 = arith.mulf %17, %227 : vector<1x256xf32>
    %229 = vector.shape_cast %228 : vector<1x256xf32> to vector<1x1x256xf32>
    %230 = arith.mulf %226, %229 : vector<1x1x256xf32>
    %231 = arith.addf %119, %230 : vector<1x1x256xf32>
    %232 = vector.extract_strided_slice %16 {offsets = [0, 0, 32], sizes = [1, 1, 256], strides = [1, 1, 1]} : vector<1x1x358xf32> to vector<1x1x256xf32>
    %233 = vector.broadcast %225 : f32 to vector<1x256xf32>
    %234 = arith.mulf %17, %233 : vector<1x256xf32>
    %235 = vector.shape_cast %234 : vector<1x256xf32> to vector<1x1x256xf32>
    %236 = arith.mulf %232, %235 : vector<1x1x256xf32>
    %237 = arith.addf %125, %236 : vector<1x1x256xf32>
    %c15 = arith.constant 15 : index
    %238 = memref.load %arg2[%c15] : memref<98xf32, #tpu.memory_space<smem>>
    %c64 = arith.constant 64 : index
    %239 = memref.load %arg2[%c64] : memref<98xf32, #tpu.memory_space<smem>>
    %240 = vector.extract_strided_slice %11 {offsets = [0, 0, 33], sizes = [1, 1, 256], strides = [1, 1, 1]} : vector<1x1x358xf32> to vector<1x1x256xf32>
    %241 = vector.broadcast %238 : f32 to vector<1x256xf32>
    %242 = arith.mulf %18, %241 : vector<1x256xf32>
    %243 = vector.shape_cast %242 : vector<1x256xf32> to vector<1x1x256xf32>
    %244 = arith.mulf %240, %243 : vector<1x1x256xf32>
    %245 = arith.addf %231, %244 : vector<1x1x256xf32>
    %246 = vector.extract_strided_slice %16 {offsets = [0, 0, 33], sizes = [1, 1, 256], strides = [1, 1, 1]} : vector<1x1x358xf32> to vector<1x1x256xf32>
    %247 = vector.broadcast %239 : f32 to vector<1x256xf32>
    %248 = arith.mulf %18, %247 : vector<1x256xf32>
    %249 = vector.shape_cast %248 : vector<1x256xf32> to vector<1x1x256xf32>
    %250 = arith.mulf %246, %249 : vector<1x1x256xf32>
    %251 = arith.addf %237, %250 : vector<1x1x256xf32>
    %c16 = arith.constant 16 : index
    %252 = memref.load %arg2[%c16] : memref<98xf32, #tpu.memory_space<smem>>
    %c65 = arith.constant 65 : index
    %253 = memref.load %arg2[%c65] : memref<98xf32, #tpu.memory_space<smem>>
    %254 = vector.extract_strided_slice %11 {offsets = [0, 0, 34], sizes = [1, 1, 256], strides = [1, 1, 1]} : vector<1x1x358xf32> to vector<1x1x256xf32>
    %255 = vector.broadcast %252 : f32 to vector<1x256xf32>
    %256 = arith.mulf %19, %255 : vector<1x256xf32>
    %257 = vector.shape_cast %256 : vector<1x256xf32> to vector<1x1x256xf32>
    %258 = arith.mulf %254, %257 : vector<1x1x256xf32>
    %259 = arith.addf %245, %258 : vector<1x1x256xf32>
    %260 = vector.extract_strided_slice %16 {offsets = [0, 0, 34], sizes = [1, 1, 256], strides = [1, 1, 1]} : vector<1x1x358xf32> to vector<1x1x256xf32>
    %261 = vector.broadcast %253 : f32 to vector<1x256xf32>
    %262 = arith.mulf %19, %261 : vector<1x256xf32>
    %263 = vector.shape_cast %262 : vector<1x256xf32> to vector<1x1x256xf32>
    %264 = arith.mulf %260, %263 : vector<1x1x256xf32>
    %265 = arith.addf %251, %264 : vector<1x1x256xf32>
    %c17 = arith.constant 17 : index
    %266 = memref.load %arg2[%c17] : memref<98xf32, #tpu.memory_space<smem>>
    %c66 = arith.constant 66 : index
    %267 = memref.load %arg2[%c66] : memref<98xf32, #tpu.memory_space<smem>>
    %268 = vector.extract_strided_slice %11 {offsets = [0, 0, 35], sizes = [1, 1, 256], strides = [1, 1, 1]} : vector<1x1x358xf32> to vector<1x1x256xf32>
    %269 = vector.broadcast %266 : f32 to vector<1x256xf32>
    %270 = arith.mulf %20, %269 : vector<1x256xf32>
    %271 = vector.shape_cast %270 : vector<1x256xf32> to vector<1x1x256xf32>
    %272 = arith.mulf %268, %271 : vector<1x1x256xf32>
    %273 = arith.addf %259, %272 : vector<1x1x256xf32>
    %274 = vector.extract_strided_slice %16 {offsets = [0, 0, 35], sizes = [1, 1, 256], strides = [1, 1, 1]} : vector<1x1x358xf32> to vector<1x1x256xf32>
    %275 = vector.broadcast %267 : f32 to vector<1x256xf32>
    %276 = arith.mulf %20, %275 : vector<1x256xf32>
    %277 = vector.shape_cast %276 : vector<1x256xf32> to vector<1x1x256xf32>
    %278 = arith.mulf %274, %277 : vector<1x1x256xf32>
    %279 = arith.addf %265, %278 : vector<1x1x256xf32>
    %c18 = arith.constant 18 : index
    %280 = memref.load %arg2[%c18] : memref<98xf32, #tpu.memory_space<smem>>
    %c67 = arith.constant 67 : index
    %281 = memref.load %arg2[%c67] : memref<98xf32, #tpu.memory_space<smem>>
    %282 = vector.extract_strided_slice %11 {offsets = [0, 0, 36], sizes = [1, 1, 256], strides = [1, 1, 1]} : vector<1x1x358xf32> to vector<1x1x256xf32>
    %283 = vector.broadcast %280 : f32 to vector<1x256xf32>
    %284 = arith.mulf %21, %283 : vector<1x256xf32>
    %285 = vector.shape_cast %284 : vector<1x256xf32> to vector<1x1x256xf32>
    %286 = arith.mulf %282, %285 : vector<1x1x256xf32>
    %287 = arith.addf %273, %286 : vector<1x1x256xf32>
    %288 = vector.extract_strided_slice %16 {offsets = [0, 0, 36], sizes = [1, 1, 256], strides = [1, 1, 1]} : vector<1x1x358xf32> to vector<1x1x256xf32>
    %289 = vector.broadcast %281 : f32 to vector<1x256xf32>
    %290 = arith.mulf %21, %289 : vector<1x256xf32>
    %291 = vector.shape_cast %290 : vector<1x256xf32> to vector<1x1x256xf32>
    %292 = arith.mulf %288, %291 : vector<1x1x256xf32>
    %293 = arith.addf %279, %292 : vector<1x1x256xf32>
    %c19 = arith.constant 19 : index
    %294 = memref.load %arg2[%c19] : memref<98xf32, #tpu.memory_space<smem>>
    %c68 = arith.constant 68 : index
    %295 = memref.load %arg2[%c68] : memref<98xf32, #tpu.memory_space<smem>>
    %296 = vector.extract_strided_slice %11 {offsets = [0, 0, 37], sizes = [1, 1, 256], strides = [1, 1, 1]} : vector<1x1x358xf32> to vector<1x1x256xf32>
    %297 = vector.broadcast %294 : f32 to vector<1x256xf32>
    %298 = arith.mulf %22, %297 : vector<1x256xf32>
    %299 = vector.shape_cast %298 : vector<1x256xf32> to vector<1x1x256xf32>
    %300 = arith.mulf %296, %299 : vector<1x1x256xf32>
    %301 = arith.addf %287, %300 : vector<1x1x256xf32>
    %302 = vector.extract_strided_slice %16 {offsets = [0, 0, 37], sizes = [1, 1, 256], strides = [1, 1, 1]} : vector<1x1x358xf32> to vector<1x1x256xf32>
    %303 = vector.broadcast %295 : f32 to vector<1x256xf32>
    %304 = arith.mulf %22, %303 : vector<1x256xf32>
    %305 = vector.shape_cast %304 : vector<1x256xf32> to vector<1x1x256xf32>
    %306 = arith.mulf %302, %305 : vector<1x1x256xf32>
    %307 = arith.addf %293, %306 : vector<1x1x256xf32>
    %c20 = arith.constant 20 : index
    %308 = memref.load %arg2[%c20] : memref<98xf32, #tpu.memory_space<smem>>
    %c69 = arith.constant 69 : index
    %309 = memref.load %arg2[%c69] : memref<98xf32, #tpu.memory_space<smem>>
    %310 = vector.extract_strided_slice %11 {offsets = [0, 0, 38], sizes = [1, 1, 256], strides = [1, 1, 1]} : vector<1x1x358xf32> to vector<1x1x256xf32>
    %311 = vector.broadcast %308 : f32 to vector<1x256xf32>
    %312 = arith.mulf %23, %311 : vector<1x256xf32>
    %313 = vector.shape_cast %312 : vector<1x256xf32> to vector<1x1x256xf32>
    %314 = arith.mulf %310, %313 : vector<1x1x256xf32>
    %315 = arith.addf %301, %314 : vector<1x1x256xf32>
    %316 = vector.extract_strided_slice %16 {offsets = [0, 0, 38], sizes = [1, 1, 256], strides = [1, 1, 1]} : vector<1x1x358xf32> to vector<1x1x256xf32>
    %317 = vector.broadcast %309 : f32 to vector<1x256xf32>
    %318 = arith.mulf %23, %317 : vector<1x256xf32>
    %319 = vector.shape_cast %318 : vector<1x256xf32> to vector<1x1x256xf32>
    %320 = arith.mulf %316, %319 : vector<1x1x256xf32>
    %321 = arith.addf %307, %320 : vector<1x1x256xf32>
    %c21 = arith.constant 21 : index
    %322 = memref.load %arg2[%c21] : memref<98xf32, #tpu.memory_space<smem>>
    %c70 = arith.constant 70 : index
    %323 = memref.load %arg2[%c70] : memref<98xf32, #tpu.memory_space<smem>>
    %324 = vector.extract_strided_slice %11 {offsets = [0, 0, 48], sizes = [1, 1, 256], strides = [1, 1, 1]} : vector<1x1x358xf32> to vector<1x1x256xf32>
    %325 = vector.broadcast %322 : f32 to vector<1x256xf32>
    %326 = arith.mulf %17, %325 : vector<1x256xf32>
    %327 = vector.shape_cast %326 : vector<1x256xf32> to vector<1x1x256xf32>
    %328 = arith.mulf %324, %327 : vector<1x1x256xf32>
    %329 = arith.addf %217, %328 : vector<1x1x256xf32>
    %330 = vector.extract_strided_slice %16 {offsets = [0, 0, 48], sizes = [1, 1, 256], strides = [1, 1, 1]} : vector<1x1x358xf32> to vector<1x1x256xf32>
    %331 = vector.broadcast %323 : f32 to vector<1x256xf32>
    %332 = arith.mulf %17, %331 : vector<1x256xf32>
    %333 = vector.shape_cast %332 : vector<1x256xf32> to vector<1x1x256xf32>
    %334 = arith.mulf %330, %333 : vector<1x1x256xf32>
    %335 = arith.addf %223, %334 : vector<1x1x256xf32>
    %c22 = arith.constant 22 : index
    %336 = memref.load %arg2[%c22] : memref<98xf32, #tpu.memory_space<smem>>
    %c71 = arith.constant 71 : index
    %337 = memref.load %arg2[%c71] : memref<98xf32, #tpu.memory_space<smem>>
    %338 = vector.extract_strided_slice %11 {offsets = [0, 0, 49], sizes = [1, 1, 256], strides = [1, 1, 1]} : vector<1x1x358xf32> to vector<1x1x256xf32>
    %339 = vector.broadcast %336 : f32 to vector<1x256xf32>
    %340 = arith.mulf %18, %339 : vector<1x256xf32>
    %341 = vector.shape_cast %340 : vector<1x256xf32> to vector<1x1x256xf32>
    %342 = arith.mulf %338, %341 : vector<1x1x256xf32>
    %343 = arith.addf %329, %342 : vector<1x1x256xf32>
    %344 = vector.extract_strided_slice %16 {offsets = [0, 0, 49], sizes = [1, 1, 256], strides = [1, 1, 1]} : vector<1x1x358xf32> to vector<1x1x256xf32>
    %345 = vector.broadcast %337 : f32 to vector<1x256xf32>
    %346 = arith.mulf %18, %345 : vector<1x256xf32>
    %347 = vector.shape_cast %346 : vector<1x256xf32> to vector<1x1x256xf32>
    %348 = arith.mulf %344, %347 : vector<1x1x256xf32>
    %349 = arith.addf %335, %348 : vector<1x1x256xf32>
    %c23 = arith.constant 23 : index
    %350 = memref.load %arg2[%c23] : memref<98xf32, #tpu.memory_space<smem>>
    %c72 = arith.constant 72 : index
    %351 = memref.load %arg2[%c72] : memref<98xf32, #tpu.memory_space<smem>>
    %352 = vector.extract_strided_slice %11 {offsets = [0, 0, 50], sizes = [1, 1, 256], strides = [1, 1, 1]} : vector<1x1x358xf32> to vector<1x1x256xf32>
    %353 = vector.broadcast %350 : f32 to vector<1x256xf32>
    %354 = arith.mulf %19, %353 : vector<1x256xf32>
    %355 = vector.shape_cast %354 : vector<1x256xf32> to vector<1x1x256xf32>
    %356 = arith.mulf %352, %355 : vector<1x1x256xf32>
    %357 = arith.addf %343, %356 : vector<1x1x256xf32>
    %358 = vector.extract_strided_slice %16 {offsets = [0, 0, 50], sizes = [1, 1, 256], strides = [1, 1, 1]} : vector<1x1x358xf32> to vector<1x1x256xf32>
    %359 = vector.broadcast %351 : f32 to vector<1x256xf32>
    %360 = arith.mulf %19, %359 : vector<1x256xf32>
    %361 = vector.shape_cast %360 : vector<1x256xf32> to vector<1x1x256xf32>
    %362 = arith.mulf %358, %361 : vector<1x1x256xf32>
    %363 = arith.addf %349, %362 : vector<1x1x256xf32>
    %c24 = arith.constant 24 : index
    %364 = memref.load %arg2[%c24] : memref<98xf32, #tpu.memory_space<smem>>
    %c73 = arith.constant 73 : index
    %365 = memref.load %arg2[%c73] : memref<98xf32, #tpu.memory_space<smem>>
    %366 = vector.extract_strided_slice %11 {offsets = [0, 0, 51], sizes = [1, 1, 256], strides = [1, 1, 1]} : vector<1x1x358xf32> to vector<1x1x256xf32>
    %367 = vector.broadcast %364 : f32 to vector<1x256xf32>
    %368 = arith.mulf %20, %367 : vector<1x256xf32>
    %369 = vector.shape_cast %368 : vector<1x256xf32> to vector<1x1x256xf32>
    %370 = arith.mulf %366, %369 : vector<1x1x256xf32>
    %371 = arith.addf %357, %370 : vector<1x1x256xf32>
    %372 = vector.extract_strided_slice %16 {offsets = [0, 0, 51], sizes = [1, 1, 256], strides = [1, 1, 1]} : vector<1x1x358xf32> to vector<1x1x256xf32>
    %373 = vector.broadcast %365 : f32 to vector<1x256xf32>
    %374 = arith.mulf %20, %373 : vector<1x256xf32>
    %375 = vector.shape_cast %374 : vector<1x256xf32> to vector<1x1x256xf32>
    %376 = arith.mulf %372, %375 : vector<1x1x256xf32>
    %377 = arith.addf %363, %376 : vector<1x1x256xf32>
    %c25 = arith.constant 25 : index
    %378 = memref.load %arg2[%c25] : memref<98xf32, #tpu.memory_space<smem>>
    %c74 = arith.constant 74 : index
    %379 = memref.load %arg2[%c74] : memref<98xf32, #tpu.memory_space<smem>>
    %380 = vector.extract_strided_slice %11 {offsets = [0, 0, 52], sizes = [1, 1, 256], strides = [1, 1, 1]} : vector<1x1x358xf32> to vector<1x1x256xf32>
    %381 = vector.broadcast %378 : f32 to vector<1x256xf32>
    %382 = arith.mulf %21, %381 : vector<1x256xf32>
    %383 = vector.shape_cast %382 : vector<1x256xf32> to vector<1x1x256xf32>
    %384 = arith.mulf %380, %383 : vector<1x1x256xf32>
    %385 = arith.addf %371, %384 : vector<1x1x256xf32>
    %386 = vector.extract_strided_slice %16 {offsets = [0, 0, 52], sizes = [1, 1, 256], strides = [1, 1, 1]} : vector<1x1x358xf32> to vector<1x1x256xf32>
    %387 = vector.broadcast %379 : f32 to vector<1x256xf32>
    %388 = arith.mulf %21, %387 : vector<1x256xf32>
    %389 = vector.shape_cast %388 : vector<1x256xf32> to vector<1x1x256xf32>
    %390 = arith.mulf %386, %389 : vector<1x1x256xf32>
    %391 = arith.addf %377, %390 : vector<1x1x256xf32>
    %c26 = arith.constant 26 : index
    %392 = memref.load %arg2[%c26] : memref<98xf32, #tpu.memory_space<smem>>
    %c75 = arith.constant 75 : index
    %393 = memref.load %arg2[%c75] : memref<98xf32, #tpu.memory_space<smem>>
    %394 = vector.extract_strided_slice %11 {offsets = [0, 0, 53], sizes = [1, 1, 256], strides = [1, 1, 1]} : vector<1x1x358xf32> to vector<1x1x256xf32>
    %395 = vector.broadcast %392 : f32 to vector<1x256xf32>
    %396 = arith.mulf %22, %395 : vector<1x256xf32>
    %397 = vector.shape_cast %396 : vector<1x256xf32> to vector<1x1x256xf32>
    %398 = arith.mulf %394, %397 : vector<1x1x256xf32>
    %399 = arith.addf %385, %398 : vector<1x1x256xf32>
    %400 = vector.extract_strided_slice %16 {offsets = [0, 0, 53], sizes = [1, 1, 256], strides = [1, 1, 1]} : vector<1x1x358xf32> to vector<1x1x256xf32>
    %401 = vector.broadcast %393 : f32 to vector<1x256xf32>
    %402 = arith.mulf %22, %401 : vector<1x256xf32>
    %403 = vector.shape_cast %402 : vector<1x256xf32> to vector<1x1x256xf32>
    %404 = arith.mulf %400, %403 : vector<1x1x256xf32>
    %405 = arith.addf %391, %404 : vector<1x1x256xf32>
    %c27 = arith.constant 27 : index
    %406 = memref.load %arg2[%c27] : memref<98xf32, #tpu.memory_space<smem>>
    %c76 = arith.constant 76 : index
    %407 = memref.load %arg2[%c76] : memref<98xf32, #tpu.memory_space<smem>>
    %408 = vector.extract_strided_slice %11 {offsets = [0, 0, 54], sizes = [1, 1, 256], strides = [1, 1, 1]} : vector<1x1x358xf32> to vector<1x1x256xf32>
    %409 = vector.broadcast %406 : f32 to vector<1x256xf32>
    %410 = arith.mulf %23, %409 : vector<1x256xf32>
    %411 = vector.shape_cast %410 : vector<1x256xf32> to vector<1x1x256xf32>
    %412 = arith.mulf %408, %411 : vector<1x1x256xf32>
    %413 = arith.addf %399, %412 : vector<1x1x256xf32>
    %414 = vector.extract_strided_slice %16 {offsets = [0, 0, 54], sizes = [1, 1, 256], strides = [1, 1, 1]} : vector<1x1x358xf32> to vector<1x1x256xf32>
    %415 = vector.broadcast %407 : f32 to vector<1x256xf32>
    %416 = arith.mulf %23, %415 : vector<1x256xf32>
    %417 = vector.shape_cast %416 : vector<1x256xf32> to vector<1x1x256xf32>
    %418 = arith.mulf %414, %417 : vector<1x1x256xf32>
    %419 = arith.addf %405, %418 : vector<1x1x256xf32>
    %c28 = arith.constant 28 : index
    %420 = memref.load %arg2[%c28] : memref<98xf32, #tpu.memory_space<smem>>
    %c77 = arith.constant 77 : index
    %421 = memref.load %arg2[%c77] : memref<98xf32, #tpu.memory_space<smem>>
    %422 = vector.extract_strided_slice %11 {offsets = [0, 0, 64], sizes = [1, 1, 256], strides = [1, 1, 1]} : vector<1x1x358xf32> to vector<1x1x256xf32>
    %423 = vector.broadcast %420 : f32 to vector<1x256xf32>
    %424 = arith.mulf %17, %423 : vector<1x256xf32>
    %425 = vector.shape_cast %424 : vector<1x256xf32> to vector<1x1x256xf32>
    %426 = arith.mulf %422, %425 : vector<1x1x256xf32>
    %427 = arith.addf %315, %426 : vector<1x1x256xf32>
    %428 = vector.extract_strided_slice %16 {offsets = [0, 0, 64], sizes = [1, 1, 256], strides = [1, 1, 1]} : vector<1x1x358xf32> to vector<1x1x256xf32>
    %429 = vector.broadcast %421 : f32 to vector<1x256xf32>
    %430 = arith.mulf %17, %429 : vector<1x256xf32>
    %431 = vector.shape_cast %430 : vector<1x256xf32> to vector<1x1x256xf32>
    %432 = arith.mulf %428, %431 : vector<1x1x256xf32>
    %433 = arith.addf %321, %432 : vector<1x1x256xf32>
    %c29 = arith.constant 29 : index
    %434 = memref.load %arg2[%c29] : memref<98xf32, #tpu.memory_space<smem>>
    %c78 = arith.constant 78 : index
    %435 = memref.load %arg2[%c78] : memref<98xf32, #tpu.memory_space<smem>>
    %436 = vector.extract_strided_slice %11 {offsets = [0, 0, 65], sizes = [1, 1, 256], strides = [1, 1, 1]} : vector<1x1x358xf32> to vector<1x1x256xf32>
    %437 = vector.broadcast %434 : f32 to vector<1x256xf32>
    %438 = arith.mulf %18, %437 : vector<1x256xf32>
    %439 = vector.shape_cast %438 : vector<1x256xf32> to vector<1x1x256xf32>
    %440 = arith.mulf %436, %439 : vector<1x1x256xf32>
    %441 = arith.addf %427, %440 : vector<1x1x256xf32>
    %442 = vector.extract_strided_slice %16 {offsets = [0, 0, 65], sizes = [1, 1, 256], strides = [1, 1, 1]} : vector<1x1x358xf32> to vector<1x1x256xf32>
    %443 = vector.broadcast %435 : f32 to vector<1x256xf32>
    %444 = arith.mulf %18, %443 : vector<1x256xf32>
    %445 = vector.shape_cast %444 : vector<1x256xf32> to vector<1x1x256xf32>
    %446 = arith.mulf %442, %445 : vector<1x1x256xf32>
    %447 = arith.addf %433, %446 : vector<1x1x256xf32>
    %c30 = arith.constant 30 : index
    %448 = memref.load %arg2[%c30] : memref<98xf32, #tpu.memory_space<smem>>
    %c79 = arith.constant 79 : index
    %449 = memref.load %arg2[%c79] : memref<98xf32, #tpu.memory_space<smem>>
    %450 = vector.extract_strided_slice %11 {offsets = [0, 0, 66], sizes = [1, 1, 256], strides = [1, 1, 1]} : vector<1x1x358xf32> to vector<1x1x256xf32>
    %451 = vector.broadcast %448 : f32 to vector<1x256xf32>
    %452 = arith.mulf %19, %451 : vector<1x256xf32>
    %453 = vector.shape_cast %452 : vector<1x256xf32> to vector<1x1x256xf32>
    %454 = arith.mulf %450, %453 : vector<1x1x256xf32>
    %455 = arith.addf %441, %454 : vector<1x1x256xf32>
    %456 = vector.extract_strided_slice %16 {offsets = [0, 0, 66], sizes = [1, 1, 256], strides = [1, 1, 1]} : vector<1x1x358xf32> to vector<1x1x256xf32>
    %457 = vector.broadcast %449 : f32 to vector<1x256xf32>
    %458 = arith.mulf %19, %457 : vector<1x256xf32>
    %459 = vector.shape_cast %458 : vector<1x256xf32> to vector<1x1x256xf32>
    %460 = arith.mulf %456, %459 : vector<1x1x256xf32>
    %461 = arith.addf %447, %460 : vector<1x1x256xf32>
    %c31 = arith.constant 31 : index
    %462 = memref.load %arg2[%c31] : memref<98xf32, #tpu.memory_space<smem>>
    %c80 = arith.constant 80 : index
    %463 = memref.load %arg2[%c80] : memref<98xf32, #tpu.memory_space<smem>>
    %464 = vector.extract_strided_slice %11 {offsets = [0, 0, 67], sizes = [1, 1, 256], strides = [1, 1, 1]} : vector<1x1x358xf32> to vector<1x1x256xf32>
    %465 = vector.broadcast %462 : f32 to vector<1x256xf32>
    %466 = arith.mulf %20, %465 : vector<1x256xf32>
    %467 = vector.shape_cast %466 : vector<1x256xf32> to vector<1x1x256xf32>
    %468 = arith.mulf %464, %467 : vector<1x1x256xf32>
    %469 = arith.addf %455, %468 : vector<1x1x256xf32>
    %470 = vector.extract_strided_slice %16 {offsets = [0, 0, 67], sizes = [1, 1, 256], strides = [1, 1, 1]} : vector<1x1x358xf32> to vector<1x1x256xf32>
    %471 = vector.broadcast %463 : f32 to vector<1x256xf32>
    %472 = arith.mulf %20, %471 : vector<1x256xf32>
    %473 = vector.shape_cast %472 : vector<1x256xf32> to vector<1x1x256xf32>
    %474 = arith.mulf %470, %473 : vector<1x1x256xf32>
    %475 = arith.addf %461, %474 : vector<1x1x256xf32>
    %c32 = arith.constant 32 : index
    %476 = memref.load %arg2[%c32] : memref<98xf32, #tpu.memory_space<smem>>
    %c81 = arith.constant 81 : index
    %477 = memref.load %arg2[%c81] : memref<98xf32, #tpu.memory_space<smem>>
    %478 = vector.extract_strided_slice %11 {offsets = [0, 0, 68], sizes = [1, 1, 256], strides = [1, 1, 1]} : vector<1x1x358xf32> to vector<1x1x256xf32>
    %479 = vector.broadcast %476 : f32 to vector<1x256xf32>
    %480 = arith.mulf %21, %479 : vector<1x256xf32>
    %481 = vector.shape_cast %480 : vector<1x256xf32> to vector<1x1x256xf32>
    %482 = arith.mulf %478, %481 : vector<1x1x256xf32>
    %483 = arith.addf %469, %482 : vector<1x1x256xf32>
    %484 = vector.extract_strided_slice %16 {offsets = [0, 0, 68], sizes = [1, 1, 256], strides = [1, 1, 1]} : vector<1x1x358xf32> to vector<1x1x256xf32>
    %485 = vector.broadcast %477 : f32 to vector<1x256xf32>
    %486 = arith.mulf %21, %485 : vector<1x256xf32>
    %487 = vector.shape_cast %486 : vector<1x256xf32> to vector<1x1x256xf32>
    %488 = arith.mulf %484, %487 : vector<1x1x256xf32>
    %489 = arith.addf %475, %488 : vector<1x1x256xf32>
    %c33 = arith.constant 33 : index
    %490 = memref.load %arg2[%c33] : memref<98xf32, #tpu.memory_space<smem>>
    %c82 = arith.constant 82 : index
    %491 = memref.load %arg2[%c82] : memref<98xf32, #tpu.memory_space<smem>>
    %492 = vector.extract_strided_slice %11 {offsets = [0, 0, 69], sizes = [1, 1, 256], strides = [1, 1, 1]} : vector<1x1x358xf32> to vector<1x1x256xf32>
    %493 = vector.broadcast %490 : f32 to vector<1x256xf32>
    %494 = arith.mulf %22, %493 : vector<1x256xf32>
    %495 = vector.shape_cast %494 : vector<1x256xf32> to vector<1x1x256xf32>
    %496 = arith.mulf %492, %495 : vector<1x1x256xf32>
    %497 = arith.addf %483, %496 : vector<1x1x256xf32>
    %498 = vector.extract_strided_slice %16 {offsets = [0, 0, 69], sizes = [1, 1, 256], strides = [1, 1, 1]} : vector<1x1x358xf32> to vector<1x1x256xf32>
    %499 = vector.broadcast %491 : f32 to vector<1x256xf32>
    %500 = arith.mulf %22, %499 : vector<1x256xf32>
    %501 = vector.shape_cast %500 : vector<1x256xf32> to vector<1x1x256xf32>
    %502 = arith.mulf %498, %501 : vector<1x1x256xf32>
    %503 = arith.addf %489, %502 : vector<1x1x256xf32>
    %c34 = arith.constant 34 : index
    %504 = memref.load %arg2[%c34] : memref<98xf32, #tpu.memory_space<smem>>
    %c83 = arith.constant 83 : index
    %505 = memref.load %arg2[%c83] : memref<98xf32, #tpu.memory_space<smem>>
    %506 = vector.extract_strided_slice %11 {offsets = [0, 0, 70], sizes = [1, 1, 256], strides = [1, 1, 1]} : vector<1x1x358xf32> to vector<1x1x256xf32>
    %507 = vector.broadcast %504 : f32 to vector<1x256xf32>
    %508 = arith.mulf %23, %507 : vector<1x256xf32>
    %509 = vector.shape_cast %508 : vector<1x256xf32> to vector<1x1x256xf32>
    %510 = arith.mulf %506, %509 : vector<1x1x256xf32>
    %511 = arith.addf %497, %510 : vector<1x1x256xf32>
    %512 = vector.extract_strided_slice %16 {offsets = [0, 0, 70], sizes = [1, 1, 256], strides = [1, 1, 1]} : vector<1x1x358xf32> to vector<1x1x256xf32>
    %513 = vector.broadcast %505 : f32 to vector<1x256xf32>
    %514 = arith.mulf %23, %513 : vector<1x256xf32>
    %515 = vector.shape_cast %514 : vector<1x256xf32> to vector<1x1x256xf32>
    %516 = arith.mulf %512, %515 : vector<1x1x256xf32>
    %517 = arith.addf %503, %516 : vector<1x1x256xf32>
    %c35 = arith.constant 35 : index
    %518 = memref.load %arg2[%c35] : memref<98xf32, #tpu.memory_space<smem>>
    %c84 = arith.constant 84 : index
    %519 = memref.load %arg2[%c84] : memref<98xf32, #tpu.memory_space<smem>>
    %520 = vector.extract_strided_slice %11 {offsets = [0, 0, 80], sizes = [1, 1, 256], strides = [1, 1, 1]} : vector<1x1x358xf32> to vector<1x1x256xf32>
    %521 = vector.broadcast %518 : f32 to vector<1x256xf32>
    %522 = arith.mulf %17, %521 : vector<1x256xf32>
    %523 = vector.shape_cast %522 : vector<1x256xf32> to vector<1x1x256xf32>
    %524 = arith.mulf %520, %523 : vector<1x1x256xf32>
    %525 = arith.addf %413, %524 : vector<1x1x256xf32>
    %526 = vector.extract_strided_slice %16 {offsets = [0, 0, 80], sizes = [1, 1, 256], strides = [1, 1, 1]} : vector<1x1x358xf32> to vector<1x1x256xf32>
    %527 = vector.broadcast %519 : f32 to vector<1x256xf32>
    %528 = arith.mulf %17, %527 : vector<1x256xf32>
    %529 = vector.shape_cast %528 : vector<1x256xf32> to vector<1x1x256xf32>
    %530 = arith.mulf %526, %529 : vector<1x1x256xf32>
    %531 = arith.addf %419, %530 : vector<1x1x256xf32>
    %c36 = arith.constant 36 : index
    %532 = memref.load %arg2[%c36] : memref<98xf32, #tpu.memory_space<smem>>
    %c85 = arith.constant 85 : index
    %533 = memref.load %arg2[%c85] : memref<98xf32, #tpu.memory_space<smem>>
    %534 = vector.extract_strided_slice %11 {offsets = [0, 0, 81], sizes = [1, 1, 256], strides = [1, 1, 1]} : vector<1x1x358xf32> to vector<1x1x256xf32>
    %535 = vector.broadcast %532 : f32 to vector<1x256xf32>
    %536 = arith.mulf %18, %535 : vector<1x256xf32>
    %537 = vector.shape_cast %536 : vector<1x256xf32> to vector<1x1x256xf32>
    %538 = arith.mulf %534, %537 : vector<1x1x256xf32>
    %539 = arith.addf %525, %538 : vector<1x1x256xf32>
    %540 = vector.extract_strided_slice %16 {offsets = [0, 0, 81], sizes = [1, 1, 256], strides = [1, 1, 1]} : vector<1x1x358xf32> to vector<1x1x256xf32>
    %541 = vector.broadcast %533 : f32 to vector<1x256xf32>
    %542 = arith.mulf %18, %541 : vector<1x256xf32>
    %543 = vector.shape_cast %542 : vector<1x256xf32> to vector<1x1x256xf32>
    %544 = arith.mulf %540, %543 : vector<1x1x256xf32>
    %545 = arith.addf %531, %544 : vector<1x1x256xf32>
    %c37 = arith.constant 37 : index
    %546 = memref.load %arg2[%c37] : memref<98xf32, #tpu.memory_space<smem>>
    %c86 = arith.constant 86 : index
    %547 = memref.load %arg2[%c86] : memref<98xf32, #tpu.memory_space<smem>>
    %548 = vector.extract_strided_slice %11 {offsets = [0, 0, 82], sizes = [1, 1, 256], strides = [1, 1, 1]} : vector<1x1x358xf32> to vector<1x1x256xf32>
    %549 = vector.broadcast %546 : f32 to vector<1x256xf32>
    %550 = arith.mulf %19, %549 : vector<1x256xf32>
    %551 = vector.shape_cast %550 : vector<1x256xf32> to vector<1x1x256xf32>
    %552 = arith.mulf %548, %551 : vector<1x1x256xf32>
    %553 = arith.addf %539, %552 : vector<1x1x256xf32>
    %554 = vector.extract_strided_slice %16 {offsets = [0, 0, 82], sizes = [1, 1, 256], strides = [1, 1, 1]} : vector<1x1x358xf32> to vector<1x1x256xf32>
    %555 = vector.broadcast %547 : f32 to vector<1x256xf32>
    %556 = arith.mulf %19, %555 : vector<1x256xf32>
    %557 = vector.shape_cast %556 : vector<1x256xf32> to vector<1x1x256xf32>
    %558 = arith.mulf %554, %557 : vector<1x1x256xf32>
    %559 = arith.addf %545, %558 : vector<1x1x256xf32>
    %c38 = arith.constant 38 : index
    %560 = memref.load %arg2[%c38] : memref<98xf32, #tpu.memory_space<smem>>
    %c87 = arith.constant 87 : index
    %561 = memref.load %arg2[%c87] : memref<98xf32, #tpu.memory_space<smem>>
    %562 = vector.extract_strided_slice %11 {offsets = [0, 0, 83], sizes = [1, 1, 256], strides = [1, 1, 1]} : vector<1x1x358xf32> to vector<1x1x256xf32>
    %563 = vector.broadcast %560 : f32 to vector<1x256xf32>
    %564 = arith.mulf %20, %563 : vector<1x256xf32>
    %565 = vector.shape_cast %564 : vector<1x256xf32> to vector<1x1x256xf32>
    %566 = arith.mulf %562, %565 : vector<1x1x256xf32>
    %567 = arith.addf %553, %566 : vector<1x1x256xf32>
    %568 = vector.extract_strided_slice %16 {offsets = [0, 0, 83], sizes = [1, 1, 256], strides = [1, 1, 1]} : vector<1x1x358xf32> to vector<1x1x256xf32>
    %569 = vector.broadcast %561 : f32 to vector<1x256xf32>
    %570 = arith.mulf %20, %569 : vector<1x256xf32>
    %571 = vector.shape_cast %570 : vector<1x256xf32> to vector<1x1x256xf32>
    %572 = arith.mulf %568, %571 : vector<1x1x256xf32>
    %573 = arith.addf %559, %572 : vector<1x1x256xf32>
    %c39 = arith.constant 39 : index
    %574 = memref.load %arg2[%c39] : memref<98xf32, #tpu.memory_space<smem>>
    %c88 = arith.constant 88 : index
    %575 = memref.load %arg2[%c88] : memref<98xf32, #tpu.memory_space<smem>>
    %576 = vector.extract_strided_slice %11 {offsets = [0, 0, 84], sizes = [1, 1, 256], strides = [1, 1, 1]} : vector<1x1x358xf32> to vector<1x1x256xf32>
    %577 = vector.broadcast %574 : f32 to vector<1x256xf32>
    %578 = arith.mulf %21, %577 : vector<1x256xf32>
    %579 = vector.shape_cast %578 : vector<1x256xf32> to vector<1x1x256xf32>
    %580 = arith.mulf %576, %579 : vector<1x1x256xf32>
    %581 = arith.addf %567, %580 : vector<1x1x256xf32>
    %582 = vector.extract_strided_slice %16 {offsets = [0, 0, 84], sizes = [1, 1, 256], strides = [1, 1, 1]} : vector<1x1x358xf32> to vector<1x1x256xf32>
    %583 = vector.broadcast %575 : f32 to vector<1x256xf32>
    %584 = arith.mulf %21, %583 : vector<1x256xf32>
    %585 = vector.shape_cast %584 : vector<1x256xf32> to vector<1x1x256xf32>
    %586 = arith.mulf %582, %585 : vector<1x1x256xf32>
    %587 = arith.addf %573, %586 : vector<1x1x256xf32>
    %c40 = arith.constant 40 : index
    %588 = memref.load %arg2[%c40] : memref<98xf32, #tpu.memory_space<smem>>
    %c89 = arith.constant 89 : index
    %589 = memref.load %arg2[%c89] : memref<98xf32, #tpu.memory_space<smem>>
    %590 = vector.extract_strided_slice %11 {offsets = [0, 0, 85], sizes = [1, 1, 256], strides = [1, 1, 1]} : vector<1x1x358xf32> to vector<1x1x256xf32>
    %591 = vector.broadcast %588 : f32 to vector<1x256xf32>
    %592 = arith.mulf %22, %591 : vector<1x256xf32>
    %593 = vector.shape_cast %592 : vector<1x256xf32> to vector<1x1x256xf32>
    %594 = arith.mulf %590, %593 : vector<1x1x256xf32>
    %595 = arith.addf %581, %594 : vector<1x1x256xf32>
    %596 = vector.extract_strided_slice %16 {offsets = [0, 0, 85], sizes = [1, 1, 256], strides = [1, 1, 1]} : vector<1x1x358xf32> to vector<1x1x256xf32>
    %597 = vector.broadcast %589 : f32 to vector<1x256xf32>
    %598 = arith.mulf %22, %597 : vector<1x256xf32>
    %599 = vector.shape_cast %598 : vector<1x256xf32> to vector<1x1x256xf32>
    %600 = arith.mulf %596, %599 : vector<1x1x256xf32>
    %601 = arith.addf %587, %600 : vector<1x1x256xf32>
    %c41 = arith.constant 41 : index
    %602 = memref.load %arg2[%c41] : memref<98xf32, #tpu.memory_space<smem>>
    %c90 = arith.constant 90 : index
    %603 = memref.load %arg2[%c90] : memref<98xf32, #tpu.memory_space<smem>>
    %604 = vector.extract_strided_slice %11 {offsets = [0, 0, 86], sizes = [1, 1, 256], strides = [1, 1, 1]} : vector<1x1x358xf32> to vector<1x1x256xf32>
    %605 = vector.broadcast %602 : f32 to vector<1x256xf32>
    %606 = arith.mulf %23, %605 : vector<1x256xf32>
    %607 = vector.shape_cast %606 : vector<1x256xf32> to vector<1x1x256xf32>
    %608 = arith.mulf %604, %607 : vector<1x1x256xf32>
    %609 = arith.addf %595, %608 : vector<1x1x256xf32>
    %610 = vector.extract_strided_slice %16 {offsets = [0, 0, 86], sizes = [1, 1, 256], strides = [1, 1, 1]} : vector<1x1x358xf32> to vector<1x1x256xf32>
    %611 = vector.broadcast %603 : f32 to vector<1x256xf32>
    %612 = arith.mulf %23, %611 : vector<1x256xf32>
    %613 = vector.shape_cast %612 : vector<1x256xf32> to vector<1x1x256xf32>
    %614 = arith.mulf %610, %613 : vector<1x1x256xf32>
    %615 = arith.addf %601, %614 : vector<1x1x256xf32>
    %c42 = arith.constant 42 : index
    %616 = memref.load %arg2[%c42] : memref<98xf32, #tpu.memory_space<smem>>
    %c91 = arith.constant 91 : index
    %617 = memref.load %arg2[%c91] : memref<98xf32, #tpu.memory_space<smem>>
    %618 = vector.extract_strided_slice %11 {offsets = [0, 0, 96], sizes = [1, 1, 256], strides = [1, 1, 1]} : vector<1x1x358xf32> to vector<1x1x256xf32>
    %619 = vector.broadcast %616 : f32 to vector<1x256xf32>
    %620 = arith.mulf %17, %619 : vector<1x256xf32>
    %621 = vector.shape_cast %620 : vector<1x256xf32> to vector<1x1x256xf32>
    %622 = arith.mulf %618, %621 : vector<1x1x256xf32>
    %623 = arith.addf %511, %622 : vector<1x1x256xf32>
    %624 = vector.extract_strided_slice %16 {offsets = [0, 0, 96], sizes = [1, 1, 256], strides = [1, 1, 1]} : vector<1x1x358xf32> to vector<1x1x256xf32>
    %625 = vector.broadcast %617 : f32 to vector<1x256xf32>
    %626 = arith.mulf %17, %625 : vector<1x256xf32>
    %627 = vector.shape_cast %626 : vector<1x256xf32> to vector<1x1x256xf32>
    %628 = arith.mulf %624, %627 : vector<1x1x256xf32>
    %629 = arith.addf %517, %628 : vector<1x1x256xf32>
    %c43 = arith.constant 43 : index
    %630 = memref.load %arg2[%c43] : memref<98xf32, #tpu.memory_space<smem>>
    %c92 = arith.constant 92 : index
    %631 = memref.load %arg2[%c92] : memref<98xf32, #tpu.memory_space<smem>>
    %632 = vector.extract_strided_slice %11 {offsets = [0, 0, 97], sizes = [1, 1, 256], strides = [1, 1, 1]} : vector<1x1x358xf32> to vector<1x1x256xf32>
    %633 = vector.broadcast %630 : f32 to vector<1x256xf32>
    %634 = arith.mulf %18, %633 : vector<1x256xf32>
    %635 = vector.shape_cast %634 : vector<1x256xf32> to vector<1x1x256xf32>
    %636 = arith.mulf %632, %635 : vector<1x1x256xf32>
    %637 = arith.addf %623, %636 : vector<1x1x256xf32>
    %638 = vector.extract_strided_slice %16 {offsets = [0, 0, 97], sizes = [1, 1, 256], strides = [1, 1, 1]} : vector<1x1x358xf32> to vector<1x1x256xf32>
    %639 = vector.broadcast %631 : f32 to vector<1x256xf32>
    %640 = arith.mulf %18, %639 : vector<1x256xf32>
    %641 = vector.shape_cast %640 : vector<1x256xf32> to vector<1x1x256xf32>
    %642 = arith.mulf %638, %641 : vector<1x1x256xf32>
    %643 = arith.addf %629, %642 : vector<1x1x256xf32>
    %c44 = arith.constant 44 : index
    %644 = memref.load %arg2[%c44] : memref<98xf32, #tpu.memory_space<smem>>
    %c93 = arith.constant 93 : index
    %645 = memref.load %arg2[%c93] : memref<98xf32, #tpu.memory_space<smem>>
    %646 = vector.extract_strided_slice %11 {offsets = [0, 0, 98], sizes = [1, 1, 256], strides = [1, 1, 1]} : vector<1x1x358xf32> to vector<1x1x256xf32>
    %647 = vector.broadcast %644 : f32 to vector<1x256xf32>
    %648 = arith.mulf %19, %647 : vector<1x256xf32>
    %649 = vector.shape_cast %648 : vector<1x256xf32> to vector<1x1x256xf32>
    %650 = arith.mulf %646, %649 : vector<1x1x256xf32>
    %651 = arith.addf %637, %650 : vector<1x1x256xf32>
    %652 = vector.extract_strided_slice %16 {offsets = [0, 0, 98], sizes = [1, 1, 256], strides = [1, 1, 1]} : vector<1x1x358xf32> to vector<1x1x256xf32>
    %653 = vector.broadcast %645 : f32 to vector<1x256xf32>
    %654 = arith.mulf %19, %653 : vector<1x256xf32>
    %655 = vector.shape_cast %654 : vector<1x256xf32> to vector<1x1x256xf32>
    %656 = arith.mulf %652, %655 : vector<1x1x256xf32>
    %657 = arith.addf %643, %656 : vector<1x1x256xf32>
    %c45 = arith.constant 45 : index
    %658 = memref.load %arg2[%c45] : memref<98xf32, #tpu.memory_space<smem>>
    %c94 = arith.constant 94 : index
    %659 = memref.load %arg2[%c94] : memref<98xf32, #tpu.memory_space<smem>>
    %660 = vector.extract_strided_slice %11 {offsets = [0, 0, 99], sizes = [1, 1, 256], strides = [1, 1, 1]} : vector<1x1x358xf32> to vector<1x1x256xf32>
    %661 = vector.broadcast %658 : f32 to vector<1x256xf32>
    %662 = arith.mulf %20, %661 : vector<1x256xf32>
    %663 = vector.shape_cast %662 : vector<1x256xf32> to vector<1x1x256xf32>
    %664 = arith.mulf %660, %663 : vector<1x1x256xf32>
    %665 = arith.addf %651, %664 : vector<1x1x256xf32>
    %666 = vector.extract_strided_slice %16 {offsets = [0, 0, 99], sizes = [1, 1, 256], strides = [1, 1, 1]} : vector<1x1x358xf32> to vector<1x1x256xf32>
    %667 = vector.broadcast %659 : f32 to vector<1x256xf32>
    %668 = arith.mulf %20, %667 : vector<1x256xf32>
    %669 = vector.shape_cast %668 : vector<1x256xf32> to vector<1x1x256xf32>
    %670 = arith.mulf %666, %669 : vector<1x1x256xf32>
    %671 = arith.addf %657, %670 : vector<1x1x256xf32>
    %c46 = arith.constant 46 : index
    %672 = memref.load %arg2[%c46] : memref<98xf32, #tpu.memory_space<smem>>
    %c95 = arith.constant 95 : index
    %673 = memref.load %arg2[%c95] : memref<98xf32, #tpu.memory_space<smem>>
    %674 = vector.extract_strided_slice %11 {offsets = [0, 0, 100], sizes = [1, 1, 256], strides = [1, 1, 1]} : vector<1x1x358xf32> to vector<1x1x256xf32>
    %675 = vector.broadcast %672 : f32 to vector<1x256xf32>
    %676 = arith.mulf %21, %675 : vector<1x256xf32>
    %677 = vector.shape_cast %676 : vector<1x256xf32> to vector<1x1x256xf32>
    %678 = arith.mulf %674, %677 : vector<1x1x256xf32>
    %679 = arith.addf %665, %678 : vector<1x1x256xf32>
    %680 = vector.extract_strided_slice %16 {offsets = [0, 0, 100], sizes = [1, 1, 256], strides = [1, 1, 1]} : vector<1x1x358xf32> to vector<1x1x256xf32>
    %681 = vector.broadcast %673 : f32 to vector<1x256xf32>
    %682 = arith.mulf %21, %681 : vector<1x256xf32>
    %683 = vector.shape_cast %682 : vector<1x256xf32> to vector<1x1x256xf32>
    %684 = arith.mulf %680, %683 : vector<1x1x256xf32>
    %685 = arith.addf %671, %684 : vector<1x1x256xf32>
    %c47 = arith.constant 47 : index
    %686 = memref.load %arg2[%c47] : memref<98xf32, #tpu.memory_space<smem>>
    %c96 = arith.constant 96 : index
    %687 = memref.load %arg2[%c96] : memref<98xf32, #tpu.memory_space<smem>>
    %688 = vector.extract_strided_slice %11 {offsets = [0, 0, 101], sizes = [1, 1, 256], strides = [1, 1, 1]} : vector<1x1x358xf32> to vector<1x1x256xf32>
    %689 = vector.broadcast %686 : f32 to vector<1x256xf32>
    %690 = arith.mulf %22, %689 : vector<1x256xf32>
    %691 = vector.shape_cast %690 : vector<1x256xf32> to vector<1x1x256xf32>
    %692 = arith.mulf %688, %691 : vector<1x1x256xf32>
    %693 = arith.addf %679, %692 : vector<1x1x256xf32>
    %694 = vector.extract_strided_slice %16 {offsets = [0, 0, 101], sizes = [1, 1, 256], strides = [1, 1, 1]} : vector<1x1x358xf32> to vector<1x1x256xf32>
    %695 = vector.broadcast %687 : f32 to vector<1x256xf32>
    %696 = arith.mulf %22, %695 : vector<1x256xf32>
    %697 = vector.shape_cast %696 : vector<1x256xf32> to vector<1x1x256xf32>
    %698 = arith.mulf %694, %697 : vector<1x1x256xf32>
    %699 = arith.addf %685, %698 : vector<1x1x256xf32>
    %c48 = arith.constant 48 : index
    %700 = memref.load %arg2[%c48] : memref<98xf32, #tpu.memory_space<smem>>
    %c97 = arith.constant 97 : index
    %701 = memref.load %arg2[%c97] : memref<98xf32, #tpu.memory_space<smem>>
    %702 = vector.extract_strided_slice %11 {offsets = [0, 0, 102], sizes = [1, 1, 256], strides = [1, 1, 1]} : vector<1x1x358xf32> to vector<1x1x256xf32>
    %703 = vector.broadcast %700 : f32 to vector<1x256xf32>
    %704 = arith.mulf %23, %703 : vector<1x256xf32>
    %705 = vector.shape_cast %704 : vector<1x256xf32> to vector<1x1x256xf32>
    %706 = arith.mulf %702, %705 : vector<1x1x256xf32>
    %707 = arith.addf %693, %706 : vector<1x1x256xf32>
    %708 = vector.extract_strided_slice %16 {offsets = [0, 0, 102], sizes = [1, 1, 256], strides = [1, 1, 1]} : vector<1x1x358xf32> to vector<1x1x256xf32>
    %709 = vector.broadcast %701 : f32 to vector<1x256xf32>
    %710 = arith.mulf %23, %709 : vector<1x256xf32>
    %711 = vector.shape_cast %710 : vector<1x256xf32> to vector<1x1x256xf32>
    %712 = arith.mulf %708, %711 : vector<1x1x256xf32>
    %713 = arith.addf %699, %712 : vector<1x1x256xf32>
    %714 = arith.addf %707, %713 : vector<1x1x256xf32>
    %715 = arith.addf %609, %615 : vector<1x1x256xf32>
    %716 = arith.addf %714, %715 : vector<1x1x256xf32>
    %717 = arith.negf %716 : vector<1x1x256xf32>
    %718 = math.exp %717 : vector<1x1x256xf32>
    %cst_24 = arith.constant 1.000000e+00 : f32
    %719 = vector.broadcast %cst_24 : f32 to vector<1x1x256xf32>
    %720 = arith.addf %719, %718 : vector<1x1x256xf32>
    %721 = arith.divf %719, %720 : vector<1x1x256xf32>
    %cst_25 = arith.constant 1.000000e+00 : f32
    %722 = vector.broadcast %cst_25 : f32 to vector<1x1x256xf32>
    %723 = arith.addf %721, %722 : vector<1x1x256xf32>
    %724 = vector.broadcast %723 : vector<1x1x256xf32> to vector<1x4x256xf32>
    %725 = arith.mulf %0, %724 : vector<1x4x256xf32>
    %c0_26 = arith.constant 0 : index
    %c0_27 = arith.constant 0 : index
    %c0_28 = arith.constant 0 : index
    %726 = vector.load %arg4[%c0_26, %c0_27, %c0_28] : memref<1x4x256xf32, #tpu.memory_space<vmem>>, vector<1x4x256xf32>
    tpu.vector_store %arg4[%c0_26, %c0_27, %c0_28], %725 {strides = array<i32>} : memref<1x4x256xf32, #tpu.memory_space<vmem>>, vector<1x4x256xf32>,
    return
  }
  func.func @transform_0(%arg0: i32) -> (i32, i32, i32) {
    %c0_i32 = arith.constant 0 : i32
    %c0_i32_0 = arith.constant 0 : i32
    %c0_i32_1 = arith.constant 0 : i32
    return %arg0, %c0_i32, %c0_i32_0 : i32, i32, i32
  }
  func.func @transform_1(%arg0: i32) -> i32 {
    %c0_i32 = arith.constant 0 : i32
    %c0_i32_0 = arith.constant 0 : i32
    return %c0_i32 : i32
  }
  func.func @transform_2(%arg0: i32) -> (i32, i32) {
    %c0_i32 = arith.constant 0 : i32
    %c0_i32_0 = arith.constant 0 : i32
    %c0_i32_1 = arith.constant 0 : i32
    return %c0_i32, %c0_i32_0 : i32, i32
  }
  func.func @transform_3(%arg0: i32) -> (i32, i32, i32) {
    %c0_i32 = arith.constant 0 : i32
    %c0_i32_0 = arith.constant 0 : i32
    %c0_i32_1 = arith.constant 0 : i32
    return %arg0, %c0_i32, %c0_i32_0 : i32, i32, i32
  }
}

</mosaic_0001>

<bundles_post_ra>
// kernel: tpu_custom_call.1
= control target key start
LH: loop header
LB: loop body
LE: loop exit
PB: predicated region body
PF: predicated region fallthrough
CT: control target
= control target key end

     0   :  { %8 = vsyncpa [#allocation3], 0  ;;  %s7203_s0 = inlined_call_operand.hbm [shape: f32[2,4,256], index: 0, kind: input, shape index: {}]   ;;  %s7204_s1 = inlined_call_operand.hbm [shape: f32[98], index: 1, kind: input, shape index: {}]   ;;  %s7205_s2 = inlined_call_operand.hbm [shape: f32[7,256], index: 2, kind: input, shape index: {}]   ;;  %s7206_s3 = inlined_call_operand.hbm [shape: f32[2,4,256], index: 3, kind: output, shape index: {}]  }
   0x1   :  { %10 = vsyncpa [#allocation3 + $0x1], 0 }
   0x2   :  { %11 = vsyncpa [#allocation5], 0 }
   0x3   :  { %12 = vsyncpa [#allocation8], 0 }
   0x4   :  { %13 = vsyncpa [#allocation4], 0 }
   0x5   :  { %15 = vsyncpa [#allocation4 + $0x1], 0  ;;  %s4781_s12 = smov 0   ;;  %s4783_s13 = smov 0  }
   0x6   :  { %s4785_s14 = smov 0   ;;  %s4787_s15 = smov 0  }
   0x7 LB: > { %s4802_s16 = sadd.s32 4294967295, %s4682_s15   ;;  %s4253_s17 = sadd.s32 4294967294, %s4682_s15   ;;  %s4682_s15 = sphi %s4787_s15, %s7725_s15   ;;  %s4678_s14 = sphi %s4785_s14, %s7724_s14   ;;  %s4674_s13 = sphi %s4783_s13, %s7723_s13   ;;  %s4670_s12 = sphi %s4781_s12, %s7722_s12  }
   0x8   : > { %p41_p0 = scmp.ne.s32.totalorder %s4674_s13, %s4670_s12  ;;  %p7207_p1 = scmp.eq.s32.totalorder %s4802_s16, 0 }
   0x9   : > { %p113_p3 = scmp.eq.s32.totalorder %s4253_s17, 1  ;;  %p4254_p5 = scmp.ge.s32.totalorder %s4682_s15, 1 }
   0xa   : > { %p4811_p4 = por %p7207_p1, %p41_p0  ;;  %p120_p7 = scmp.lt.s32.totalorder %s4682_s15, 3 }
   0xb   : > { %p4816_p6 = por %p113_p3, %p41_p0  ;;  %s4684_s21 = smov [#allocation7]  }
   0xc   : > { %s7303_s18 = scalar_select %p4811_p4, 1, 0 }
   0xd   : > { %s7304_s19 = scalar_select %p4816_p6, 1, 0 }
   0xe   : > { %p4821_p8 = pnand %p4254_p5, %p120_p7  ;;  %s142_s22 = sshll.u32 %s4684_s21, 4  ;;  %s4828_s22 = int_to_ptr.vmem [resolvable:$true] %s142_s22 }
   0xf   : > { %s4837_s24 = sadd.s32 1, %s4682_s15   ;;  %s28_s26 = sadd.s32 1, %s4678_s14 }
  0x10   : > { %p4384_p10 = pneg %p4821_p8  ;;  %s25_s25 = ssub.s32 %s4682_s15, %s4837_s24 }
  0x11   : > { %p4842_p12 = scmp.eq.s32.totalorder %s25_s25, 0  ;;  %s4537_s30 = scalar_lea.hbm %s7204_s1, 16 }
  0x12   : > { %p4832_p11 = pnand %p4384_p10, %p7207_p1  ;;  %p4538_p13 = scmp.ne.s32.totalorder %s7204_s1, %s4537_s30 }
  0x13   : > { %p4544_p7 = scmp.lt.u32.totalorder %s4537_s30, %s7204_s1 }
  0x14   : > { %p4539_p0 = pneg %p4832_p11 }
  0x16   : > { %p4540_p3 = pnand %p4539_p0, %p4538_p13 }
  0x18   : > { %p4541_p5 = pneg %p4540_p3 }
  0x1a   : > { %p4546_p10 = pnand %p4544_p7, %p4541_p5 }
  0x1c   : > { %4549 = shalt.err (!%p4546_p10)
}
  0x1d   : > { %s4685_s8 = smov [#allocation6]   ;;  %s4550_s21 = scalar_lea.hbm %s7205_s2, 256 }
  0x1e   : > { %4387 = dma.hbm_to_smem (!%p4832_p11), %s7204_s1, 16, %s4685_s8, [#allocation5]  }
  0x1f   : > { %p4551_p13 = scmp.ne.s32.totalorder %s7205_s2, %s4550_s21  ;;  %p4557_p7 = scmp.lt.u32.totalorder %s4550_s21, %s7205_s2 }
  0x21   : > { %p4553_p3 = pnand %p4551_p13, %p4539_p0 }
  0x23   : > { %p4554_p5 = pneg %p4553_p3 }
  0x25   : > { %p4559_p10 = pnand %p4557_p7, %p4554_p5 }
  0x27   : > { %4562 = shalt.err (!%p4559_p10)
}
  0x28   : > { %s4563_s4 = scalar_lea.vmem %s4828_s22, 256  ;;  %p4571_p6 = scmp.lt.s32.totalorder %s4828_s22, %s4828_s22 }
  0x29   : > { %p4564_p9 = scmp.ne.s32.totalorder %s4828_s22, %s4563_s4  ;;  %p4572_p13 = scmp.lt.s32.totalorder %s4563_s4, %s4563_s4 }
  0x2b   : > { %p4566_p1 = pnand %p4564_p9, %p4539_p0  ;;  %p4573_p3 = por %p4572_p13, %p4571_p6 }
  0x2d   : > { %p4567_p2 = pneg %p4566_p1 }
  0x2f   : > { %p4574_p4 = pnand %p4573_p3, %p4567_p2 }
  0x31   : > { %4577 = shalt.err (!%p4574_p4)
}
  0x32   : > { %4390 = dma.hbm_to_vmem [thread:$0]  (!%p4832_p11), %s7205_s2, 256, %s4828_s22, [#allocation8]  }
  0x33   : > { %s4895_s7 = scalar_select %p4842_p12, %s4678_s14, %s28_s26  }
  0x34   : > { %p35_p1 = scmp.ne.s32.totalorder %s4678_s14, %s4674_s13  ;;  %p36_p2 = scmp.eq.s32.totalorder %s4682_s15, 0 }
  0x35   : > { %p4401_p4 = scmp.lt.s32.totalorder %s4682_s15, 2  ;;  %s153_s23 = sand.u32 1, %s4678_s14  }
  0x36   : > { %p37_p6 = por %p36_p2, %p35_p1  ;;  %p7308_p9 = scmp.eq.s32.totalorder %s4802_s16, 1 }
  0x37   : > { %s4258_s9 = sshll.u32 %s153_s23, 3  ;;  %s4370_s10 = sshll.u32 %s4682_s15, 7 }
  0x38   : > { %p4904_p0 = por %p7308_p9, %p35_p1  ;;  %s4912_s22 = scalar_lea.hbm %s7203_s0, %s4370_s10 }
  0x39   : > { %s157_s26 = scalar_lea.vmem [#allocation2], %s4258_s9  ;;  %p4916_p11 = pnand %p4401_p4, %p37_p6 }
  0x3a   : > { %s7309_s8 = scalar_select %p4904_p0, 1, 0 }
  0x3b   : > { %s165_s27 = sshll.u32 %s157_s26, 4  ;;  %s154_s25 = scalar_lea.sflag [#allocation3], %s153_s23  ;;  %s4914_s27 = int_to_ptr.vmem [resolvable:$true] %s165_s27 }
  0x3c   : > { %s4578_s28 = scalar_lea.hbm %s4912_s22, 128  ;;  %p4580_p5 = pneg %p4916_p11 }
  0x3d   : > { %p4579_p12 = scmp.ne.s32.totalorder %s4912_s22, %s4578_s28  ;;  %s4583_s4 = scalar_lea.hbm %s7203_s0, 256 }
  0x3e   : > { %p4584_p13 = scmp.lt.u32.totalorder %s4912_s22, %s7203_s0  ;;  %p4585_p3 = scmp.lt.u32.totalorder %s4583_s4, %s4578_s28 }
  0x3f   : > { %p4581_p7 = pnand %p4580_p5, %p4579_p12  ;;  %p4587_p2 = scmp.lt.u32.totalorder %s4578_s28, %s4912_s22 }
  0x40   : > { %p4586_p1 = por %p4585_p3, %p4584_p13 }
  0x41   : > { %p4582_p10 = pneg %p4581_p7 }
  0x42   : > { %p4588_p4 = por %p4587_p2, %p4586_p1 }
  0x44   : > { %p4589_p6 = pnand %p4588_p4, %p4582_p10 }
  0x46   : > { %4592 = shalt.err (!%p4589_p6)
}
  0x47   : > { %s4593_s23 = scalar_lea.vmem %s4914_s27, 128  ;;  %s4686_s9 = smov [#allocation2]  }
  0x48   : > { %p4594_p9 = scmp.ne.s32.totalorder %s4914_s27, %s4593_s23  ;;  %s4598_s10 = sshll.u32 %s4686_s9, 4  ;;  %s4599_s10 = int_to_ptr.vmem [resolvable:$false] %s4598_s10 }
  0x49   : > { %s4600_s11 = scalar_lea.vmem %s4599_s10, 256  ;;  %p4601_p0 = scmp.lt.s32.totalorder %s4914_s27, %s4599_s10 }
  0x4a   : > { %p4596_p12 = pnand %p4594_p9, %p4580_p5  ;;  %p4602_p13 = scmp.lt.s32.totalorder %s4600_s11, %s4593_s23 }
  0x4c   : > { %p4597_p7 = pneg %p4596_p12  ;;  %p4603_p3 = por %p4602_p13, %p4601_p0 }
  0x4e   : > { %p4604_p1 = pnand %p4603_p3, %p4597_p7 }
  0x50   : > { %4607 = shalt.err (!%p4604_p1)
}
  0x51   : > { %4394 = dma.hbm_to_vmem [thread:$0]  (!%p4916_p11), %s4912_s22, 128, %s4914_s27, %s154_s25  }
  0x52   : > { %174 = sbr.rel (%p4821_p8) target bundleno = 8136 (0x1fc8), region = 32 }
  0x59   : > { %s4948_s17 = sand.u32 1, %s4674_s13   ;;  %p7311_p0 = scmp.ne.s32.totalorder %s7303_s18, 0 }
  0x5a   : > { %s4262_s26 = sshll.u32 %s4948_s17, 3  ;;  %s177_s28 = scalar_lea.sflag [#allocation3], %s4948_s17 }
  0x5b   : > { %s4954_s29 = scalar_lea.vmem [#allocation2], %s4262_s26 }
  0x5c   : > { %4653 = dma.done.wait (%p7311_p0), %s177_s28, 128  }
  0x5d   : > { %4655 = vsyncadd (%p7311_p0), %s177_s28, 4294967168  ;;  %p7312_p11 = scmp.eq.s32.totalorder %s4802_s16, 0 }
  0x5f   : > { %4657 = dma.done.wait (%p7312_p11), [#allocation5], 16   ;;  %p7313_p8 = pmov %p7312_p11 }
  0x61   : > { %4659 = vsyncadd (%p7313_p8), [#allocation5], 4294967280  ;;  %p7314_p5 = pmov %p7313_p8 }
  0x63   : > { %4661 = dma.done.wait (%p7314_p5), [#allocation8], 256   ;;  %p7315_p10 = pmov %p7314_p5 }
  0x65   : > { %4663 = vsyncadd (%p7315_p10), [#allocation8], 4294967040 }
  0x66   : > { %193 = sfence }
  0x67   : > { %v291_v0 = vlaneseq  ;;  %s4267_s20 = sld [smem:[#allocation6 + $0x1]]  ;;  %s4268_s22 = sld [smem:[#allocation6 + $0x32]]  ;;  %v212_v2 = vld [vmem:[%s4954_s29] sm:$0xff]  ;;  %vm216_vm0 = vcmask 1043456   ;;  %vm254_vm1 = vcmask 416768   ;;  %vm339_vm2 = vcmask 7168  }
  0x68   : > { %s4269_s18 = sld [smem:[#allocation6 + $0x2]]  ;;  %v234_v3 = vsel %vm216_vm0, %v212_v2, -inf  ;;  %v217_v4 = vsel %vm216_vm0, %v212_v2, 0.0  ;;  %v214_v5 = vcombine.high %v212_v2, %v212_v2  ;;  %v4969_v6 = vld [vmem:[#allocation7 + $0x1] ss:$8 sm:$0x3] }
  0x69   : > { %v292_v1 = vshrl.u32 %v291_v0, 7  ;;  %v235_v7 = vrot.slane %v234_v3, 4  ;;  %v218_v8 = vrot.slane %v217_v4, 4  ;;  %v4976_v19 = vld [vmem:[#allocation7 + $0x2] ss:$8 sm:$0x3] }
  0x6a   : > { %v241_v11 = vsel %vm216_vm0, %v214_v5, -inf  ;;  %v224_v12 = vsel %vm216_vm0, %v214_v5, 0.0  ;;  %s4687_s27 = smov 1   ;;  %s4270_s21 = sld [smem:[#allocation6 + $0x33]]  ;;  %vm417_vm3 = vcmask 15360   ;;  %vm495_vm4 = vcmask 23552  }
  0x6b   : > { %v4971_v9 = vsub.s32 0, %v292_v1  ;;  %v4973_v10 = vsub.s32 1, %v292_v1  ;;  %v236_v14 = vmax.f32 %v234_v3, %v235_v7  ;;  %v219_v15 = vadd.f32 %v218_v8, %v217_v4  ;;  %s4271_s25 = sld [smem:[#allocation6 + $0x3]]  ;;  %s4688_s30 = smov 2  }
  0x6c   : > { %v242_v16 = vrot.slane %v241_v11, 4  ;;  %v225_v20 = vrot.slane %v224_v12, 4  ;;  %s4272_s4 = sld [smem:[#allocation6 + $0x34]]  ;;  %s4689_s5 = smov 51   ;;  %vm573_vm5 = vcmask 31744   ;;  %vm651_vm6 = vcmask 39936  }
  0x6d   : > { %v324_v13 = vstv %s4267_s20  ;;  %v363_v18 = vstv %s4268_s22  ;;  %v237_v23 = vrot.slane %v236_v14, 2  ;;  %v220_v24 = vrot.slane %v219_v15, 2  ;;  %v4989_v52 = vld [vmem:[#allocation7 + $0x3] ss:$8 sm:$0x3]  ;;  %s4273_s6 = sld [smem:[#allocation6 + $0x4]] }
  0x6e   : > { %v325_v17 = vmul.f32 %v324_v13, %v4969_v6  ;;  %v364_v21 = vmul.f32 %v363_v18, %v4969_v6  ;;  %v402_v22 = vstv %s4269_s18  ;;  %v243_v27 = vmax.f32 %v241_v11, %v242_v16  ;;  %s4274_s23 = sld [smem:[#allocation6 + $0x35]]  ;;  %v4999_v61 = vld [vmem:[#allocation7 + $0x4] ss:$8 sm:$0x3]  ;;  %s4690_s10 = smov 3  }
  0x6f   : > { %v403_v29 = vmul.f32 %v402_v22, %v4976_v19  ;;  %v221_v30 = vadd.f32 %v220_v24, %v219_v15  ;;  %v238_v32 = vmax.f32 %v236_v14, %v237_v23  ;;  %v226_v34 = vadd.f32 %v225_v20, %v224_v12  ;;  %s4275_s9 = sld [smem:[#allocation6 + $0x5]]  ;;  %s4276_s11 = sld [smem:[#allocation6 + $0x36]]  ;;  %v5007_v7 = vld [vmem:[#allocation7 + $0x5] ss:$8 sm:$0x3] }
  0x70   : > { %v334_v25 = vrot.slane %v325_v17, %v4973_v10  ;;  %v330_v26 = vrot.slane %v325_v17, %v4971_v9  ;;  %v369_v28 = vrot.slane %v364_v21, %v4971_v9  ;;  %v373_v31 = vrot.slane %v364_v21, %v4973_v10  ;;  %s4277_s28 = sld [smem:[#allocation6 + $0x6]]  ;;  %s4691_s20 = smov 4   ;;  %v5015_v18 = vld [vmem:[#allocation7 + $0x6] ss:$8 sm:$0x3] }
  0x71   : > { %v244_v33 = vrot.slane %v243_v27, 2  ;;  %v222_v35 = vrot.slane %v221_v30, 1  ;;  %v227_v36 = vrot.slane %v226_v34, 2  ;;  %v412_v37 = vrot.slane %v403_v29, %v4973_v10  ;;  %s4278_s22 = sld [smem:[#allocation6 + $0x37]]  ;;  %p7719_p4 = scmp.ne.s32.totalorder %s7309_s8, 0 }
  0x72   : > { %337 = vrot.lane.b32.xlu1 %v334_v25, %s4687_s27  ;;  %335 = vrot.lane.b32.xlu0 %v330_v26, %s4687_s27  ;;  %v408_v38 = vrot.slane %v403_v29, %v4971_v9  ;;  %v239_v39 = vrot.slane %v238_v32, 1  ;;  %v441_v48 = vstv %s4270_s21  ;;  %v480_v53 = vstv %s4271_s25  ;;  %s4279_s18 = sld [smem:[#allocation6 + $0x7]]  ;;  %s4280_s21 = sld [smem:[#allocation6 + $0x38]] }
  0x73   : > { %v223_v40 = vadd.f32 %v222_v35, %v221_v30  ;;  %v245_v41 = vmax.f32 %v243_v27, %v244_v33  ;;  %v228_v42 = vadd.f32 %v227_v36, %v226_v34  ;;  %v442_v51 = vmul.f32 %v441_v48, %v4976_v19  ;;  %s4281_s25 = sld [smem:[#allocation6 + $0x8]] }
  0x74   : > { %v240_v44 = vmax.f32 %v238_v32, %v239_v39  ;;  %v481_v56 = vmul.f32 %v480_v53, %v4989_v52  ;;  %v519_v57 = vstv %s4272_s4  ;;  %v558_v62 = vstv %s4273_s6  ;;  %s4694_s4 = smov 16   ;;  %s4695_s6 = smov 17  }
  0x75   : > { %v229_v43 = vrot.slane %v228_v42, 1  ;;  %v232_v45 = vmul.f32 0.25, %v223_v40  ;;  %v246_v46 = vrot.slane %v245_v41, 1  ;;  %v447_v54 = vrot.slane %v442_v51, %v4971_v9 }
  0x76   : > { %374 = vrot.lane.b32.xlu1 %v369_v28, %s4687_s27  ;;  %376 = vrot.lane.b32.xlu0 %v373_v31, %s4687_s27  ;;  %v451_v55 = vrot.slane %v442_v51, %v4973_v10  ;;  %v490_v58 = vrot.slane %v481_v56, %v4973_v10  ;;  %v486_v59 = vrot.slane %v481_v56, %v4971_v9  ;;  %v597_v2 = vstv %s4274_s23  ;;  %s4692_s27 = smov 5   ;;  %v5023_v28 = vld [vmem:[#allocation7] ss:$8 sm:$0x3]  ;;  %s4696_s23 = smov 127  }
  0x77   : > { %v230_v47 = vadd.f32 %v229_v43, %v228_v42  ;;  %v247_v49 = vmax.f32 %v245_v41, %v246_v46  ;;  %v520_v60 = vmul.f32 %v519_v57, %v4989_v52  ;;  %v559_v1 = vmul.f32 %v558_v62, %v4999_v61 }
  0x78   : > { %v598_v5 = vmul.f32 %v597_v2, %v4999_v61  ;;  %v636_v8 = vstv %s4275_s9  ;;  %v675_v14 = vstv %s4276_s11  ;;  %v714_v20 = vstv %s4277_s28  ;;  %s4697_s9 = smov 126   ;;  %s4699_s11 = smov 124  }
  0x79   : > { %v233_v50 = vmul.f32 0.25, %v230_v47  ;;  %v525_v63 = vrot.slane %v520_v60, %v4971_v9  ;;  %v529_v0 = vrot.slane %v520_v60, %v4973_v10  ;;  %v568_v3 = vrot.slane %v559_v1, %v4973_v10  ;;  %s4700_s28 = smov 123  }
  0x7a   : > { %415 = vrot.lane.b32.xlu1 %v412_v37, %s4688_s30  ;;  %413 = vrot.lane.b32.xlu0 %v408_v38, %s4688_s30  ;;  %v564_v4 = vrot.slane %v559_v1, %v4971_v9  ;;  %v603_v11 = vrot.slane %v598_v5, %v4971_v9  ;;  %v607_v12 = vrot.slane %v598_v5, %v4973_v10  ;;  %v753_v24 = vstv %s4278_s22  ;;  %s4282_s22 = sld [smem:[#allocation6 + $0x39]] }
  0x7b   : > { %v637_v13 = vmul.f32 %v636_v8, %v5007_v7  ;;  %v676_v17 = vmul.f32 %v675_v14, %v5007_v7  ;;  %v715_v23 = vmul.f32 %v714_v20, %v5015_v18  ;;  %v754_v27 = vmul.f32 %v753_v24, %v5015_v18 }
  0x7c   : > { %v792_v29 = vstv %s4279_s18  ;;  %v818_v33 = vstv %s4280_s21  ;;  %v845_v37 = vstv %s4281_s25  ;;  %vm729_vm7 = vcmask 48128   ;;  %s4283_s18 = sld [smem:[#allocation6 + $0x9]]  ;;  %s4284_s21 = sld [smem:[#allocation6 + $0x3a]] }
  0x7d   : > { %v646_v15 = vrot.slane %v637_v13, %v4973_v10  ;;  %v642_v16 = vrot.slane %v637_v13, %v4971_v9  ;;  %v681_v21 = vrot.slane %v676_v17, %v4971_v9  ;;  %v685_v22 = vrot.slane %v676_v17, %v4973_v10  ;;  %s4285_s25 = sld [smem:[#allocation6 + $0xa]] }
  0x7e   : > { %263 = vrot.lane.b32.xlu1 %v240_v44, %s4689_s5  ;;  %250 = vrot.lane.b32.xlu0 %v232_v45, %s4689_s5  ;;  %v724_v25 = vrot.slane %v715_v23, %v4973_v10  ;;  %v720_v26 = vrot.slane %v715_v23, %v4971_v9  ;;  %v759_v30 = vrot.slane %v754_v27, %v4971_v9  ;;  %vm860_vm8 = vcmask 138240  }
  0x7f   : > { %v763_v31 = vrot.slane %v754_v27, %v4973_v10  ;;  %v793_v32 = vmul.f32 %v792_v29, %v5023_v28  ;;  %v819_v36 = vmul.f32 %v818_v33, %v5023_v28  ;;  %v846_v40 = vmul.f32 %v845_v37, %v4969_v6 }
  0x80   : > { %vm941_vm9 = vcmask 146432   ;;  %vm1022_vm10 = vcmask 154624   ;;  %vm1103_vm11 = vcmask 162816   ;;  %vm1184_vm12 = vcmask 171008  }
  0x81   : > { %v802_v34 = vrot.slane %v793_v32, %v4973_v10  ;;  %v798_v35 = vrot.slane %v793_v32, %v4971_v9  ;;  %v828_v38 = vrot.slane %v819_v36, %v4973_v10  ;;  %v824_v39 = vrot.slane %v819_v36, %v4971_v9 }
  0x82   : > { %265 = vrot.lane.b32.xlu1 %v247_v49, %s4689_s5  ;;  %252 = vrot.lane.b32.xlu0 %v233_v50, %s4689_s5  ;;  %v855_v41 = vrot.slane %v846_v40, %v4973_v10  ;;  %v851_v42 = vrot.slane %v846_v40, %v4971_v9  ;;  %vm1265_vm13 = vcmask 179200   ;;  %vm7295_vm14 = vcmask 261120  }
  0x83   : > { %vm1424_vm15 = vcmask 269312   ;;  %vm1502_vm0 = vcmask 277504  }
  0x86   : > { %452 = vrot.lane.b32.xlu1 %v447_v54, %s4688_s30  ;;  %454 = vrot.lane.b32.xlu0 %v451_v55, %s4688_s30  ;;  %s4693_s30 = smov 6  }
  0x8a   : > { %493 = vrot.lane.b32.xlu1 %v490_v58, %s4690_s10  ;;  %491 = vrot.lane.b32.xlu0 %v486_v59, %s4690_s10 }
  0x8e   : > { %530 = vrot.lane.b32.xlu1 %v525_v63, %s4690_s10  ;;  %532 = vrot.lane.b32.xlu0 %v529_v0, %s4690_s10  ;;  %s4698_s10 = smov 125  }
  0x92   : > { %571 = vrot.lane.b32.xlu1 %v568_v3, %s4691_s20  ;;  %569 = vrot.lane.b32.xlu0 %v564_v4, %s4691_s20 }
  0x96   : > { %608 = vrot.lane.b32.xlu1 %v603_v11, %s4691_s20  ;;  %610 = vrot.lane.b32.xlu0 %v607_v12, %s4691_s20  ;;  %s4701_s20 = smov 122  }
  0x9a   : > { %649 = vrot.lane.b32.xlu1 %v646_v15, %s4692_s27  ;;  %647 = vrot.lane.b32.xlu0 %v642_v16, %s4692_s27 }
  0x9e   : > { %686 = vrot.lane.b32.xlu1 %v681_v21, %s4692_s27  ;;  %688 = vrot.lane.b32.xlu0 %v685_v22, %s4692_s27  ;;  %s4702_s27 = smov 18  }
  0xa2   : > { %727 = vrot.lane.b32.xlu1 %v724_v25, %s4693_s30  ;;  %725 = vrot.lane.b32.xlu0 %v720_v26, %s4693_s30 }
  0xa6   : > { %764 = vrot.lane.b32.xlu1 %v759_v30, %s4693_s30  ;;  %766 = vrot.lane.b32.xlu0 %v763_v31, %s4693_s30  ;;  %s4703_s30 = smov 19  }
  0xaa   : > { %805 = vrot.lane.b32.xlu1 %v802_v34, %s4694_s4  ;;  %803 = vrot.lane.b32.xlu0 %v798_v35, %s4694_s4 }
  0xae   : > { %831 = vrot.lane.b32.xlu1 %v828_v38, %s4694_s4  ;;  %829 = vrot.lane.b32.xlu0 %v824_v39, %s4694_s4  ;;  %s4286_s4 = sld [smem:[#allocation6 + $0x3b]] }
  0xb2   : > { %858 = vrot.lane.b32.xlu1 %v855_v41, %s4695_s6  ;;  %856 = vrot.lane.b32.xlu0 %v851_v42, %s4695_s6 }
  0xe4   : > { %v5038_v43 = vpop.permute.xlu1 %337  ;;  %v5040_v44 = vpop.permute.xlu0 %335 }
  0xe8   : > { %v375_v45 = vpop.permute.xlu1 %374  ;;  %v5042_v46 = vpop.permute.xlu0 %376 }
  0xe9   : > { %v378_v58 = vsel %vm339_vm2, %v375_v45, %v5042_v46 }
  0xec   : > { %v5044_v47 = vpop.permute.xlu1 %415  ;;  %v5046_v48 = vpop.permute.xlu0 %413 }
  0xf0   : > { %v264_v49 = vpop.permute.xlu1 %263  ;;  %v5048_v50 = vpop.permute.xlu0 %250 }
  0xf1   : > { %v5051_v51 = vsel %vm254_vm1, 0.0, %v264_v49  ;;  %v5055_v53 = vsel %vm254_vm1, 0.0, %v5048_v50 }
  0xf2   : > { %v382_v54 = vmul.f32 %v375_v45, %v5051_v51  ;;  %v344_v55 = vmul.f32 %v5040_v44, %v5055_v53  ;;  %v422_v62 = vmul.f32 %v5046_v48, %v5055_v53 }
  0xf4   : > { %388 = vrot.lane.b32.xlu1 %v382_v54, %s4696_s23  ;;  %v266_v56 = vpop.permute.xlu1 %265  ;;  %350 = vrot.lane.b32.xlu0 %v344_v55, %s4696_s23  ;;  %v5062_v57 = vpop.permute.xlu0 %252 }
  0xf5   : > { %v5067_v59 = vsel %vm254_vm1, %v264_v49, %v266_v56  ;;  %v5124_v40 = vsel %vm254_vm1, %v266_v56, 0.0  ;;  %v5136_v54 = vsel %vm254_vm1, %v5062_v57, 0.0 }
  0xf6   : > { %v383_v60 = vmul.f32 %v378_v58, %v5067_v59  ;;  %v384_v45 = vmul.f32 %v5042_v46, %v5124_v40  ;;  %v346_v56 = vmul.f32 %v5038_v43, %v5136_v54  ;;  %v424_v58 = vmul.f32 %v5044_v47, %v5136_v54 }
  0xf8   : > { %v453_v63 = vpop.permute.xlu1 %452  ;;  %390 = vrot.lane.b32.xlu0 %v383_v60, %s4696_s23  ;;  %v5073_v0 = vpop.permute.xlu0 %454 }
  0xf9   : > { %v460_v1 = vmul.f32 %v453_v63, %v5051_v51  ;;  %v456_v2 = vsel %vm417_vm3, %v453_v63, %v5073_v0  ;;  %v462_v55 = vmul.f32 %v5073_v0, %v5124_v40 }
  0xfa   : > { %v461_v5 = vmul.f32 %v456_v2, %v5067_v59 }
  0xfb   : > { %466 = vrot.lane.b32.xlu1 %v460_v1, %s4697_s9 }
  0xfc   : > { %v5079_v3 = vpop.permute.xlu1 %493  ;;  %428 = vrot.lane.b32.xlu0 %v422_v62, %s4697_s9  ;;  %v5082_v4 = vpop.permute.xlu0 %491 }
  0xfd   : > { %v500_v8 = vmul.f32 %v5082_v4, %v5055_v53  ;;  %v502_v62 = vmul.f32 %v5079_v3, %v5136_v54 }
 0x100   : > { %v531_v11 = vpop.permute.xlu1 %530  ;;  %468 = vrot.lane.b32.xlu0 %v461_v5, %s4697_s9  ;;  %v533_v12 = vpop.permute.xlu0 %532 }
 0x101   : > { %v538_v13 = vmul.f32 %v531_v11, %v5051_v51  ;;  %v534_v14 = vsel %vm495_vm4, %v531_v11, %v533_v12  ;;  %v540_v46 = vmul.f32 %v533_v12, %v5124_v40  ;;  %v5171_v11 = vsel %vm254_vm1, %v5048_v50, %v5062_v57 }
 0x102   : > { %v539_v17 = vmul.f32 %v534_v14, %v5067_v59  ;;  %v418_v57 = vsel %vm417_vm3, %v5046_v48, %v5044_v47  ;;  %vm1658_vm3 = vcmask 293888  }
 0x103   : > { %544 = vrot.lane.b32.xlu1 %v538_v13, %s4698_s10  ;;  %v340_v13 = vsel %vm339_vm2, %v5040_v44, %v5038_v43  ;;  %v423_v43 = vmul.f32 %v418_v57, %v5171_v11  ;;  %v885_v44 = vstv %s4282_s22  ;;  %s4705_s22 = smov 21   ;;  %vm1580_vm2 = vcmask 285696  }
 0x104   : > { %v5091_v15 = vpop.permute.xlu1 %571  ;;  %506 = vrot.lane.b32.xlu0 %v500_v8, %s4698_s10  ;;  %v5094_v16 = vpop.permute.xlu0 %569 }
 0x105   : > { %v578_v23 = vmul.f32 %v5094_v16, %v5055_v53  ;;  %v580_v1 = vmul.f32 %v5091_v15, %v5136_v54  ;;  %v574_v48 = vsel %vm573_vm5, %v5094_v16, %v5091_v15 }
 0x108   : > { %v609_v20 = vpop.permute.xlu1 %608  ;;  %546 = vrot.lane.b32.xlu0 %v539_v17, %s4698_s10  ;;  %v611_v21 = vpop.permute.xlu0 %610  ;;  %v345_v17 = vmul.f32 %v340_v13, %v5171_v11 }
 0x109   : > { %v616_v22 = vmul.f32 %v609_v20, %v5051_v51  ;;  %v612_v24 = vsel %vm573_vm5, %v609_v20, %v611_v21  ;;  %v618_v60 = vmul.f32 %v611_v21, %v5124_v40  ;;  %v496_v21 = vsel %vm495_vm4, %v5082_v4, %v5079_v3 }
 0x10a   : > { %v617_v27 = vmul.f32 %v612_v24, %v5067_v59  ;;  %v886_v24 = vmul.f32 %v885_v44, %v4969_v6  ;;  %v501_v47 = vmul.f32 %v496_v21, %v5171_v11  ;;  %v579_v4 = vmul.f32 %v574_v48, %v5171_v11 }
 0x10b   : > { %622 = vrot.lane.b32.xlu1 %v616_v22, %s4699_s11  ;;  %vm1736_vm4 = vcmask 302080   ;;  %vm1814_vm5 = vcmask 310272  }
 0x10c   : > { %v5103_v25 = vpop.permute.xlu1 %649  ;;  %584 = vrot.lane.b32.xlu0 %v578_v23, %s4699_s11  ;;  %v5106_v26 = vpop.permute.xlu0 %647  ;;  %v895_v3 = vrot.slane %v886_v24, %v4973_v10 }
 0x10d   : > { %v656_v32 = vmul.f32 %v5106_v26, %v5055_v53  ;;  %v658_v12 = vmul.f32 %v5103_v25, %v5136_v54  ;;  %v652_v6 = vsel %vm651_vm6, %v5106_v26, %v5103_v25  ;;  %v891_v26 = vrot.slane %v886_v24, %v4971_v9 }
 0x10e   : > { %v657_v15 = vmul.f32 %v652_v6, %v5171_v11  ;;  %v926_v6 = vstv %s4283_s18  ;;  %s4290_s18 = sld [smem:[#allocation6 + $0x3d]] }
 0x110   : > { %v687_v29 = vpop.permute.xlu1 %686  ;;  %624 = vrot.lane.b32.xlu0 %v617_v27, %s4699_s11  ;;  %v689_v30 = vpop.permute.xlu0 %688 }
 0x111   : > { %v694_v31 = vmul.f32 %v687_v29, %v5051_v51  ;;  %v690_v33 = vsel %vm651_vm6, %v687_v29, %v689_v30  ;;  %v696_v0 = vmul.f32 %v689_v30, %v5124_v40  ;;  %vm1892_vm6 = vcmask 392192  }
 0x112   : > { %v695_v36 = vmul.f32 %v690_v33, %v5067_v59 }
 0x113   : > { %700 = vrot.lane.b32.xlu1 %v694_v31, %s4700_s28 }
 0x114   : > { %v5115_v34 = vpop.permute.xlu1 %727  ;;  %662 = vrot.lane.b32.xlu0 %v656_v32, %s4700_s28  ;;  %v5118_v35 = vpop.permute.xlu0 %725 }
 0x115   : > { %v734_v41 = vmul.f32 %v5118_v35, %v5055_v53  ;;  %v736_v20 = vmul.f32 %v5115_v34, %v5136_v54  ;;  %v730_v16 = vsel %vm729_vm7, %v5118_v35, %v5115_v34 }
 0x116   : > { %v735_v29 = vmul.f32 %v730_v16, %v5171_v11 }
 0x118   : > { %v765_v37 = vpop.permute.xlu1 %764  ;;  %702 = vrot.lane.b32.xlu0 %v695_v36, %s4700_s28  ;;  %v767_v38 = vpop.permute.xlu0 %766 }
 0x119   : > { %v772_v39 = vmul.f32 %v765_v37, %v5051_v51  ;;  %v768_v42 = vsel %vm729_vm7, %v765_v37, %v767_v38  ;;  %v774_v5 = vmul.f32 %v767_v38, %v5124_v40  ;;  %vm1973_vm7 = vcmask 400384  }
 0x11a   : > { %v773_v49 = vmul.f32 %v768_v42, %v5067_v59 }
 0x11b   : > { %778 = vrot.lane.b32.xlu1 %v772_v39, %s4701_s20 }
 0x11c   : > { %740 = vrot.lane.b32.xlu0 %v734_v41, %s4701_s20  ;;  %v5154_v63 = vpop.permute.xlu0 %803  ;;  %v5161_v2 = vpop.permute.xlu1 %805 }
 0x11f   : > { %392 = vrot.lane.b32.xlu1 %v384_v45, %s4696_s23 }
 0x120   : > { %780 = vrot.lane.b32.xlu0 %v773_v49, %s4701_s20  ;;  %v5166_v8 = vpop.permute.xlu0 %829  ;;  %v5180_v14 = vpop.permute.xlu1 %831 }
 0x121   : > { %7316 = vst [vmem:[#allocation14_spill] sm:$0xff] %v5180_v14 }
 0x123   : > { %470 = vrot.lane.b32.xlu1 %v462_v55, %s4697_s9 }
 0x124   : > { %354 = vrot.lane.b32.xlu0 %v346_v56, %s4696_s23  ;;  %v857_v50 = vpop.permute.xlu0 %856  ;;  %v859_v23 = vpop.permute.xlu1 %858 }
 0x125   : > { %v865_v22 = vmul.f32 %v857_v50, %v5055_v53  ;;  %v867_v27 = vmul.f32 %v859_v23, %v5136_v54  ;;  %v861_v30 = vsel %vm860_vm8, %v857_v50, %v859_v23 }
 0x126   : > { %v866_v25 = vmul.f32 %v861_v30, %v5171_v11 }
 0x127   : > { %548 = vrot.lane.b32.xlu1 %v540_v46, %s4698_s10 }
 0x128   : > { %432 = vrot.lane.b32.xlu0 %v424_v58, %s4697_s9 }
 0x12b   : > { %626 = vrot.lane.b32.xlu1 %v618_v60, %s4699_s11 }
 0x12c   : > { %510 = vrot.lane.b32.xlu0 %v502_v62, %s4698_s10 }
 0x12f   : > { %704 = vrot.lane.b32.xlu1 %v696_v0, %s4700_s28 }
 0x130   : > { %588 = vrot.lane.b32.xlu0 %v580_v1, %s4699_s11 }
 0x133   : > { %782 = vrot.lane.b32.xlu1 %v774_v5, %s4701_s20 }
 0x134   : > { %666 = vrot.lane.b32.xlu0 %v658_v12, %s4700_s28 }
 0x137   : > { %352 = vrot.lane.b32.xlu1 %v345_v17, %s4696_s23 }
 0x138   : > { %744 = vrot.lane.b32.xlu0 %v736_v20, %s4701_s20 }
 0x13b   : > { %430 = vrot.lane.b32.xlu1 %v423_v43, %s4697_s9 }
 0x13c   : > { %871 = vrot.lane.b32.xlu0 %v865_v22, %s4696_s23 }
 0x13f   : > { %508 = vrot.lane.b32.xlu1 %v501_v47, %s4698_s10 }
 0x140   : > { %875 = vrot.lane.b32.xlu0 %v867_v27, %s4696_s23 }
 0x143   : > { %586 = vrot.lane.b32.xlu1 %v579_v4, %s4699_s11 }
 0x144   : > { %898 = vrot.lane.b32.xlu0 %v895_v3, %s4695_s6 }
 0x147   : > { %664 = vrot.lane.b32.xlu1 %v657_v15, %s4700_s28 }
 0x14b   : > { %742 = vrot.lane.b32.xlu1 %v735_v29, %s4701_s20  ;;  %v927_v29 = vmul.f32 %v926_v6, %v4976_v19 }
 0x14f   : > { %873 = vrot.lane.b32.xlu1 %v866_v25, %s4696_s23 }
 0x153   : > { %896 = vrot.lane.b32.xlu1 %v891_v26, %s4695_s6  ;;  %s4287_s6 = sld [smem:[#allocation6 + $0xb]] }
 0x166   : > { %v5224_v31 = vpop.permute.xlu0 %350  ;;  %v5234_v36 = vpop.permute.xlu1 %388 }
 0x167   : > { %7317 = vst [vmem:[#allocation15_spill] sm:$0xff] %v5224_v31  ;;  %7322 = vst [vmem:[#allocation20_spill] sm:$0xff] %v5234_v36  ;;  %v5600_v36 = vld [vmem:[#allocation7 + $0x4] ss:$8 sm:$0x3] }
 0x16a   : > { %v5226_v32 = vpop.permute.xlu0 %390 }
 0x16b   : > { %7318 = vst [vmem:[#allocation16_spill] sm:$0xff] %v5226_v32  ;;  %v5634_v32 = vld [vmem:[#allocation7 + $0x5] ss:$8 sm:$0x3] }
 0x16d   : > { %v5238_v38 = vpop.permute.xlu1 %466 }
 0x16e   : > { %v5228_v33 = vpop.permute.xlu0 %428  ;;  %7324 = vst [vmem:[#allocation22_spill] sm:$0xff] %v5238_v38 }
 0x16f   : > { %7319 = vst [vmem:[#allocation17_spill] sm:$0xff] %v5228_v33 }
 0x172   : > { %v5230_v34 = vpop.permute.xlu0 %468 }
 0x173   : > { %7320 = vst [vmem:[#allocation18_spill] sm:$0xff] %v5230_v34 }
 0x175   : > { %v5242_v41 = vpop.permute.xlu1 %544 }
 0x176   : > { %v5232_v35 = vpop.permute.xlu0 %506  ;;  %7326 = vst [vmem:[#allocation24_spill] sm:$0xff] %v5242_v41 }
 0x177   : > { %7321 = vst [vmem:[#allocation19_spill] sm:$0xff] %v5232_v35 }
 0x17a   : > { %v5236_v37 = vpop.permute.xlu0 %546 }
 0x17b   : > { %7323 = vst [vmem:[#allocation21_spill] sm:$0xff] %v5236_v37 }
 0x17d   : > { %v5246_v45 = vpop.permute.xlu1 %622 }
 0x17e   : > { %v5240_v39 = vpop.permute.xlu0 %584  ;;  %7328 = vst [vmem:[#allocation26_spill] sm:$0xff] %v5246_v45 }
 0x17f   : > { %7325 = vst [vmem:[#allocation23_spill] sm:$0xff] %v5240_v39 }
 0x182   : > { %v5244_v42 = vpop.permute.xlu0 %624 }
 0x183   : > { %7327 = vst [vmem:[#allocation25_spill] sm:$0xff] %v5244_v42 }
 0x185   : > { %v5250_v55 = vpop.permute.xlu1 %700 }
 0x186   : > { %v5248_v49 = vpop.permute.xlu0 %662  ;;  %7330 = vst [vmem:[#allocation28_spill] sm:$0xff] %v5250_v55 }
 0x187   : > { %7329 = vst [vmem:[#allocation27_spill] sm:$0xff] %v5248_v49 }
 0x18a   : > { %v5252_v56 = vpop.permute.xlu0 %702 }
 0x18b   : > { %7331 = vst [vmem:[#allocation29_spill] sm:$0xff] %v5252_v56 }
 0x18d   : > { %v5254_v46 = vpop.permute.xlu1 %778 }
 0x18e   : > { %7332 = vst [vmem:[#allocation30_spill] sm:$0xff] %v5254_v46  ;;  %v5256_v58 = vpop.permute.xlu0 %740 }
 0x18f   : > { %7333 = vst [vmem:[#allocation31_spill] sm:$0xff] %v5256_v58 }
 0x191   : > { %v5258_v60 = vpop.permute.xlu1 %392 }
 0x192   : > { %7334 = vst [vmem:[#allocation32_spill] sm:$0xff] %v5258_v60  ;;  %v5260_v62 = vpop.permute.xlu0 %780  ;;  %v5566_v60 = vld [vmem:[#allocation7 + $0x3] ss:$8 sm:$0x3] }
 0x193   : > { %7335 = vst [vmem:[#allocation33_spill] sm:$0xff] %v5260_v62 }
 0x195   : > { %v5262_v0 = vpop.permute.xlu1 %470 }
 0x196   : > { %7336 = vst [vmem:[#allocation34_spill] sm:$0xff] %v5262_v0  ;;  %v5264_v1 = vpop.permute.xlu0 %354 }
 0x197   : > { %7337 = vst [vmem:[#allocation35_spill] sm:$0xff] %v5264_v1 }
 0x199   : > { %v5266_v5 = vpop.permute.xlu1 %548 }
 0x19a   : > { %7338 = vst [vmem:[#allocation36_spill] sm:$0xff] %v5266_v5  ;;  %v5268_v12 = vpop.permute.xlu0 %432 }
 0x19b   : > { %7339 = vst [vmem:[#allocation37_spill] sm:$0xff] %v5268_v12 }
 0x19d   : > { %v5270_v13 = vpop.permute.xlu1 %626 }
 0x19e   : > { %7340 = vst [vmem:[#allocation38_spill] sm:$0xff] %v5270_v13  ;;  %v5272_v17 = vpop.permute.xlu0 %510 }
 0x19f   : > { %7341 = vst [vmem:[#allocation39_spill] sm:$0xff] %v5272_v17 }
 0x1a1   : > { %v5274_v20 = vpop.permute.xlu1 %704 }
 0x1a2   : > { %7342 = vst [vmem:[#allocation40_spill] sm:$0xff] %v5274_v20  ;;  %v5278_v57 = vpop.permute.xlu0 %588 }
 0x1a3   : > { %7344 = vst [vmem:[#allocation42_spill] sm:$0xff] %v5278_v57 }
 0x1a5   : > { %v5276_v50 = vpop.permute.xlu1 %782 }
 0x1a6   : > { %7343 = vst [vmem:[#allocation41_spill] sm:$0xff] %v5276_v50  ;;  %v5282_v44 = vpop.permute.xlu0 %666 }
 0x1a7   : > { %7346 = vst [vmem:[#allocation44_spill] sm:$0xff] %v5282_v44 }
 0x1a9   : > { %v5280_v43 = vpop.permute.xlu1 %352 }
 0x1aa   : > { %7345 = vst [vmem:[#allocation43_spill] sm:$0xff] %v5280_v43  ;;  %v5288_v23 = vpop.permute.xlu0 %744  ;;  %v5532_v43 = vld [vmem:[#allocation7 + $0x2] ss:$8 sm:$0x3] }
 0x1ab   : > { %7349 = vst [vmem:[#allocation47_spill] sm:$0xff] %v5288_v23  ;;  %v932_v23 = vrot.slane %v927_v29, %v4971_v9 }
 0x1ad   : > { %v5284_v21 = vpop.permute.xlu1 %430 }
 0x1ae   : > { %7347 = vst [vmem:[#allocation45_spill] sm:$0xff] %v5284_v21  ;;  %v5292_v47 = vpop.permute.xlu0 %871 }
 0x1b1   : > { %v5286_v22 = vpop.permute.xlu1 %508 }
 0x1b2   : > { %7348 = vst [vmem:[#allocation46_spill] sm:$0xff] %v5286_v22  ;;  %v5298_v3 = vpop.permute.xlu0 %875 }
 0x1b5   : > { %v5290_v24 = vpop.permute.xlu1 %586 }
 0x1b6   : > { %7350 = vst [vmem:[#allocation48_spill] sm:$0xff] %v5290_v24  ;;  %v899_v15 = vpop.permute.xlu0 %898 }
 0x1b7   : > { %v906_v58 = vmul.f32 %v899_v15, %v5124_v40 }
 0x1b9   : > { %v5294_v48 = vpop.permute.xlu1 %664 }
 0x1ba   : > { %7351 = vst [vmem:[#allocation49_spill] sm:$0xff] %v5294_v48 }
 0x1bd   : > { %v5296_v27 = vpop.permute.xlu1 %742 }
 0x1be   : > { %7352 = vst [vmem:[#allocation50_spill] sm:$0xff] %v5296_v27  ;;  %v936_v27 = vrot.slane %v927_v29, %v4973_v10 }
 0x1c1   : > { %v5300_v4 = vpop.permute.xlu1 %873 }
 0x1c5   : > { %v897_v16 = vpop.permute.xlu1 %896 }
 0x1c6   : > { %v900_v30 = vsel %vm860_vm8, %v897_v16, %v899_v15  ;;  %v904_v25 = vmul.f32 %v897_v16, %v5051_v51  ;;  %vm2054_vm8 = vcmask 408576  }
 0x1c7   : > { %v905_v26 = vmul.f32 %v900_v30, %v5067_v59 }
 0x1c8   : > { %910 = vrot.lane.b32.xlu1 %v904_v25, %s4696_s23 }
 0x1c9   : > { %912 = vrot.lane.b32.xlu0 %v905_v26, %s4696_s23  ;;  %v966_v26 = vstv %s4284_s21  ;;  %s4292_s21 = sld [smem:[#allocation6 + $0x3e]] }
 0x1cc   : > { %914 = vrot.lane.b32.xlu1 %v906_v58, %s4696_s23  ;;  %v967_v58 = vmul.f32 %v966_v26, %v4976_v19  ;;  %v1007_v26 = vstv %s4285_s25  ;;  %s4704_s23 = smov 20   ;;  %s4707_s25 = smov 32  }
 0x1cd   : > { %937 = vrot.lane.b32.xlu0 %v932_v23, %s4702_s27 }
 0x1ce   : > { %v976_v46 = vrot.slane %v967_v58, %v4973_v10  ;;  %v972_v62 = vrot.slane %v967_v58, %v4971_v9 }
 0x1d0   : > { %939 = vrot.lane.b32.xlu1 %v936_v27, %s4702_s27 }
 0x23a   : > { %v5312_v6 = vpop.permute.xlu1 %910 }
 0x23b   : > { %v5314_v16 = vpop.permute.xlu0 %912 }
 0x23e   : > { %v5316_v30 = vpop.permute.xlu1 %914 }
 0x23f   : > { %7353 = vst [vmem:[#allocation51_spill] sm:$0xff] %v5316_v30  ;;  %v938_v25 = vpop.permute.xlu0 %937 }
 0x240   : > { %v946_v50 = vmul.f32 %v938_v25, %v5055_v53 }
 0x242   : > { %v940_v15 = vpop.permute.xlu1 %939  ;;  %952 = vrot.lane.b32.xlu0 %v946_v50, %s4697_s9 }
 0x243   : > { %v942_v23 = vsel %vm941_vm9, %v938_v25, %v940_v15  ;;  %v948_v27 = vmul.f32 %v940_v15, %v5136_v54 }
 0x244   : > { %v947_v29 = vmul.f32 %v942_v23, %v5171_v11 }
 0x246   : > { %956 = vrot.lane.b32.xlu0 %v948_v27, %s4697_s9  ;;  %954 = vrot.lane.b32.xlu1 %v947_v29, %s4697_s9  ;;  %v1008_v27 = vmul.f32 %v1007_v26, %v4989_v52 }
 0x248   : > { %v1017_v49 = vrot.slane %v1008_v27, %v4973_v10 }
 0x24a   : > { %979 = vrot.lane.b32.xlu0 %v976_v46, %s4702_s27  ;;  %977 = vrot.lane.b32.xlu1 %v972_v62, %s4702_s27  ;;  %v1013_v46 = vrot.slane %v1008_v27, %v4971_v9  ;;  %s4706_s27 = smov 22  }
 0x2b4   : > { %v5328_v50 = vpop.permute.xlu0 %952 }
 0x2b8   : > { %v5330_v19 = vpop.permute.xlu0 %956  ;;  %v5332_v25 = vpop.permute.xlu1 %954 }
 0x2bc   : > { %v980_v15 = vpop.permute.xlu0 %979  ;;  %v978_v23 = vpop.permute.xlu1 %977 }
 0x2bd   : > { %v981_v29 = vsel %vm941_vm9, %v978_v23, %v980_v15  ;;  %v985_v44 = vmul.f32 %v978_v23, %v5051_v51  ;;  %v987_v62 = vmul.f32 %v980_v15, %v5124_v40  ;;  %vm2296_vm9 = vcmask 433152  }
 0x2be   : > { %v986_v58 = vmul.f32 %v981_v29, %v5067_v59 }
 0x2bf   : > { %991 = vrot.lane.b32.xlu1 %v985_v44, %s4697_s9 }
 0x2c0   : > { %993 = vrot.lane.b32.xlu0 %v986_v58, %s4697_s9  ;;  %v1047_v58 = vstv %s4286_s4  ;;  %s4295_s4 = sld [smem:[#allocation6 + $0xf]] }
 0x2c1   : > { %v1048_v27 = vmul.f32 %v1047_v58, %v4989_v52  ;;  %v1088_v58 = vstv %s4287_s6  ;;  %s4709_s6 = smov 33  }
 0x2c3   : > { %995 = vrot.lane.b32.xlu1 %v987_v62, %s4697_s9  ;;  %v1057_v20 = vrot.slane %v1048_v27, %v4973_v10  ;;  %v1053_v55 = vrot.slane %v1048_v27, %v4971_v9  ;;  %s4288_s9 = sld [smem:[#allocation6 + $0x3c]] }
 0x2c4   : > { %1018 = vrot.lane.b32.xlu0 %v1013_v46, %s4703_s30 }
 0x2c7   : > { %1020 = vrot.lane.b32.xlu1 %v1017_v49, %s4703_s30 }
 0x331   : > { %v5344_v26 = vpop.permute.xlu1 %991 }
 0x332   : > { %v5346_v23 = vpop.permute.xlu0 %993 }
 0x335   : > { %v5348_v29 = vpop.permute.xlu1 %995 }
 0x336   : > { %7354 = vst [vmem:[#allocation52_spill] sm:$0xff] %v5348_v29  ;;  %v1019_v44 = vpop.permute.xlu0 %1018 }
 0x337   : > { %v1027_v48 = vmul.f32 %v1019_v44, %v5055_v53 }
 0x339   : > { %v1021_v15 = vpop.permute.xlu1 %1020  ;;  %1033 = vrot.lane.b32.xlu0 %v1027_v48, %s4698_s10 }
 0x33a   : > { %v1023_v46 = vsel %vm1022_vm10, %v1019_v44, %v1021_v15  ;;  %v1029_v49 = vmul.f32 %v1021_v15, %v5136_v54 }
 0x33b   : > { %v1028_v62 = vmul.f32 %v1023_v46, %v5171_v11 }
 0x33d   : > { %1037 = vrot.lane.b32.xlu0 %v1029_v49, %s4698_s10  ;;  %1035 = vrot.lane.b32.xlu1 %v1028_v62, %s4698_s10  ;;  %v1089_v49 = vmul.f32 %v1088_v58, %v4999_v61 }
 0x33f   : > { %v1098_v57 = vrot.slane %v1089_v49, %v4973_v10 }
 0x341   : > { %1060 = vrot.lane.b32.xlu0 %v1057_v20, %s4703_s30  ;;  %1058 = vrot.lane.b32.xlu1 %v1053_v55, %s4703_s30  ;;  %v1094_v55 = vrot.slane %v1089_v49, %v4971_v9  ;;  %s4294_s30 = sld [smem:[#allocation6 + $0x3f]] }
 0x3ab   : > { %v5360_v48 = vpop.permute.xlu0 %1033 }
 0x3af   : > { %v5362_v52 = vpop.permute.xlu0 %1037  ;;  %v5364_v44 = vpop.permute.xlu1 %1035 }
 0x3b3   : > { %v1061_v15 = vpop.permute.xlu0 %1060  ;;  %v1059_v46 = vpop.permute.xlu1 %1058 }
 0x3b4   : > { %v1062_v62 = vsel %vm1022_vm10, %v1059_v46, %v1061_v15  ;;  %v1066_v56 = vmul.f32 %v1059_v46, %v5051_v51  ;;  %v1068_v20 = vmul.f32 %v1061_v15, %v5124_v40  ;;  %vm2377_vm10 = vcmask 441344  }
 0x3b5   : > { %v1067_v27 = vmul.f32 %v1062_v62, %v5067_v59 }
 0x3b6   : > { %1072 = vrot.lane.b32.xlu1 %v1066_v56, %s4698_s10 }
 0x3b7   : > { %1074 = vrot.lane.b32.xlu0 %v1067_v27, %s4698_s10  ;;  %v1128_v27 = vstv %s4288_s9  ;;  %s4710_s9 = smov 95  }
 0x3b8   : > { %v1129_v49 = vmul.f32 %v1128_v27, %v4999_v61 }
 0x3ba   : > { %1076 = vrot.lane.b32.xlu1 %v1068_v20, %s4698_s10  ;;  %v1138_v24 = vrot.slane %v1129_v49, %v4973_v10  ;;  %v1134_v13 = vrot.slane %v1129_v49, %v4971_v9  ;;  %s4289_s10 = sld [smem:[#allocation6 + $0xc]] }
 0x3bb   : > { %1099 = vrot.lane.b32.xlu0 %v1094_v55, %s4704_s23 }
 0x3be   : > { %1101 = vrot.lane.b32.xlu1 %v1098_v57, %s4704_s23 }
 0x3c0   : > { %v1169_v27 = vstv %s4289_s10  ;;  %s4297_s10 = sld [smem:[#allocation6 + $0x10]] }
 0x428   : > { %v5376_v58 = vpop.permute.xlu1 %1072 }
 0x429   : > { %v5378_v46 = vpop.permute.xlu0 %1074 }
 0x42c   : > { %v5380_v62 = vpop.permute.xlu1 %1076 }
 0x42d   : > { %7355 = vst [vmem:[#allocation53_spill] sm:$0xff] %v5380_v62  ;;  %v1100_v56 = vpop.permute.xlu0 %1099 }
 0x42e   : > { %v1108_v39 = vmul.f32 %v1100_v56, %v5055_v53 }
 0x430   : > { %v1102_v15 = vpop.permute.xlu1 %1101  ;;  %1114 = vrot.lane.b32.xlu0 %v1108_v39, %s4699_s11 }
 0x431   : > { %v1104_v55 = vsel %vm1103_vm11, %v1100_v56, %v1102_v15  ;;  %v1110_v57 = vmul.f32 %v1102_v15, %v5136_v54 }
 0x432   : > { %v1109_v20 = vmul.f32 %v1104_v55, %v5171_v11 }
 0x434   : > { %1118 = vrot.lane.b32.xlu0 %v1110_v57, %s4699_s11  ;;  %1116 = vrot.lane.b32.xlu1 %v1109_v20, %s4699_s11  ;;  %v1170_v57 = vmul.f32 %v1169_v27, %v5007_v7 }
 0x436   : > { %v1179_v42 = vrot.slane %v1170_v57, %v4973_v10 }
 0x438   : > { %1141 = vrot.lane.b32.xlu0 %v1138_v24, %s4704_s23  ;;  %1139 = vrot.lane.b32.xlu1 %v1134_v13, %s4704_s23  ;;  %v1175_v13 = vrot.slane %v1170_v57, %v4971_v9  ;;  %s4296_s23 = sld [smem:[#allocation6 + $0x40]] }
 0x4a2   : > { %v5392_v39 = vpop.permute.xlu0 %1114 }
 0x4a6   : > { %v5394_v61 = vpop.permute.xlu0 %1118  ;;  %v5396_v56 = vpop.permute.xlu1 %1116 }
 0x4aa   : > { %v1142_v15 = vpop.permute.xlu0 %1141  ;;  %v1140_v55 = vpop.permute.xlu1 %1139 }
 0x4ab   : > { %v1143_v20 = vsel %vm1103_vm11, %v1140_v55, %v1142_v15  ;;  %v1147_v45 = vmul.f32 %v1140_v55, %v5051_v51  ;;  %v1149_v24 = vmul.f32 %v1142_v15, %v5124_v40  ;;  %vm7298_vm11 = vcmask 523264  }
 0x4ac   : > { %v1148_v49 = vmul.f32 %v1143_v20, %v5067_v59 }
 0x4ad   : > { %1153 = vrot.lane.b32.xlu1 %v1147_v45, %s4699_s11 }
 0x4ae   : > { %1155 = vrot.lane.b32.xlu0 %v1148_v49, %s4699_s11  ;;  %v1209_v49 = vstv %s4290_s18  ;;  %s4298_s18 = sld [smem:[#allocation6 + $0x41]] }
 0x4af   : > { %v1210_v57 = vmul.f32 %v1209_v49, %v5007_v7 }
 0x4b1   : > { %1157 = vrot.lane.b32.xlu1 %v1149_v24, %s4699_s11  ;;  %v1219_v35 = vrot.slane %v1210_v57, %v4973_v10  ;;  %v1215_v22 = vrot.slane %v1210_v57, %v4971_v9  ;;  %s4291_s11 = sld [smem:[#allocation6 + $0xd]] }
 0x4b2   : > { %1180 = vrot.lane.b32.xlu0 %v1175_v13, %s4705_s22 }
 0x4b5   : > { %1182 = vrot.lane.b32.xlu1 %v1179_v42, %s4705_s22 }
 0x4b7   : > { %v1250_v49 = vstv %s4291_s11  ;;  %s4712_s11 = smov 94  }
 0x51f   : > { %v5408_v27 = vpop.permute.xlu1 %1153 }
 0x520   : > { %v5410_v55 = vpop.permute.xlu0 %1155 }
 0x523   : > { %v5412_v20 = vpop.permute.xlu1 %1157 }
 0x524   : > { %7356 = vst [vmem:[#allocation54_spill] sm:$0xff] %v5412_v20  ;;  %v1181_v45 = vpop.permute.xlu0 %1180 }
 0x525   : > { %v1189_v17 = vmul.f32 %v1181_v45, %v5055_v53 }
 0x527   : > { %v1183_v15 = vpop.permute.xlu1 %1182  ;;  %1195 = vrot.lane.b32.xlu0 %v1189_v17, %s4700_s28 }
 0x528   : > { %v1185_v13 = vsel %vm1184_vm12, %v1181_v45, %v1183_v15  ;;  %v1191_v42 = vmul.f32 %v1183_v15, %v5136_v54 }
 0x529   : > { %v1190_v24 = vmul.f32 %v1185_v13, %v5171_v11 }
 0x52b   : > { %1199 = vrot.lane.b32.xlu0 %v1191_v42, %s4700_s28  ;;  %1197 = vrot.lane.b32.xlu1 %v1190_v24, %s4700_s28  ;;  %v1251_v42 = vmul.f32 %v1250_v49, %v5015_v18 }
 0x52d   : > { %v1260_v41 = vrot.slane %v1251_v42, %v4973_v10 }
 0x52f   : > { %1222 = vrot.lane.b32.xlu0 %v1219_v35, %s4705_s22  ;;  %1220 = vrot.lane.b32.xlu1 %v1215_v22, %s4705_s22  ;;  %v1256_v35 = vrot.slane %v1251_v42, %v4971_v9  ;;  %s4711_s22 = smov 34  }
 0x599   : > { %v5424_v17 = vpop.permute.xlu0 %1195 }
 0x59d   : > { %v5426_v7 = vpop.permute.xlu0 %1199  ;;  %v5428_v45 = vpop.permute.xlu1 %1197 }
 0x5a1   : > { %v1223_v15 = vpop.permute.xlu0 %1222  ;;  %v1221_v13 = vpop.permute.xlu1 %1220 }
 0x5a2   : > { %v1224_v24 = vsel %vm1184_vm12, %v1221_v13, %v1223_v15  ;;  %v1228_v5 = vmul.f32 %v1221_v13, %v5051_v51  ;;  %v1230_v22 = vmul.f32 %v1223_v15, %v5124_v40  ;;  %vm2535_vm12 = vcmask 531456  }
 0x5a3   : > { %v1229_v57 = vmul.f32 %v1224_v24, %v5067_v59 }
 0x5a4   : > { %1234 = vrot.lane.b32.xlu1 %v1228_v5, %s4700_s28 }
 0x5a5   : > { %1236 = vrot.lane.b32.xlu0 %v1229_v57, %s4700_s28  ;;  %v1290_v57 = vstv %s4292_s21  ;;  %s4713_s21 = smov 35  }
 0x5a6   : > { %v1291_v42 = vmul.f32 %v1290_v57, %v5015_v18 }
 0x5a8   : > { %1238 = vrot.lane.b32.xlu1 %v1230_v22, %s4700_s28  ;;  %v1300_v12 = vrot.slane %v1291_v42, %v4973_v10  ;;  %v1296_v33 = vrot.slane %v1291_v42, %v4971_v9  ;;  %s4293_s28 = sld [smem:[#allocation6 + $0xe]] }
 0x5a9   : > { %1261 = vrot.lane.b32.xlu0 %v1256_v35, %s4706_s27 }
 0x5ac   : > { %1263 = vrot.lane.b32.xlu1 %v1260_v41, %s4706_s27 }
 0x5ae   : > { %v1331_v57 = vstv %s4293_s28  ;;  %s4300_s28 = sld [smem:[#allocation6 + $0x42]] }
 0x616   : > { %v5440_v49 = vpop.permute.xlu1 %1234 }
 0x617   : > { %v5442_v13 = vpop.permute.xlu0 %1236 }
 0x61a   : > { %v5444_v24 = vpop.permute.xlu1 %1238 }
 0x61b   : > { %7357 = vst [vmem:[#allocation55_spill] sm:$0xff] %v5444_v24  ;;  %v1262_v5 = vpop.permute.xlu0 %1261  ;;  %v5702_v24 = vld [vmem:[#allocation7] ss:$8 sm:$0x3] }
 0x61c   : > { %v1270_v37 = vmul.f32 %v1262_v5, %v5055_v53 }
 0x61e   : > { %v1264_v15 = vpop.permute.xlu1 %1263  ;;  %1276 = vrot.lane.b32.xlu0 %v1270_v37, %s4701_s20 }
 0x61f   : > { %v1266_v35 = vsel %vm1265_vm13, %v1262_v5, %v1264_v15  ;;  %v1272_v41 = vmul.f32 %v1264_v15, %v5136_v54 }
 0x620   : > { %v1271_v22 = vmul.f32 %v1266_v35, %v5171_v11 }
 0x622   : > { %1280 = vrot.lane.b32.xlu0 %v1272_v41, %s4701_s20  ;;  %1278 = vrot.lane.b32.xlu1 %v1271_v22, %s4701_s20  ;;  %v1332_v41 = vmul.f32 %v1331_v57, %v5023_v28 }
 0x624   : > { %v1341_v0 = vrot.slane %v1332_v41, %v4973_v10 }
 0x626   : > { %1303 = vrot.lane.b32.xlu0 %v1300_v12, %s4706_s27  ;;  %1301 = vrot.lane.b32.xlu1 %v1296_v33, %s4706_s27  ;;  %v1337_v33 = vrot.slane %v1332_v41, %v4971_v9  ;;  %s4299_s27 = sld [smem:[#allocation6 + $0x11]] }
 0x690   : > { %v5456_v37 = vpop.permute.xlu0 %1276 }
 0x694   : > { %v5458_v18 = vpop.permute.xlu0 %1280  ;;  %v5460_v5 = vpop.permute.xlu1 %1278 }
 0x698   : > { %v1304_v15 = vpop.permute.xlu0 %1303  ;;  %v1302_v35 = vpop.permute.xlu1 %1301 }
 0x699   : > { %v1305_v22 = vsel %vm1265_vm13, %v1302_v35, %v1304_v15  ;;  %v1309_v21 = vmul.f32 %v1302_v35, %v5051_v51  ;;  %v1311_v12 = vmul.f32 %v1304_v15, %v5124_v40  ;;  %vm2613_vm13 = vcmask 539648  }
 0x69a   : > { %v1310_v42 = vmul.f32 %v1305_v22, %v5067_v59 }
 0x69b   : > { %1315 = vrot.lane.b32.xlu1 %v1309_v21, %s4701_s20 }
 0x69c   : > { %1317 = vrot.lane.b32.xlu0 %v1310_v42, %s4701_s20  ;;  %v1370_v42 = vstv %s4294_s30  ;;  %s4714_s30 = smov 93  }
 0x69d   : > { %v1371_v41 = vmul.f32 %v1370_v42, %v5023_v28 }
 0x69f   : > { %1319 = vrot.lane.b32.xlu1 %v1311_v12, %s4701_s20  ;;  %s4708_s20 = smov 96   ;;  %v1380_v34 = vrot.slane %v1371_v41, %v4973_v10  ;;  %v1376_v1 = vrot.slane %v1371_v41, %v4971_v9 }
 0x6a0   : > { %1342 = vrot.lane.b32.xlu0 %v1337_v33, %s4707_s25 }
 0x6a3   : > { %1344 = vrot.lane.b32.xlu1 %v1341_v0, %s4707_s25 }
 0x70d   : > { %v5474_v57 = vpop.permute.xlu1 %1315 }
 0x70e   : > { %v5476_v35 = vpop.permute.xlu0 %1317 }
 0x711   : > { %v5478_v21 = vpop.permute.xlu1 %1319 }
 0x712   : > { %7358 = vst [vmem:[#allocation56_spill] sm:$0xff] %v5478_v21  ;;  %v1343_v22 = vpop.permute.xlu0 %1342  ;;  %v5668_v21 = vld [vmem:[#allocation7 + $0x6] ss:$8 sm:$0x3] }
 0x713   : > { %v1351_v15 = vmul.f32 %v1343_v22, %v5055_v53 }
 0x715   : > { %v1345_v12 = vpop.permute.xlu1 %1344  ;;  %1357 = vrot.lane.b32.xlu0 %v1351_v15, %s4708_s20  ;;  %v1409_v15 = vstv %s4295_s4  ;;  %s4301_s4 = sld [smem:[#allocation6 + $0x12]] }
 0x716   : > { %v1347_v0 = vsel %vm7295_vm14, %v1343_v22, %v1345_v12  ;;  %v1353_v33 = vmul.f32 %v1345_v12, %v5136_v54 }
 0x717   : > { %v1352_v38 = vmul.f32 %v1347_v0, %v5171_v11 }
 0x719   : > { %1361 = vrot.lane.b32.xlu0 %v1353_v33, %s4708_s20  ;;  %1359 = vrot.lane.b32.xlu1 %v1352_v38, %s4708_s20  ;;  %v5498_v33 = vld [vmem:[#allocation7 + $0x1] ss:$8 sm:$0x3] }
 0x71a   : > { %v1410_v38 = vmul.f32 %v5498_v33, %v1409_v15 }
 0x71d   : > { %1383 = vrot.lane.b32.xlu0 %v1380_v34, %s4707_s25  ;;  %1381 = vrot.lane.b32.xlu1 %v1376_v1, %s4707_s25 }
 0x787   : > { %v5492_v28 = vpop.permute.xlu0 %1357 }
 0x788   : > { %7359 = vst [vmem:[#allocation57_spill] sm:$0xff] %v5492_v28 }
 0x78b   : > { %v5494_v22 = vpop.permute.xlu0 %1361  ;;  %v5496_v42 = vpop.permute.xlu1 %1359 }
 0x78c   : > { %7360 = vst [vmem:[#allocation58_spill] sm:$0xff] %v5494_v22  ;;  %7361 = vst [vmem:[#allocation59_spill] sm:$0xff] %v5496_v42  ;;  %v1415_v22 = vrot.slane %v1410_v38, %v4971_v9  ;;  %v1419_v42 = vrot.slane %v1410_v38, %v4973_v10 }
 0x78f   : > { %v1384_v12 = vpop.permute.xlu0 %1383  ;;  %v1382_v0 = vpop.permute.xlu1 %1381 }
 0x790   : > { %v1385_v41 = vsel %vm7295_vm14, %v1382_v0, %v1384_v12  ;;  %v1389_v34 = vmul.f32 %v1382_v0, %v5051_v51  ;;  %v1391_v28 = vmul.f32 %v1384_v12, %v5124_v40  ;;  %vm7299_vm14 = vcmask 498688  }
 0x791   : > { %v1390_v1 = vmul.f32 %v1385_v41, %v5067_v59 }
 0x792   : > { %1395 = vrot.lane.b32.xlu1 %v1389_v34, %s4708_s20 }
 0x793   : > { %1397 = vrot.lane.b32.xlu0 %v1390_v1, %s4708_s20  ;;  %v1448_v1 = vstv %s4296_s23  ;;  %s4302_s23 = sld [smem:[#allocation6 + $0x43]] }
 0x796   : > { %1399 = vrot.lane.b32.xlu1 %v1391_v28, %s4708_s20  ;;  %v1449_v28 = vmul.f32 %v5498_v33, %v1448_v1 }
 0x797   : > { %1420 = vrot.lane.b32.xlu0 %v1415_v22, %s4709_s6 }
 0x79a   : > { %1422 = vrot.lane.b32.xlu1 %v1419_v42, %s4709_s6 }
 0x804   : > { %v5510_v15 = vpop.permute.xlu1 %1395 }
 0x805   : > { %7362 = vst [vmem:[#allocation60_spill] sm:$0xff] %v5510_v15  ;;  %v5512_v0 = vpop.permute.xlu0 %1397  ;;  %v1454_v15 = vrot.slane %v1449_v28, %v4971_v9 }
 0x806   : > { %7363 = vst [vmem:[#allocation61_spill] sm:$0xff] %v5512_v0 }
 0x808   : > { %v5514_v41 = vpop.permute.xlu1 %1399 }
 0x809   : > { %7364 = vst [vmem:[#allocation62_spill] sm:$0xff] %v5514_v41  ;;  %v1421_v34 = vpop.permute.xlu0 %1420  ;;  %v1458_v41 = vrot.slane %v1449_v28, %v4973_v10 }
 0x80a   : > { %v1429_v31 = vmul.f32 %v1421_v34, %v5055_v53 }
 0x80c   : > { %v1423_v12 = vpop.permute.xlu1 %1422  ;;  %1435 = vrot.lane.b32.xlu0 %v1429_v31, %s4710_s9 }
 0x80d   : > { %v1425_v22 = vsel %vm1424_vm15, %v1421_v34, %v1423_v12  ;;  %v1431_v42 = vmul.f32 %v1423_v12, %v5136_v54  ;;  %v1487_v12 = vstv %s4297_s10  ;;  %s4716_s10 = smov 92  }
 0x80e   : > { %v1430_v38 = vmul.f32 %v1425_v22, %v5171_v11 }
 0x810   : > { %1439 = vrot.lane.b32.xlu0 %v1431_v42, %s4710_s9  ;;  %1437 = vrot.lane.b32.xlu1 %v1430_v38, %s4710_s9  ;;  %v1488_v42 = vmul.f32 %v5532_v43, %v1487_v12 }
 0x814   : > { %1461 = vrot.lane.b32.xlu0 %v1458_v41, %s4709_s6  ;;  %1459 = vrot.lane.b32.xlu1 %v1454_v15, %s4709_s6  ;;  %v1493_v41 = vrot.slane %v1488_v42, %v4971_v9  ;;  %s4715_s6 = smov 36  }
 0x87e   : > { %v5526_v31 = vpop.permute.xlu0 %1435 }
 0x87f   : > { %7365 = vst [vmem:[#allocation63_spill] sm:$0xff] %v5526_v31  ;;  %v1497_v31 = vrot.slane %v1488_v42, %v4973_v10 }
 0x882   : > { %v5528_v1 = vpop.permute.xlu0 %1439  ;;  %v5530_v34 = vpop.permute.xlu1 %1437 }
 0x883   : > { %7366 = vst [vmem:[#allocation64_spill] sm:$0xff] %v5528_v1  ;;  %7367 = vst [vmem:[#allocation65_spill] sm:$0xff] %v5530_v34 }
 0x886   : > { %v1462_v0 = vpop.permute.xlu0 %1461  ;;  %v1460_v22 = vpop.permute.xlu1 %1459 }
 0x887   : > { %v1463_v38 = vsel %vm1424_vm15, %v1460_v22, %v1462_v0  ;;  %v1467_v28 = vmul.f32 %v1460_v22, %v5051_v51  ;;  %v1469_v1 = vmul.f32 %v1462_v0, %v5124_v40  ;;  %vm2691_vm15 = vcmask 547840  }
 0x888   : > { %v1468_v15 = vmul.f32 %v1463_v38, %v5067_v59 }
 0x889   : > { %1473 = vrot.lane.b32.xlu1 %v1467_v28, %s4710_s9 }
 0x88a   : > { %1475 = vrot.lane.b32.xlu0 %v1468_v15, %s4710_s9  ;;  %v1526_v15 = vstv %s4298_s18  ;;  %s4717_s18 = smov 37  }
 0x88d   : > { %1477 = vrot.lane.b32.xlu1 %v1469_v1, %s4710_s9  ;;  %v1527_v1 = vmul.f32 %v5532_v43, %v1526_v15 }
 0x88e   : > { %1498 = vrot.lane.b32.xlu0 %v1493_v41, %s4711_s22 }
 0x891   : > { %1500 = vrot.lane.b32.xlu1 %v1497_v31, %s4711_s22 }
 0x8fb   : > { %v5544_v12 = vpop.permute.xlu1 %1473 }
 0x8fc   : > { %7368 = vst [vmem:[#allocation66_spill] sm:$0xff] %v5544_v12  ;;  %v5546_v22 = vpop.permute.xlu0 %1475  ;;  %v1532_v12 = vrot.slane %v1527_v1, %v4971_v9 }
 0x8fd   : > { %7369 = vst [vmem:[#allocation67_spill] sm:$0xff] %v5546_v22 }
 0x8ff   : > { %v5548_v38 = vpop.permute.xlu1 %1477 }
 0x900   : > { %7370 = vst [vmem:[#allocation68_spill] sm:$0xff] %v5548_v38  ;;  %v1499_v28 = vpop.permute.xlu0 %1498  ;;  %v1536_v38 = vrot.slane %v1527_v1, %v4973_v10 }
 0x901   : > { %v1507_v34 = vmul.f32 %v1499_v28, %v5055_v53 }
 0x903   : > { %v1501_v0 = vpop.permute.xlu1 %1500  ;;  %1513 = vrot.lane.b32.xlu0 %v1507_v34, %s4712_s11 }
 0x904   : > { %v1503_v31 = vsel %vm1502_vm0, %v1499_v28, %v1501_v0  ;;  %v1509_v42 = vmul.f32 %v1501_v0, %v5136_v54  ;;  %v1565_v0 = vstv %s4299_s27  ;;  %s4304_s27 = sld [smem:[#allocation6 + $0x44]] }
 0x905   : > { %v1508_v41 = vmul.f32 %v1503_v31, %v5171_v11 }
 0x907   : > { %1517 = vrot.lane.b32.xlu0 %v1509_v42, %s4712_s11  ;;  %1515 = vrot.lane.b32.xlu1 %v1508_v41, %s4712_s11  ;;  %v1566_v42 = vmul.f32 %v5566_v60, %v1565_v0 }
 0x90b   : > { %1539 = vrot.lane.b32.xlu0 %v1536_v38, %s4711_s22  ;;  %1537 = vrot.lane.b32.xlu1 %v1532_v12, %s4711_s22  ;;  %v1571_v38 = vrot.slane %v1566_v42, %v4971_v9  ;;  %s4303_s22 = sld [smem:[#allocation6 + $0x13]] }
 0x975   : > { %v5560_v34 = vpop.permute.xlu0 %1513 }
 0x976   : > { %7371 = vst [vmem:[#allocation69_spill] sm:$0xff] %v5560_v34  ;;  %v1575_v34 = vrot.slane %v1566_v42, %v4973_v10 }
 0x979   : > { %v5562_v15 = vpop.permute.xlu0 %1517  ;;  %v5564_v28 = vpop.permute.xlu1 %1515 }
 0x97a   : > { %7372 = vst [vmem:[#allocation70_spill] sm:$0xff] %v5562_v15  ;;  %7373 = vst [vmem:[#allocation71_spill] sm:$0xff] %v5564_v28 }
 0x97d   : > { %v1540_v22 = vpop.permute.xlu0 %1539  ;;  %v1538_v31 = vpop.permute.xlu1 %1537 }
 0x97e   : > { %v1541_v41 = vsel %vm1502_vm0, %v1538_v31, %v1540_v22  ;;  %v1545_v1 = vmul.f32 %v1538_v31, %v5051_v51  ;;  %v1547_v15 = vmul.f32 %v1540_v22, %v5124_v40  ;;  %vm2769_vm0 = vcmask 556032  }
 0x97f   : > { %v1546_v12 = vmul.f32 %v1541_v41, %v5067_v59 }
 0x980   : > { %1551 = vrot.lane.b32.xlu1 %v1545_v1, %s4712_s11 }
 0x981   : > { %1553 = vrot.lane.b32.xlu0 %v1546_v12, %s4712_s11  ;;  %v1604_v12 = vstv %s4300_s28  ;;  %s4305_s28 = sld [smem:[#allocation6 + $0x14]] }
 0x984   : > { %1555 = vrot.lane.b32.xlu1 %v1547_v15, %s4712_s11  ;;  %v1605_v15 = vmul.f32 %v5566_v60, %v1604_v12 }
 0x985   : > { %1576 = vrot.lane.b32.xlu0 %v1571_v38, %s4713_s21 }
 0x988   : > { %1578 = vrot.lane.b32.xlu1 %v1575_v34, %s4713_s21 }
 0x9f2   : > { %v5578_v0 = vpop.permute.xlu1 %1551 }
 0x9f3   : > { %7374 = vst [vmem:[#allocation72_spill] sm:$0xff] %v5578_v0  ;;  %v5580_v31 = vpop.permute.xlu0 %1553  ;;  %v1610_v0 = vrot.slane %v1605_v15, %v4971_v9 }
 0x9f4   : > { %7375 = vst [vmem:[#allocation73_spill] sm:$0xff] %v5580_v31 }
 0x9f6   : > { %v5582_v41 = vpop.permute.xlu1 %1555 }
 0x9f7   : > { %7376 = vst [vmem:[#allocation74_spill] sm:$0xff] %v5582_v41  ;;  %v1577_v1 = vpop.permute.xlu0 %1576  ;;  %v1614_v41 = vrot.slane %v1605_v15, %v4973_v10 }
 0x9f8   : > { %v1585_v28 = vmul.f32 %v1577_v1, %v5055_v53 }
 0x9fa   : > { %v1579_v22 = vpop.permute.xlu1 %1578  ;;  %1591 = vrot.lane.b32.xlu0 %v1585_v28, %s4714_s30 }
 0x9fb   : > { %v1581_v34 = vsel %vm1580_vm2, %v1577_v1, %v1579_v22  ;;  %v1587_v42 = vmul.f32 %v1579_v22, %v5136_v54  ;;  %v1643_v22 = vstv %s4301_s4  ;;  %s4719_s4 = smov 38  }
 0x9fc   : > { %v1586_v38 = vmul.f32 %v1581_v34, %v5171_v11 }
 0x9fe   : > { %1595 = vrot.lane.b32.xlu0 %v1587_v42, %s4714_s30  ;;  %1593 = vrot.lane.b32.xlu1 %v1586_v38, %s4714_s30  ;;  %v1644_v42 = vmul.f32 %v5600_v36, %v1643_v22 }
 0xa02   : > { %1617 = vrot.lane.b32.xlu0 %v1614_v41, %s4713_s21  ;;  %1615 = vrot.lane.b32.xlu1 %v1610_v0, %s4713_s21  ;;  %v1649_v41 = vrot.slane %v1644_v42, %v4971_v9  ;;  %s4718_s21 = smov 91  }
 0xa6c   : > { %v5594_v28 = vpop.permute.xlu0 %1591 }
 0xa6d   : > { %7377 = vst [vmem:[#allocation75_spill] sm:$0xff] %v5594_v28  ;;  %v1653_v28 = vrot.slane %v1644_v42, %v4973_v10 }
 0xa70   : > { %v5596_v12 = vpop.permute.xlu0 %1595  ;;  %v5598_v1 = vpop.permute.xlu1 %1593 }
 0xa71   : > { %7378 = vst [vmem:[#allocation76_spill] sm:$0xff] %v5596_v12  ;;  %7379 = vst [vmem:[#allocation77_spill] sm:$0xff] %v5598_v1 }
 0xa74   : > { %v1618_v31 = vpop.permute.xlu0 %1617  ;;  %v1616_v34 = vpop.permute.xlu1 %1615 }
 0xa75   : > { %v1619_v38 = vsel %vm1580_vm2, %v1616_v34, %v1618_v31  ;;  %v1623_v15 = vmul.f32 %v1616_v34, %v5051_v51  ;;  %v1625_v12 = vmul.f32 %v1618_v31, %v5124_v40  ;;  %vm2847_vm2 = vcmask 564224  }
 0xa76   : > { %v1624_v0 = vmul.f32 %v1619_v38, %v5067_v59 }
 0xa77   : > { %1629 = vrot.lane.b32.xlu1 %v1623_v15, %s4714_s30 }
 0xa78   : > { %1631 = vrot.lane.b32.xlu0 %v1624_v0, %s4714_s30  ;;  %v1682_v0 = vstv %s4302_s23  ;;  %s4720_s23 = smov 90  }
 0xa7b   : > { %1633 = vrot.lane.b32.xlu1 %v1625_v12, %s4714_s30  ;;  %v1683_v12 = vmul.f32 %v5600_v36, %v1682_v0 }
 0xa7c   : > { %1654 = vrot.lane.b32.xlu0 %v1649_v41, %s4715_s6 }
 0xa7f   : > { %1656 = vrot.lane.b32.xlu1 %v1653_v28, %s4715_s6 }
 0xae9   : > { %v5612_v22 = vpop.permute.xlu1 %1629 }
 0xaea   : > { %7380 = vst [vmem:[#allocation78_spill] sm:$0xff] %v5612_v22  ;;  %v5614_v34 = vpop.permute.xlu0 %1631  ;;  %v1688_v22 = vrot.slane %v1683_v12, %v4971_v9 }
 0xaeb   : > { %7381 = vst [vmem:[#allocation79_spill] sm:$0xff] %v5614_v34 }
 0xaed   : > { %v5616_v38 = vpop.permute.xlu1 %1633 }
 0xaee   : > { %7382 = vst [vmem:[#allocation80_spill] sm:$0xff] %v5616_v38  ;;  %v1655_v15 = vpop.permute.xlu0 %1654  ;;  %v1692_v38 = vrot.slane %v1683_v12, %v4973_v10 }
 0xaef   : > { %v1663_v1 = vmul.f32 %v1655_v15, %v5055_v53 }
 0xaf1   : > { %v1657_v31 = vpop.permute.xlu1 %1656  ;;  %1669 = vrot.lane.b32.xlu0 %v1663_v1, %s4716_s10 }
 0xaf2   : > { %v1659_v28 = vsel %vm1658_vm3, %v1655_v15, %v1657_v31  ;;  %v1665_v42 = vmul.f32 %v1657_v31, %v5136_v54  ;;  %v1721_v31 = vstv %s4303_s22  ;;  %s4307_s22 = sld [smem:[#allocation6 + $0x15]] }
 0xaf3   : > { %v1664_v41 = vmul.f32 %v1659_v28, %v5171_v11 }
 0xaf5   : > { %1673 = vrot.lane.b32.xlu0 %v1665_v42, %s4716_s10  ;;  %1671 = vrot.lane.b32.xlu1 %v1664_v41, %s4716_s10  ;;  %v1722_v42 = vmul.f32 %v5634_v32, %v1721_v31 }
 0xaf9   : > { %1695 = vrot.lane.b32.xlu0 %v1692_v38, %s4715_s6  ;;  %1693 = vrot.lane.b32.xlu1 %v1688_v22, %s4715_s6  ;;  %v1727_v38 = vrot.slane %v1722_v42, %v4971_v9  ;;  %s4306_s6 = sld [smem:[#allocation6 + $0x45]] }
 0xb63   : > { %v5628_v1 = vpop.permute.xlu0 %1669 }
 0xb64   : > { %7383 = vst [vmem:[#allocation81_spill] sm:$0xff] %v5628_v1  ;;  %v1731_v1 = vrot.slane %v1722_v42, %v4973_v10 }
 0xb67   : > { %v5630_v0 = vpop.permute.xlu0 %1673  ;;  %v5632_v15 = vpop.permute.xlu1 %1671 }
 0xb68   : > { %7384 = vst [vmem:[#allocation82_spill] sm:$0xff] %v5630_v0  ;;  %7385 = vst [vmem:[#allocation83_spill] sm:$0xff] %v5632_v15 }
 0xb6b   : > { %v1696_v34 = vpop.permute.xlu0 %1695  ;;  %v1694_v28 = vpop.permute.xlu1 %1693 }
 0xb6c   : > { %v1697_v41 = vsel %vm1658_vm3, %v1694_v28, %v1696_v34  ;;  %v1701_v12 = vmul.f32 %v1694_v28, %v5051_v51  ;;  %v1703_v0 = vmul.f32 %v1696_v34, %v5124_v40  ;;  %vm2925_vm3 = vcmask 572416  }
 0xb6d   : > { %v1702_v22 = vmul.f32 %v1697_v41, %v5067_v59 }
 0xb6e   : > { %1707 = vrot.lane.b32.xlu1 %v1701_v12, %s4716_s10 }
 0xb6f   : > { %1709 = vrot.lane.b32.xlu0 %v1702_v22, %s4716_s10  ;;  %v1760_v22 = vstv %s4304_s27  ;;  %s4308_s27 = sld [smem:[#allocation6 + $0x46]] }
 0xb72   : > { %1711 = vrot.lane.b32.xlu1 %v1703_v0, %s4716_s10  ;;  %v1761_v0 = vmul.f32 %v5634_v32, %v1760_v22 }
 0xb73   : > { %1732 = vrot.lane.b32.xlu0 %v1727_v38, %s4717_s18 }
 0xb76   : > { %1734 = vrot.lane.b32.xlu1 %v1731_v1, %s4717_s18 }
 0xbe0   : > { %v5646_v31 = vpop.permute.xlu1 %1707 }
 0xbe1   : > { %7386 = vst [vmem:[#allocation84_spill] sm:$0xff] %v5646_v31  ;;  %v5648_v28 = vpop.permute.xlu0 %1709  ;;  %v1766_v31 = vrot.slane %v1761_v0, %v4971_v9 }
 0xbe2   : > { %7387 = vst [vmem:[#allocation85_spill] sm:$0xff] %v5648_v28 }
 0xbe4   : > { %v5650_v41 = vpop.permute.xlu1 %1711 }
 0xbe5   : > { %7388 = vst [vmem:[#allocation86_spill] sm:$0xff] %v5650_v41  ;;  %v1733_v12 = vpop.permute.xlu0 %1732  ;;  %v1770_v41 = vrot.slane %v1761_v0, %v4973_v10 }
 0xbe6   : > { %v1741_v15 = vmul.f32 %v1733_v12, %v5055_v53 }
 0xbe8   : > { %v1735_v34 = vpop.permute.xlu1 %1734  ;;  %1747 = vrot.lane.b32.xlu0 %v1741_v15, %s4718_s21 }
 0xbe9   : > { %v1737_v1 = vsel %vm1736_vm4, %v1733_v12, %v1735_v34  ;;  %v1743_v42 = vmul.f32 %v1735_v34, %v5136_v54  ;;  %v1799_v34 = vstv %s4305_s28  ;;  %s4309_s28 = sld [smem:[#allocation6 + $0x16]] }
 0xbea   : > { %v1742_v38 = vmul.f32 %v1737_v1, %v5171_v11 }
 0xbec   : > { %1751 = vrot.lane.b32.xlu0 %v1743_v42, %s4718_s21  ;;  %1749 = vrot.lane.b32.xlu1 %v1742_v38, %s4718_s21  ;;  %v1800_v42 = vmul.f32 %v5668_v21, %v1799_v34 }
 0xbf0   : > { %1773 = vrot.lane.b32.xlu0 %v1770_v41, %s4717_s18  ;;  %1771 = vrot.lane.b32.xlu1 %v1766_v31, %s4717_s18  ;;  %v1805_v41 = vrot.slane %v1800_v42, %v4971_v9  ;;  %s4721_s18 = smov 48  }
 0xc5a   : > { %v5662_v15 = vpop.permute.xlu0 %1747 }
 0xc5b   : > { %7389 = vst [vmem:[#allocation87_spill] sm:$0xff] %v5662_v15  ;;  %v1809_v15 = vrot.slane %v1800_v42, %v4973_v10 }
 0xc5e   : > { %v5664_v22 = vpop.permute.xlu0 %1751  ;;  %v5666_v12 = vpop.permute.xlu1 %1749 }
 0xc5f   : > { %7390 = vst [vmem:[#allocation88_spill] sm:$0xff] %v5664_v22  ;;  %7391 = vst [vmem:[#allocation89_spill] sm:$0xff] %v5666_v12 }
 0xc62   : > { %v1774_v28 = vpop.permute.xlu0 %1773  ;;  %v1772_v1 = vpop.permute.xlu1 %1771 }
 0xc63   : > { %v1775_v38 = vsel %vm1736_vm4, %v1772_v1, %v1774_v28  ;;  %v1779_v0 = vmul.f32 %v1772_v1, %v5051_v51  ;;  %v1781_v22 = vmul.f32 %v1774_v28, %v5124_v40  ;;  %vm3003_vm4 = vcmask 654336  }
 0xc64   : > { %v1780_v31 = vmul.f32 %v1775_v38, %v5067_v59 }
 0xc65   : > { %1785 = vrot.lane.b32.xlu1 %v1779_v0, %s4718_s21 }
 0xc66   : > { %1787 = vrot.lane.b32.xlu0 %v1780_v31, %s4718_s21  ;;  %v1838_v31 = vstv %s4306_s6  ;;  %s4310_s6 = sld [smem:[#allocation6 + $0x47]] }
 0xc69   : > { %1789 = vrot.lane.b32.xlu1 %v1781_v22, %s4718_s21  ;;  %v1839_v22 = vmul.f32 %v5668_v21, %v1838_v31 }
 0xc6a   : > { %1810 = vrot.lane.b32.xlu0 %v1805_v41, %s4719_s4 }
 0xc6d   : > { %1812 = vrot.lane.b32.xlu1 %v1809_v15, %s4719_s4 }
 0xcd7   : > { %v5680_v34 = vpop.permute.xlu1 %1785 }
 0xcd8   : > { %7392 = vst [vmem:[#allocation90_spill] sm:$0xff] %v5680_v34  ;;  %v5682_v1 = vpop.permute.xlu0 %1787  ;;  %v1844_v34 = vrot.slane %v1839_v22, %v4971_v9 }
 0xcd9   : > { %7393 = vst [vmem:[#allocation91_spill] sm:$0xff] %v5682_v1 }
 0xcdb   : > { %v5684_v38 = vpop.permute.xlu1 %1789 }
 0xcdc   : > { %7394 = vst [vmem:[#allocation92_spill] sm:$0xff] %v5684_v38  ;;  %v1811_v0 = vpop.permute.xlu0 %1810  ;;  %v1848_v38 = vrot.slane %v1839_v22, %v4973_v10 }
 0xcdd   : > { %v1819_v12 = vmul.f32 %v1811_v0, %v5055_v53 }
 0xcdf   : > { %v1813_v28 = vpop.permute.xlu1 %1812  ;;  %1825 = vrot.lane.b32.xlu0 %v1819_v12, %s4720_s23 }
 0xce0   : > { %v1815_v15 = vsel %vm1814_vm5, %v1811_v0, %v1813_v28  ;;  %v1821_v42 = vmul.f32 %v1813_v28, %v5136_v54  ;;  %v1877_v28 = vstv %s4307_s22  ;;  %s4311_s22 = sld [smem:[#allocation6 + $0x17]] }
 0xce1   : > { %v1820_v41 = vmul.f32 %v1815_v15, %v5171_v11 }
 0xce3   : > { %1829 = vrot.lane.b32.xlu0 %v1821_v42, %s4720_s23  ;;  %1827 = vrot.lane.b32.xlu1 %v1820_v41, %s4720_s23  ;;  %v1878_v42 = vmul.f32 %v5702_v24, %v1877_v28 }
 0xce7   : > { %1851 = vrot.lane.b32.xlu0 %v1848_v38, %s4719_s4  ;;  %1849 = vrot.lane.b32.xlu1 %v1844_v34, %s4719_s4  ;;  %v1883_v38 = vrot.slane %v1878_v42, %v4971_v9  ;;  %s4722_s4 = smov 49  }
 0xd51   : > { %v5696_v12 = vpop.permute.xlu0 %1825 }
 0xd52   : > { %7395 = vst [vmem:[#allocation93_spill] sm:$0xff] %v5696_v12  ;;  %v1887_v12 = vrot.slane %v1878_v42, %v4973_v10 }
 0xd55   : > { %v5698_v31 = vpop.permute.xlu0 %1829  ;;  %v5700_v0 = vpop.permute.xlu1 %1827 }
 0xd56   : > { %7396 = vst [vmem:[#allocation94_spill] sm:$0xff] %v5698_v31  ;;  %7397 = vst [vmem:[#allocation95_spill] sm:$0xff] %v5700_v0 }
 0xd59   : > { %v1852_v1 = vpop.permute.xlu0 %1851  ;;  %v1850_v15 = vpop.permute.xlu1 %1849 }
 0xd5a   : > { %v1853_v41 = vsel %vm1814_vm5, %v1850_v15, %v1852_v1  ;;  %v1857_v22 = vmul.f32 %v1850_v15, %v5051_v51  ;;  %v1859_v31 = vmul.f32 %v1852_v1, %v5124_v40  ;;  %vm3084_vm5 = vcmask 662528  }
 0xd5b   : > { %v1858_v34 = vmul.f32 %v1853_v41, %v5067_v59 }
 0xd5c   : > { %1863 = vrot.lane.b32.xlu1 %v1857_v22, %s4720_s23 }
 0xd5d   : > { %1865 = vrot.lane.b32.xlu0 %v1858_v34, %s4720_s23  ;;  %v1917_v34 = vstv %s4308_s27  ;;  %s4312_s27 = sld [smem:[#allocation6 + $0x48]] }
 0xd60   : > { %1867 = vrot.lane.b32.xlu1 %v1859_v31, %s4720_s23  ;;  %v1918_v31 = vmul.f32 %v5702_v24, %v1917_v34 }
 0xd61   : > { %1888 = vrot.lane.b32.xlu0 %v1883_v38, %s4721_s18 }
 0xd64   : > { %1890 = vrot.lane.b32.xlu1 %v1887_v12, %s4721_s18 }
 0xdce   : > { %v5714_v28 = vpop.permute.xlu1 %1863 }
 0xdcf   : > { %7398 = vst [vmem:[#allocation96_spill] sm:$0xff] %v5714_v28  ;;  %v5716_v15 = vpop.permute.xlu0 %1865  ;;  %v1923_v28 = vrot.slane %v1918_v31, %v4971_v9 }
 0xdd0   : > { %7399 = vst [vmem:[#allocation97_spill] sm:$0xff] %v5716_v15 }
 0xdd2   : > { %v5718_v41 = vpop.permute.xlu1 %1867 }
 0xdd3   : > { %7400 = vst [vmem:[#allocation98_spill] sm:$0xff] %v5718_v41  ;;  %v1889_v22 = vpop.permute.xlu0 %1888  ;;  %v1927_v41 = vrot.slane %v1918_v31, %v4973_v10 }
 0xdd4   : > { %v1897_v0 = vmul.f32 %v1889_v22, %v5055_v53 }
 0xdd6   : > { %v1891_v1 = vpop.permute.xlu1 %1890  ;;  %1903 = vrot.lane.b32.xlu0 %v1897_v0, %s4708_s20 }
 0xdd7   : > { %v1893_v42 = vsel %vm1892_vm6, %v1889_v22, %v1891_v1  ;;  %v1899_v12 = vmul.f32 %v1891_v1, %v5136_v54  ;;  %v1958_v1 = vstv %s4309_s28  ;;  %s4314_s28 = sld [smem:[#allocation6 + $0x49]] }
 0xdd8   : > { %v1898_v38 = vmul.f32 %v1893_v42, %v5171_v11 }
 0xdda   : > { %1907 = vrot.lane.b32.xlu0 %v1899_v12, %s4708_s20  ;;  %1905 = vrot.lane.b32.xlu1 %v1898_v38, %s4708_s20  ;;  %v1959_v12 = vmul.f32 %v5498_v33, %v1958_v1 }
 0xddc   : > { %v1968_v62 = vrot.slane %v1959_v12, %v4973_v10 }
 0xdde   : > { %1930 = vrot.lane.b32.xlu0 %v1927_v41, %s4721_s18  ;;  %1928 = vrot.lane.b32.xlu1 %v1923_v28, %s4721_s18  ;;  %v1964_v28 = vrot.slane %v1959_v12, %v4971_v9  ;;  %s4723_s18 = smov 50  }
 0xe48   : > { %v5730_v0 = vpop.permute.xlu0 %1903 }
 0xe4c   : > { %v5732_v34 = vpop.permute.xlu0 %1907  ;;  %v5734_v22 = vpop.permute.xlu1 %1905 }
 0xe50   : > { %v1931_v15 = vpop.permute.xlu0 %1930  ;;  %v1929_v42 = vpop.permute.xlu1 %1928 }
 0xe51   : > { %v1932_v38 = vsel %vm1892_vm6, %v1929_v42, %v1931_v15  ;;  %v1936_v20 = vmul.f32 %v1929_v42, %v5051_v51  ;;  %v1938_v41 = vmul.f32 %v1931_v15, %v5124_v40  ;;  %vm3165_vm6 = vcmask 670720  }
 0xe52   : > { %v1937_v31 = vmul.f32 %v1932_v38, %v5067_v59 }
 0xe53   : > { %1942 = vrot.lane.b32.xlu1 %v1936_v20, %s4708_s20 }
 0xe54   : > { %1944 = vrot.lane.b32.xlu0 %v1937_v31, %s4708_s20  ;;  %v1998_v31 = vstv %s4310_s6  ;;  %s4725_s6 = smov 53  }
 0xe55   : > { %v1999_v12 = vmul.f32 %v5498_v33, %v1998_v31  ;;  %v2039_v31 = vstv %s4311_s22  ;;  %s4318_s22 = sld [smem:[#allocation6 + $0x4b]] }
 0xe57   : > { %1946 = vrot.lane.b32.xlu1 %v1938_v41, %s4708_s20  ;;  %v2004_v30 = vrot.slane %v1999_v12, %v4971_v9 }
 0xe58   : > { %1969 = vrot.lane.b32.xlu0 %v1964_v28, %s4722_s4 }
 0xe5b   : > { %1971 = vrot.lane.b32.xlu1 %v1968_v62, %s4722_s4 }
 0xec5   : > { %v5746_v1 = vpop.permute.xlu1 %1942 }
 0xec6   : > { %7401 = vst [vmem:[#allocation99_spill] sm:$0xff] %v5746_v1  ;;  %v5748_v42 = vpop.permute.xlu0 %1944 }
 0xec7   : > { %7402 = vst [vmem:[#allocation100_spill] sm:$0xff] %v5748_v42 }
 0xec9   : > { %v5750_v38 = vpop.permute.xlu1 %1946 }
 0xeca   : > { %7403 = vst [vmem:[#allocation101_spill] sm:$0xff] %v5750_v38  ;;  %v1970_v20 = vpop.permute.xlu0 %1969  ;;  %v2008_v38 = vrot.slane %v1999_v12, %v4973_v10 }
 0xecb   : > { %v1978_v29 = vmul.f32 %v1970_v20, %v5055_v53 }
 0xecd   : > { %v1972_v15 = vpop.permute.xlu1 %1971  ;;  %1984 = vrot.lane.b32.xlu0 %v1978_v29, %s4710_s9 }
 0xece   : > { %v1974_v28 = vsel %vm1973_vm7, %v1970_v20, %v1972_v15  ;;  %v1980_v62 = vmul.f32 %v1972_v15, %v5136_v54 }
 0xecf   : > { %v1979_v41 = vmul.f32 %v1974_v28, %v5171_v11 }
 0xed1   : > { %1988 = vrot.lane.b32.xlu0 %v1980_v62, %s4710_s9  ;;  %1986 = vrot.lane.b32.xlu1 %v1979_v41, %s4710_s9  ;;  %v2040_v62 = vmul.f32 %v5532_v43, %v2039_v31 }
 0xed5   : > { %2011 = vrot.lane.b32.xlu0 %v2008_v38, %s4722_s4  ;;  %2009 = vrot.lane.b32.xlu1 %v2004_v30, %s4722_s4  ;;  %v2045_v30 = vrot.slane %v2040_v62, %v4971_v9  ;;  %s4316_s4 = sld [smem:[#allocation6 + $0x4a]] }
 0xf3f   : > { %v5762_v29 = vpop.permute.xlu0 %1984 }
 0xf40   : > { %7404 = vst [vmem:[#allocation102_spill] sm:$0xff] %v5762_v29 }
 0xf43   : > { %v5764_v33 = vpop.permute.xlu0 %1988  ;;  %v5766_v20 = vpop.permute.xlu1 %1986 }
 0xf44   : > { %7405 = vst [vmem:[#allocation103_spill] sm:$0xff] %v5764_v33  ;;  %7406 = vst [vmem:[#allocation104_spill] sm:$0xff] %v5766_v20  ;;  %v2049_v33 = vrot.slane %v2040_v62, %v4973_v10  ;;  %v6172_v20 = vld [vmem:[#allocation7] ss:$8 sm:$0x3] }
 0xf47   : > { %v2012_v15 = vpop.permute.xlu0 %2011  ;;  %v2010_v28 = vpop.permute.xlu1 %2009 }
 0xf48   : > { %v2013_v41 = vsel %vm1973_vm7, %v2010_v28, %v2012_v15  ;;  %v2017_v14 = vmul.f32 %v2010_v28, %v5051_v51  ;;  %v2019_v38 = vmul.f32 %v2012_v15, %v5124_v40  ;;  %vm3246_vm7 = vcmask 678912  }
 0xf49   : > { %v2018_v12 = vmul.f32 %v2013_v41, %v5067_v59 }
 0xf4a   : > { %2023 = vrot.lane.b32.xlu1 %v2017_v14, %s4710_s9 }
 0xf4b   : > { %2025 = vrot.lane.b32.xlu0 %v2018_v12, %s4710_s9  ;;  %v2079_v12 = vstv %s4312_s27  ;;  %s4320_s27 = sld [smem:[#allocation6 + $0x4c]] }
 0xf4c   : > { %v2080_v62 = vmul.f32 %v5532_v43, %v2079_v12 }
 0xf4e   : > { %2027 = vrot.lane.b32.xlu1 %v2019_v38, %s4710_s9  ;;  %s4313_s9 = sld [smem:[#allocation6 + $0x18]] }
 0xf4f   : > { %2050 = vrot.lane.b32.xlu0 %v2045_v30, %s4723_s18 }
 0xf52   : > { %2052 = vrot.lane.b32.xlu1 %v2049_v33, %s4723_s18 }
 0xf54   : > { %v2120_v12 = vstv %s4313_s9  ;;  %s4727_s9 = smov 64  }
 0xfbc   : > { %v5778_v31 = vpop.permute.xlu1 %2023 }
 0xfbd   : > { %7407 = vst [vmem:[#allocation105_spill] sm:$0xff] %v5778_v31  ;;  %v5780_v28 = vpop.permute.xlu0 %2025  ;;  %v2085_v31 = vrot.slane %v2080_v62, %v4971_v9 }
 0xfbe   : > { %7408 = vst [vmem:[#allocation106_spill] sm:$0xff] %v5780_v28 }
 0xfc0   : > { %v5782_v41 = vpop.permute.xlu1 %2027 }
 0xfc1   : > { %7409 = vst [vmem:[#allocation107_spill] sm:$0xff] %v5782_v41  ;;  %v2051_v14 = vpop.permute.xlu0 %2050  ;;  %v2089_v41 = vrot.slane %v2080_v62, %v4973_v10 }
 0xfc2   : > { %v2059_v29 = vmul.f32 %v2051_v14, %v5055_v53 }
 0xfc4   : > { %v2053_v15 = vpop.permute.xlu1 %2052  ;;  %2065 = vrot.lane.b32.xlu0 %v2059_v29, %s4712_s11 }
 0xfc5   : > { %v2055_v30 = vsel %vm2054_vm8, %v2051_v14, %v2053_v15  ;;  %v2061_v33 = vmul.f32 %v2053_v15, %v5136_v54 }
 0xfc6   : > { %v2060_v38 = vmul.f32 %v2055_v30, %v5171_v11 }
 0xfc8   : > { %2069 = vrot.lane.b32.xlu0 %v2061_v33, %s4712_s11  ;;  %2067 = vrot.lane.b32.xlu1 %v2060_v38, %s4712_s11  ;;  %v2121_v33 = vmul.f32 %v5566_v60, %v2120_v12 }
 0xfcc   : > { %2092 = vrot.lane.b32.xlu0 %v2089_v41, %s4723_s18  ;;  %2090 = vrot.lane.b32.xlu1 %v2085_v31, %s4723_s18  ;;  %v2126_v31 = vrot.slane %v2121_v33, %v4971_v9  ;;  %s4726_s18 = smov 54  }
0x1036   : > { %v5794_v29 = vpop.permute.xlu0 %2065 }
0x1037   : > { %7410 = vst [vmem:[#allocation108_spill] sm:$0xff] %v5794_v29 }
0x103a   : > { %v5796_v43 = vpop.permute.xlu0 %2069  ;;  %v5798_v14 = vpop.permute.xlu1 %2067 }
0x103b   : > { %7411 = vst [vmem:[#allocation109_spill] sm:$0xff] %v5796_v43  ;;  %7412 = vst [vmem:[#allocation110_spill] sm:$0xff] %v5798_v14  ;;  %v2130_v43 = vrot.slane %v2121_v33, %v4973_v10  ;;  %v6138_v14 = vld [vmem:[#allocation7 + $0x6] ss:$8 sm:$0x3] }
0x103e   : > { %v2093_v15 = vpop.permute.xlu0 %2092  ;;  %v2091_v30 = vpop.permute.xlu1 %2090 }
0x103f   : > { %v2094_v38 = vsel %vm2054_vm8, %v2091_v30, %v2093_v15  ;;  %v2098_v28 = vmul.f32 %v2091_v30, %v5051_v51  ;;  %v2100_v41 = vmul.f32 %v2093_v15, %v5124_v40  ;;  %vm3327_vm8 = vcmask 687104  }
0x1040   : > { %v2099_v62 = vmul.f32 %v2094_v38, %v5067_v59 }
0x1041   : > { %2104 = vrot.lane.b32.xlu1 %v2098_v28, %s4712_s11 }
0x1042   : > { %2106 = vrot.lane.b32.xlu0 %v2099_v62, %s4712_s11  ;;  %v2159_v62 = vstv %s4314_s28  ;;  %s4322_s28 = sld [smem:[#allocation6 + $0x4d]] }
0x1043   : > { %v2160_v33 = vmul.f32 %v5566_v60, %v2159_v62 }
0x1045   : > { %2108 = vrot.lane.b32.xlu1 %v2100_v41, %s4712_s11  ;;  %s4315_s11 = sld [smem:[#allocation6 + $0x19]] }
0x1046   : > { %2131 = vrot.lane.b32.xlu0 %v2126_v31, %s4689_s5 }
0x1049   : > { %2133 = vrot.lane.b32.xlu1 %v2130_v43, %s4689_s5 }
0x104b   : > { %v2200_v62 = vstv %s4315_s11  ;;  %s4728_s11 = smov 65  }
0x10b3   : > { %v5812_v12 = vpop.permute.xlu1 %2104 }
0x10b4   : > { %7413 = vst [vmem:[#allocation111_spill] sm:$0xff] %v5812_v12  ;;  %v5814_v30 = vpop.permute.xlu0 %2106  ;;  %v2165_v12 = vrot.slane %v2160_v33, %v4971_v9 }
0x10b5   : > { %7414 = vst [vmem:[#allocation112_spill] sm:$0xff] %v5814_v30  ;;  %v6104_v30 = vld [vmem:[#allocation7 + $0x5] ss:$8 sm:$0x3] }
0x10b7   : > { %v5816_v28 = vpop.permute.xlu1 %2108 }
0x10b8   : > { %7415 = vst [vmem:[#allocation113_spill] sm:$0xff] %v5816_v28  ;;  %v2132_v38 = vpop.permute.xlu0 %2131  ;;  %v2169_v28 = vrot.slane %v2160_v33, %v4973_v10 }
0x10b9   : > { %v2139_v29 = vmul.f32 %v2132_v38, %v5055_v53 }
0x10bb   : > { %v2134_v15 = vpop.permute.xlu1 %2133  ;;  %2145 = vrot.lane.b32.xlu0 %v2139_v29, %s4714_s30 }
0x10bc   : > { %v2135_v31 = vsel %vm254_vm1, %v2132_v38, %v2134_v15  ;;  %v2141_v43 = vmul.f32 %v2134_v15, %v5136_v54 }
0x10bd   : > { %v2140_v41 = vmul.f32 %v2135_v31, %v5171_v11 }
0x10bf   : > { %2149 = vrot.lane.b32.xlu0 %v2141_v43, %s4714_s30  ;;  %2147 = vrot.lane.b32.xlu1 %v2140_v41, %s4714_s30  ;;  %v2201_v43 = vmul.f32 %v5600_v36, %v2200_v62 }
0x10c3   : > { %2172 = vrot.lane.b32.xlu0 %v2169_v28, %s4689_s5  ;;  %2170 = vrot.lane.b32.xlu1 %v2165_v12, %s4689_s5  ;;  %v2206_v12 = vrot.slane %v2201_v43, %v4971_v9  ;;  %s4724_s5 = smov 52  }
0x112d   : > { %v5830_v60 = vpop.permute.xlu0 %2145 }
0x112e   : > { %7416 = vst [vmem:[#allocation114_spill] sm:$0xff] %v5830_v60  ;;  %v2210_v60 = vrot.slane %v2201_v43, %v4973_v10 }
0x1131   : > { %v5832_v29 = vpop.permute.xlu0 %2149  ;;  %v5834_v38 = vpop.permute.xlu1 %2147 }
0x1132   : > { %7417 = vst [vmem:[#allocation115_spill] sm:$0xff] %v5832_v29  ;;  %7418 = vst [vmem:[#allocation116_spill] sm:$0xff] %v5834_v38 }
0x1135   : > { %v2173_v15 = vpop.permute.xlu0 %2172  ;;  %v2171_v31 = vpop.permute.xlu1 %2170 }
0x1136   : > { %v2174_v41 = vsel %vm254_vm1, %v2171_v31, %v2173_v15  ;;  %v2178_v33 = vmul.f32 %v2171_v31, %v5051_v51  ;;  %v2180_v29 = vmul.f32 %v2173_v15, %v5124_v40  ;;  %vm2215_vm1 = vcmask 424960  }
0x1137   : > { %v2179_v28 = vmul.f32 %v2174_v41, %v5067_v59 }
0x1138   : > { %2184 = vrot.lane.b32.xlu1 %v2178_v33, %s4714_s30 }
0x1139   : > { %2186 = vrot.lane.b32.xlu0 %v2179_v28, %s4714_s30  ;;  %v2240_v28 = vstv %s4316_s4  ;;  %s4729_s4 = smov 63  }
0x113c   : > { %2188 = vrot.lane.b32.xlu1 %v2180_v29, %s4714_s30  ;;  %v2241_v29 = vmul.f32 %v5600_v36, %v2240_v28  ;;  %s4317_s30 = sld [smem:[#allocation6 + $0x1a]] }
0x113d   : > { %2211 = vrot.lane.b32.xlu0 %v2206_v12, %s4724_s5 }
0x1140   : > { %2213 = vrot.lane.b32.xlu1 %v2210_v60, %s4724_s5 }
0x1142   : > { %v2281_v28 = vstv %s4317_s30  ;;  %s4325_s30 = sld [smem:[#allocation6 + $0x1e]] }
0x11aa   : > { %v5846_v62 = vpop.permute.xlu1 %2184 }
0x11ab   : > { %7419 = vst [vmem:[#allocation117_spill] sm:$0xff] %v5846_v62  ;;  %v5848_v31 = vpop.permute.xlu0 %2186  ;;  %v2246_v62 = vrot.slane %v2241_v29, %v4971_v9 }
0x11ac   : > { %7420 = vst [vmem:[#allocation118_spill] sm:$0xff] %v5848_v31 }
0x11ae   : > { %v5850_v41 = vpop.permute.xlu1 %2188 }
0x11af   : > { %7421 = vst [vmem:[#allocation119_spill] sm:$0xff] %v5850_v41  ;;  %v2212_v33 = vpop.permute.xlu0 %2211  ;;  %v2250_v41 = vrot.slane %v2241_v29, %v4973_v10 }
0x11b0   : > { %v2220_v38 = vmul.f32 %v2212_v33, %v5055_v53 }
0x11b2   : > { %v2214_v15 = vpop.permute.xlu1 %2213  ;;  %2226 = vrot.lane.b32.xlu0 %v2220_v38, %s4716_s10 }
0x11b3   : > { %v2216_v43 = vsel %vm2215_vm1, %v2212_v33, %v2214_v15  ;;  %v2222_v60 = vmul.f32 %v2214_v15, %v5136_v54 }
0x11b4   : > { %v2221_v12 = vmul.f32 %v2216_v43, %v5171_v11 }
0x11b6   : > { %2230 = vrot.lane.b32.xlu0 %v2222_v60, %s4716_s10  ;;  %2228 = vrot.lane.b32.xlu1 %v2221_v12, %s4716_s10  ;;  %v2282_v60 = vmul.f32 %v5634_v32, %v2281_v28 }
0x11ba   : > { %2253 = vrot.lane.b32.xlu0 %v2250_v41, %s4724_s5  ;;  %2251 = vrot.lane.b32.xlu1 %v2246_v62, %s4724_s5  ;;  %v2287_v62 = vrot.slane %v2282_v60, %v4971_v9  ;;  %s4324_s5 = sld [smem:[#allocation6 + $0x4e]] }
0x1224   : > { %v5862_v38 = vpop.permute.xlu0 %2226 }
0x1225   : > { %7422 = vst [vmem:[#allocation120_spill] sm:$0xff] %v5862_v38 }
0x1228   : > { %v5864_v36 = vpop.permute.xlu0 %2230  ;;  %v5866_v33 = vpop.permute.xlu1 %2228 }
0x1229   : > { %7423 = vst [vmem:[#allocation121_spill] sm:$0xff] %v5864_v36  ;;  %7424 = vst [vmem:[#allocation122_spill] sm:$0xff] %v5866_v33  ;;  %v2291_v36 = vrot.slane %v2282_v60, %v4973_v10  ;;  %v6070_v33 = vld [vmem:[#allocation7 + $0x4] ss:$8 sm:$0x3] }
0x122c   : > { %v2254_v15 = vpop.permute.xlu0 %2253  ;;  %v2252_v43 = vpop.permute.xlu1 %2251 }
0x122d   : > { %v2255_v12 = vsel %vm2215_vm1, %v2252_v43, %v2254_v15  ;;  %v2259_v31 = vmul.f32 %v2252_v43, %v5051_v51  ;;  %v2261_v41 = vmul.f32 %v2254_v15, %v5124_v40  ;;  %vm3408_vm1 = vcmask 695296  }
0x122e   : > { %v2260_v29 = vmul.f32 %v2255_v12, %v5067_v59 }
0x122f   : > { %2265 = vrot.lane.b32.xlu1 %v2259_v31, %s4716_s10 }
0x1230   : > { %2267 = vrot.lane.b32.xlu0 %v2260_v29, %s4716_s10  ;;  %v2321_v29 = vstv %s4318_s22  ;;  %s4326_s22 = sld [smem:[#allocation6 + $0x4f]] }
0x1231   : > { %v2322_v60 = vmul.f32 %v5634_v32, %v2321_v29 }
0x1233   : > { %2269 = vrot.lane.b32.xlu1 %v2261_v41, %s4716_s10  ;;  %s4319_s10 = sld [smem:[#allocation6 + $0x1b]] }
0x1234   : > { %2292 = vrot.lane.b32.xlu0 %v2287_v62, %s4725_s6 }
0x1237   : > { %2294 = vrot.lane.b32.xlu1 %v2291_v36, %s4725_s6 }
0x1239   : > { %v2362_v29 = vstv %s4319_s10  ;;  %s4731_s10 = smov 62  }
0x12a1   : > { %v5878_v28 = vpop.permute.xlu1 %2265 }
0x12a2   : > { %7425 = vst [vmem:[#allocation123_spill] sm:$0xff] %v5878_v28  ;;  %v5880_v43 = vpop.permute.xlu0 %2267  ;;  %v2327_v28 = vrot.slane %v2322_v60, %v4971_v9 }
0x12a3   : > { %7426 = vst [vmem:[#allocation124_spill] sm:$0xff] %v5880_v43 }
0x12a5   : > { %v5882_v12 = vpop.permute.xlu1 %2269 }
0x12a6   : > { %7427 = vst [vmem:[#allocation125_spill] sm:$0xff] %v5882_v12  ;;  %v2293_v31 = vpop.permute.xlu0 %2292  ;;  %v2331_v12 = vrot.slane %v2322_v60, %v4973_v10 }
0x12a7   : > { %v2301_v38 = vmul.f32 %v2293_v31, %v5055_v53 }
0x12a9   : > { %v2295_v15 = vpop.permute.xlu1 %2294  ;;  %2307 = vrot.lane.b32.xlu0 %v2301_v38, %s4718_s21 }
0x12aa   : > { %v2297_v62 = vsel %vm2296_vm9, %v2293_v31, %v2295_v15  ;;  %v2303_v36 = vmul.f32 %v2295_v15, %v5136_v54 }
0x12ab   : > { %v2302_v41 = vmul.f32 %v2297_v62, %v5171_v11 }
0x12ad   : > { %2311 = vrot.lane.b32.xlu0 %v2303_v36, %s4718_s21  ;;  %2309 = vrot.lane.b32.xlu1 %v2302_v41, %s4718_s21  ;;  %v2363_v36 = vmul.f32 %v5668_v21, %v2362_v29 }
0x12b1   : > { %2334 = vrot.lane.b32.xlu0 %v2331_v12, %s4725_s6  ;;  %2332 = vrot.lane.b32.xlu1 %v2327_v28, %s4725_s6  ;;  %v2368_v28 = vrot.slane %v2363_v36, %v4971_v9  ;;  %s4730_s6 = smov 66  }
0x131b   : > { %v5894_v38 = vpop.permute.xlu0 %2307 }
0x131c   : > { %7428 = vst [vmem:[#allocation126_spill] sm:$0xff] %v5894_v38 }
0x131f   : > { %v5896_v32 = vpop.permute.xlu0 %2311  ;;  %v5898_v31 = vpop.permute.xlu1 %2309 }
0x1320   : > { %7429 = vst [vmem:[#allocation127_spill] sm:$0xff] %v5896_v32  ;;  %7430 = vst [vmem:[#allocation128_spill] sm:$0xff] %v5898_v31  ;;  %v2372_v32 = vrot.slane %v2363_v36, %v4973_v10  ;;  %v6036_v31 = vld [vmem:[#allocation7 + $0x3] ss:$8 sm:$0x3] }
0x1323   : > { %v2335_v15 = vpop.permute.xlu0 %2334  ;;  %v2333_v62 = vpop.permute.xlu1 %2332 }
0x1324   : > { %v2336_v41 = vsel %vm2296_vm9, %v2333_v62, %v2335_v15  ;;  %v2340_v43 = vmul.f32 %v2333_v62, %v5051_v51  ;;  %v2342_v12 = vmul.f32 %v2335_v15, %v5124_v40  ;;  %vm3489_vm9 = vcmask 703488  }
0x1325   : > { %v2341_v60 = vmul.f32 %v2336_v41, %v5067_v59 }
0x1326   : > { %2346 = vrot.lane.b32.xlu1 %v2340_v43, %s4718_s21 }
0x1327   : > { %2348 = vrot.lane.b32.xlu0 %v2341_v60, %s4718_s21  ;;  %v2402_v60 = vstv %s4320_s27  ;;  %s4732_s27 = smov 67  }
0x1328   : > { %v2403_v36 = vmul.f32 %v5668_v21, %v2402_v60 }
0x132a   : > { %2350 = vrot.lane.b32.xlu1 %v2342_v12, %s4718_s21  ;;  %s4321_s21 = sld [smem:[#allocation6 + $0x1c]] }
0x132b   : > { %2373 = vrot.lane.b32.xlu0 %v2368_v28, %s4726_s18 }
0x132e   : > { %2375 = vrot.lane.b32.xlu1 %v2372_v32, %s4726_s18 }
0x1330   : > { %v2443_v60 = vstv %s4321_s21  ;;  %s4328_s21 = sld [smem:[#allocation6 + $0x50]] }
0x1398   : > { %v5910_v29 = vpop.permute.xlu1 %2346 }
0x1399   : > { %7431 = vst [vmem:[#allocation129_spill] sm:$0xff] %v5910_v29  ;;  %v5912_v62 = vpop.permute.xlu0 %2348  ;;  %v2408_v29 = vrot.slane %v2403_v36, %v4971_v9 }
0x139a   : > { %7432 = vst [vmem:[#allocation130_spill] sm:$0xff] %v5912_v62 }
0x139c   : > { %v5914_v41 = vpop.permute.xlu1 %2350 }
0x139d   : > { %7433 = vst [vmem:[#allocation131_spill] sm:$0xff] %v5914_v41  ;;  %v2374_v43 = vpop.permute.xlu0 %2373  ;;  %v2412_v41 = vrot.slane %v2403_v36, %v4973_v10 }
0x139e   : > { %v2382_v38 = vmul.f32 %v2374_v43, %v5055_v53 }
0x13a0   : > { %v2376_v15 = vpop.permute.xlu1 %2375  ;;  %2388 = vrot.lane.b32.xlu0 %v2382_v38, %s4720_s23 }
0x13a1   : > { %v2378_v28 = vsel %vm2377_vm10, %v2374_v43, %v2376_v15  ;;  %v2384_v32 = vmul.f32 %v2376_v15, %v5136_v54 }
0x13a2   : > { %v2383_v12 = vmul.f32 %v2378_v28, %v5171_v11 }
0x13a4   : > { %2392 = vrot.lane.b32.xlu0 %v2384_v32, %s4720_s23  ;;  %2390 = vrot.lane.b32.xlu1 %v2383_v12, %s4720_s23  ;;  %v2444_v32 = vmul.f32 %v5702_v24, %v2443_v60 }
0x13a8   : > { %2415 = vrot.lane.b32.xlu0 %v2412_v41, %s4726_s18  ;;  %2413 = vrot.lane.b32.xlu1 %v2408_v29, %s4726_s18  ;;  %v2449_v29 = vrot.slane %v2444_v32, %v4971_v9  ;;  %s4327_s18 = sld [smem:[#allocation6 + $0x1f]] }
0x1412   : > { %v5926_v38 = vpop.permute.xlu0 %2388 }
0x1413   : > { %7434 = vst [vmem:[#allocation132_spill] sm:$0xff] %v5926_v38 }
0x1416   : > { %v5928_v21 = vpop.permute.xlu0 %2392  ;;  %v5930_v43 = vpop.permute.xlu1 %2390 }
0x1417   : > { %7435 = vst [vmem:[#allocation133_spill] sm:$0xff] %v5928_v21  ;;  %7436 = vst [vmem:[#allocation134_spill] sm:$0xff] %v5930_v43  ;;  %v2453_v21 = vrot.slane %v2444_v32, %v4973_v10  ;;  %v6002_v43 = vld [vmem:[#allocation7 + $0x2] ss:$8 sm:$0x3] }
0x141a   : > { %v2416_v15 = vpop.permute.xlu0 %2415  ;;  %v2414_v28 = vpop.permute.xlu1 %2413 }
0x141b   : > { %v2417_v12 = vsel %vm2377_vm10, %v2414_v28, %v2416_v15  ;;  %v2421_v62 = vmul.f32 %v2414_v28, %v5051_v51  ;;  %v2423_v41 = vmul.f32 %v2416_v15, %v5124_v40  ;;  %vm807_vm10 = vcmask 130048  }
0x141c   : > { %v2422_v36 = vmul.f32 %v2417_v12, %v5067_v59 }
0x141d   : > { %2427 = vrot.lane.b32.xlu1 %v2421_v62, %s4720_s23 }
0x141e   : > { %2429 = vrot.lane.b32.xlu0 %v2422_v36, %s4720_s23  ;;  %v2481_v36 = vstv %s4322_s28  ;;  %s4733_s28 = smov 61  }
0x141f   : > { %v2482_v32 = vmul.f32 %v5702_v24, %v2481_v36 }
0x1421   : > { %2431 = vrot.lane.b32.xlu1 %v2423_v41, %s4720_s23  ;;  %s4323_s23 = sld [smem:[#allocation6 + $0x1d]] }
0x1422   : > { %2454 = vrot.lane.b32.xlu0 %v2449_v29, %s4727_s9 }
0x1425   : > { %2456 = vrot.lane.b32.xlu1 %v2453_v21, %s4727_s9 }
0x148f   : > { %v5944_v60 = vpop.permute.xlu1 %2427 }
0x1490   : > { %7437 = vst [vmem:[#allocation135_spill] sm:$0xff] %v5944_v60  ;;  %v5946_v28 = vpop.permute.xlu0 %2429 }
0x1491   : > { %7438 = vst [vmem:[#allocation136_spill] sm:$0xff] %v5946_v28  ;;  %v2487_v28 = vrot.slane %v2482_v32, %v4971_v9 }
0x1493   : > { %v5948_v62 = vpop.permute.xlu1 %2431 }
0x1494   : > { %7439 = vst [vmem:[#allocation137_spill] sm:$0xff] %v5948_v62  ;;  %v2455_v12 = vpop.permute.xlu0 %2454  ;;  %v2491_v62 = vrot.slane %v2482_v32, %v4973_v10 }
0x1495   : > { %v2463_v15 = vmul.f32 %v2455_v12, %v5055_v53 }
0x1497   : > { %v2457_v41 = vpop.permute.xlu1 %2456  ;;  %2469 = vrot.lane.b32.xlu0 %v2463_v15, %s4727_s9  ;;  %v2520_v15 = vstv %s4323_s23  ;;  %s4329_s23 = sld [smem:[#allocation6 + $0x20]] }
0x1498   : > { %v2459_v29 = vsel %vm7298_vm11, %v2455_v12, %v2457_v41  ;;  %v2465_v21 = vmul.f32 %v2457_v41, %v5136_v54 }
0x1499   : > { %v2464_v60 = vmul.f32 %v2459_v29, %v5171_v11 }
0x149b   : > { %2473 = vrot.lane.b32.xlu0 %v2465_v21, %s4727_s9  ;;  %2471 = vrot.lane.b32.xlu1 %v2464_v60, %s4727_s9  ;;  %v5968_v21 = vld [vmem:[#allocation7 + $0x1] ss:$8 sm:$0x3] }
0x149c   : > { %v2521_v60 = vmul.f32 %v5968_v21, %v2520_v15 }
0x149f   : > { %2494 = vrot.lane.b32.xlu0 %v2491_v62, %s4727_s9  ;;  %2492 = vrot.lane.b32.xlu1 %v2487_v28, %s4727_s9 }
0x1509   : > { %v5962_v24 = vpop.permute.xlu0 %2469 }
0x150a   : > { %7440 = vst [vmem:[#allocation138_spill] sm:$0xff] %v5962_v24 }
0x150d   : > { %v5964_v12 = vpop.permute.xlu0 %2473  ;;  %v5966_v36 = vpop.permute.xlu1 %2471 }
0x150e   : > { %7441 = vst [vmem:[#allocation139_spill] sm:$0xff] %v5964_v12  ;;  %7442 = vst [vmem:[#allocation140_spill] sm:$0xff] %v5966_v36  ;;  %v2526_v12 = vrot.slane %v2521_v60, %v4971_v9  ;;  %v2530_v36 = vrot.slane %v2521_v60, %v4973_v10 }
0x1511   : > { %v2495_v41 = vpop.permute.xlu0 %2494  ;;  %v2493_v29 = vpop.permute.xlu1 %2492 }
0x1512   : > { %v2496_v32 = vsel %vm7298_vm11, %v2493_v29, %v2495_v41  ;;  %v2500_v62 = vmul.f32 %v2493_v29, %v5051_v51  ;;  %v2502_v24 = vmul.f32 %v2495_v41, %v5124_v40 }
0x1513   : > { %v2501_v28 = vmul.f32 %v2496_v32, %v5067_v59 }
0x1514   : > { %2506 = vrot.lane.b32.xlu1 %v2500_v62, %s4727_s9 }
0x1515   : > { %2508 = vrot.lane.b32.xlu0 %v2501_v28, %s4727_s9  ;;  %v2559_v28 = vstv %s4324_s5  ;;  %s4330_s5 = sld [smem:[#allocation6 + $0x51]] }
0x1518   : > { %2510 = vrot.lane.b32.xlu1 %v2502_v24, %s4727_s9  ;;  %v2560_v24 = vmul.f32 %v5968_v21, %v2559_v28 }
0x1519   : > { %2531 = vrot.lane.b32.xlu0 %v2526_v12, %s4728_s11 }
0x151c   : > { %2533 = vrot.lane.b32.xlu1 %v2530_v36, %s4728_s11 }
0x1586   : > { %v5980_v15 = vpop.permute.xlu1 %2506 }
0x1587   : > { %7443 = vst [vmem:[#allocation141_spill] sm:$0xff] %v5980_v15  ;;  %v5982_v29 = vpop.permute.xlu0 %2508  ;;  %v2565_v15 = vrot.slane %v2560_v24, %v4971_v9 }
0x1588   : > { %7444 = vst [vmem:[#allocation142_spill] sm:$0xff] %v5982_v29 }
0x158a   : > { %v5984_v32 = vpop.permute.xlu1 %2510 }
0x158b   : > { %7445 = vst [vmem:[#allocation143_spill] sm:$0xff] %v5984_v32  ;;  %v2532_v62 = vpop.permute.xlu0 %2531  ;;  %v2569_v32 = vrot.slane %v2560_v24, %v4973_v10 }
0x158c   : > { %v2540_v38 = vmul.f32 %v2532_v62, %v5055_v53 }
0x158e   : > { %v2534_v41 = vpop.permute.xlu1 %2533  ;;  %2546 = vrot.lane.b32.xlu0 %v2540_v38, %s4729_s4 }
0x158f   : > { %v2536_v12 = vsel %vm2535_vm12, %v2532_v62, %v2534_v41  ;;  %v2542_v36 = vmul.f32 %v2534_v41, %v5136_v54  ;;  %v2598_v41 = vstv %s4325_s30  ;;  %s4735_s30 = smov 60  }
0x1590   : > { %v2541_v60 = vmul.f32 %v2536_v12, %v5171_v11 }
0x1592   : > { %2550 = vrot.lane.b32.xlu0 %v2542_v36, %s4729_s4  ;;  %2548 = vrot.lane.b32.xlu1 %v2541_v60, %s4729_s4  ;;  %v2599_v36 = vmul.f32 %v6002_v43, %v2598_v41 }
0x1596   : > { %2572 = vrot.lane.b32.xlu0 %v2569_v32, %s4728_s11  ;;  %2570 = vrot.lane.b32.xlu1 %v2565_v15, %s4728_s11  ;;  %v2604_v32 = vrot.slane %v2599_v36, %v4971_v9  ;;  %s4734_s11 = smov 68  }
0x1600   : > { %v5996_v38 = vpop.permute.xlu0 %2546 }
0x1601   : > { %7446 = vst [vmem:[#allocation144_spill] sm:$0xff] %v5996_v38  ;;  %v2608_v38 = vrot.slane %v2599_v36, %v4973_v10 }
0x1604   : > { %v5998_v28 = vpop.permute.xlu0 %2550  ;;  %v6000_v62 = vpop.permute.xlu1 %2548 }
0x1605   : > { %7447 = vst [vmem:[#allocation145_spill] sm:$0xff] %v5998_v28  ;;  %7448 = vst [vmem:[#allocation146_spill] sm:$0xff] %v6000_v62 }
0x1608   : > { %v2573_v29 = vpop.permute.xlu0 %2572  ;;  %v2571_v12 = vpop.permute.xlu1 %2570 }
0x1609   : > { %v2574_v60 = vsel %vm2535_vm12, %v2571_v12, %v2573_v29  ;;  %v2578_v24 = vmul.f32 %v2571_v12, %v5051_v51  ;;  %v2580_v28 = vmul.f32 %v2573_v29, %v5124_v40  ;;  %vm356_vm12 = vcmask 1039360  }
0x160a   : > { %v2579_v15 = vmul.f32 %v2574_v60, %v5067_v59 }
0x160b   : > { %2584 = vrot.lane.b32.xlu1 %v2578_v24, %s4729_s4 }
0x160c   : > { %2586 = vrot.lane.b32.xlu0 %v2579_v15, %s4729_s4  ;;  %v2637_v15 = vstv %s4326_s22  ;;  %s4736_s22 = smov 69  }
0x160f   : > { %2588 = vrot.lane.b32.xlu1 %v2580_v28, %s4729_s4  ;;  %v2638_v28 = vmul.f32 %v6002_v43, %v2637_v15 }
0x1610   : > { %2609 = vrot.lane.b32.xlu0 %v2604_v32, %s4730_s6 }
0x1613   : > { %2611 = vrot.lane.b32.xlu1 %v2608_v38, %s4730_s6 }
0x167d   : > { %v6014_v41 = vpop.permute.xlu1 %2584 }
0x167e   : > { %7449 = vst [vmem:[#allocation147_spill] sm:$0xff] %v6014_v41  ;;  %v6016_v12 = vpop.permute.xlu0 %2586  ;;  %v2643_v41 = vrot.slane %v2638_v28, %v4971_v9 }
0x167f   : > { %7450 = vst [vmem:[#allocation148_spill] sm:$0xff] %v6016_v12 }
0x1681   : > { %v6018_v60 = vpop.permute.xlu1 %2588 }
0x1682   : > { %7451 = vst [vmem:[#allocation149_spill] sm:$0xff] %v6018_v60  ;;  %v2610_v24 = vpop.permute.xlu0 %2609  ;;  %v2647_v60 = vrot.slane %v2638_v28, %v4973_v10 }
0x1683   : > { %v2618_v62 = vmul.f32 %v2610_v24, %v5055_v53 }
0x1685   : > { %v2612_v29 = vpop.permute.xlu1 %2611  ;;  %2624 = vrot.lane.b32.xlu0 %v2618_v62, %s4731_s10 }
0x1686   : > { %v2614_v38 = vsel %vm2613_vm13, %v2610_v24, %v2612_v29  ;;  %v2620_v36 = vmul.f32 %v2612_v29, %v5136_v54  ;;  %v2676_v29 = vstv %s4327_s18  ;;  %s4332_s18 = sld [smem:[#allocation6 + $0x52]] }
0x1687   : > { %v2619_v32 = vmul.f32 %v2614_v38, %v5171_v11 }
0x1689   : > { %2628 = vrot.lane.b32.xlu0 %v2620_v36, %s4731_s10  ;;  %2626 = vrot.lane.b32.xlu1 %v2619_v32, %s4731_s10  ;;  %v2677_v36 = vmul.f32 %v6036_v31, %v2676_v29 }
0x168d   : > { %2650 = vrot.lane.b32.xlu0 %v2647_v60, %s4730_s6  ;;  %2648 = vrot.lane.b32.xlu1 %v2643_v41, %s4730_s6  ;;  %v2682_v60 = vrot.slane %v2677_v36, %v4971_v9  ;;  %s4331_s6 = sld [smem:[#allocation6 + $0x21]] }
0x16f7   : > { %v6030_v62 = vpop.permute.xlu0 %2624 }
0x16f8   : > { %7452 = vst [vmem:[#allocation150_spill] sm:$0xff] %v6030_v62  ;;  %v2686_v62 = vrot.slane %v2677_v36, %v4973_v10 }
0x16fb   : > { %v6032_v15 = vpop.permute.xlu0 %2628  ;;  %v6034_v24 = vpop.permute.xlu1 %2626 }
0x16fc   : > { %7453 = vst [vmem:[#allocation151_spill] sm:$0xff] %v6032_v15  ;;  %7454 = vst [vmem:[#allocation152_spill] sm:$0xff] %v6034_v24 }
0x16ff   : > { %v2651_v12 = vpop.permute.xlu0 %2650  ;;  %v2649_v38 = vpop.permute.xlu1 %2648 }
0x1700   : > { %v2652_v32 = vsel %vm2613_vm13, %v2649_v38, %v2651_v12  ;;  %v2656_v28 = vmul.f32 %v2649_v38, %v5051_v51  ;;  %v2658_v15 = vmul.f32 %v2651_v12, %v5124_v40  ;;  %vm434_vm13 = vcmask 1031168  }
0x1701   : > { %v2657_v41 = vmul.f32 %v2652_v32, %v5067_v59 }
0x1702   : > { %2662 = vrot.lane.b32.xlu1 %v2656_v28, %s4731_s10 }
0x1703   : > { %2664 = vrot.lane.b32.xlu0 %v2657_v41, %s4731_s10  ;;  %v2715_v41 = vstv %s4328_s21  ;;  %s4333_s21 = sld [smem:[#allocation6 + $0x22]] }
0x1706   : > { %2666 = vrot.lane.b32.xlu1 %v2658_v15, %s4731_s10  ;;  %v2716_v15 = vmul.f32 %v6036_v31, %v2715_v41 }
0x1707   : > { %2687 = vrot.lane.b32.xlu0 %v2682_v60, %s4732_s27 }
0x170a   : > { %2689 = vrot.lane.b32.xlu1 %v2686_v62, %s4732_s27 }
0x1774   : > { %v6048_v29 = vpop.permute.xlu1 %2662 }
0x1775   : > { %7455 = vst [vmem:[#allocation153_spill] sm:$0xff] %v6048_v29  ;;  %v6050_v38 = vpop.permute.xlu0 %2664  ;;  %v2721_v29 = vrot.slane %v2716_v15, %v4971_v9 }
0x1776   : > { %7456 = vst [vmem:[#allocation154_spill] sm:$0xff] %v6050_v38 }
0x1778   : > { %v6052_v32 = vpop.permute.xlu1 %2666 }
0x1779   : > { %7457 = vst [vmem:[#allocation155_spill] sm:$0xff] %v6052_v32  ;;  %v2688_v28 = vpop.permute.xlu0 %2687  ;;  %v2725_v32 = vrot.slane %v2716_v15, %v4973_v10 }
0x177a   : > { %v2696_v24 = vmul.f32 %v2688_v28, %v5055_v53 }
0x177c   : > { %v2690_v12 = vpop.permute.xlu1 %2689  ;;  %2702 = vrot.lane.b32.xlu0 %v2696_v24, %s4733_s28 }
0x177d   : > { %v2692_v62 = vsel %vm2691_vm15, %v2688_v28, %v2690_v12  ;;  %v2698_v36 = vmul.f32 %v2690_v12, %v5136_v54  ;;  %v2754_v12 = vstv %s4329_s23  ;;  %s4738_s23 = smov 70  }
0x177e   : > { %v2697_v60 = vmul.f32 %v2692_v62, %v5171_v11 }
0x1780   : > { %2706 = vrot.lane.b32.xlu0 %v2698_v36, %s4733_s28  ;;  %2704 = vrot.lane.b32.xlu1 %v2697_v60, %s4733_s28  ;;  %v2755_v36 = vmul.f32 %v6070_v33, %v2754_v12 }
0x1784   : > { %2728 = vrot.lane.b32.xlu0 %v2725_v32, %s4732_s27  ;;  %2726 = vrot.lane.b32.xlu1 %v2721_v29, %s4732_s27  ;;  %v2760_v32 = vrot.slane %v2755_v36, %v4971_v9  ;;  %s4737_s27 = smov 59  }
0x17ee   : > { %v6064_v24 = vpop.permute.xlu0 %2702 }
0x17ef   : > { %7458 = vst [vmem:[#allocation156_spill] sm:$0xff] %v6064_v24  ;;  %v2764_v24 = vrot.slane %v2755_v36, %v4973_v10 }
0x17f2   : > { %v6066_v41 = vpop.permute.xlu0 %2706  ;;  %v6068_v28 = vpop.permute.xlu1 %2704 }
0x17f3   : > { %7459 = vst [vmem:[#allocation157_spill] sm:$0xff] %v6066_v41  ;;  %7460 = vst [vmem:[#allocation158_spill] sm:$0xff] %v6068_v28 }
0x17f6   : > { %v2729_v38 = vpop.permute.xlu0 %2728  ;;  %v2727_v62 = vpop.permute.xlu1 %2726 }
0x17f7   : > { %v2730_v60 = vsel %vm2691_vm15, %v2727_v62, %v2729_v38  ;;  %v2734_v15 = vmul.f32 %v2727_v62, %v5051_v51  ;;  %v2736_v41 = vmul.f32 %v2729_v38, %v5124_v40  ;;  %vm512_vm15 = vcmask 1022976  }
0x17f8   : > { %v2735_v29 = vmul.f32 %v2730_v60, %v5067_v59 }
0x17f9   : > { %2740 = vrot.lane.b32.xlu1 %v2734_v15, %s4733_s28 }
0x17fa   : > { %2742 = vrot.lane.b32.xlu0 %v2735_v29, %s4733_s28  ;;  %v2793_v29 = vstv %s4330_s5  ;;  %s4739_s5 = smov 58  }
0x17fd   : > { %2744 = vrot.lane.b32.xlu1 %v2736_v41, %s4733_s28  ;;  %v2794_v41 = vmul.f32 %v6070_v33, %v2793_v29 }
0x17fe   : > { %2765 = vrot.lane.b32.xlu0 %v2760_v32, %s4734_s11 }
0x1801   : > { %2767 = vrot.lane.b32.xlu1 %v2764_v24, %s4734_s11 }
0x186b   : > { %v6082_v12 = vpop.permute.xlu1 %2740 }
0x186c   : > { %7461 = vst [vmem:[#allocation159_spill] sm:$0xff] %v6082_v12  ;;  %v6084_v62 = vpop.permute.xlu0 %2742  ;;  %v2799_v12 = vrot.slane %v2794_v41, %v4971_v9 }
0x186d   : > { %7462 = vst [vmem:[#allocation160_spill] sm:$0xff] %v6084_v62 }
0x186f   : > { %v6086_v60 = vpop.permute.xlu1 %2744 }
0x1870   : > { %7463 = vst [vmem:[#allocation161_spill] sm:$0xff] %v6086_v60  ;;  %v2766_v15 = vpop.permute.xlu0 %2765  ;;  %v2803_v60 = vrot.slane %v2794_v41, %v4973_v10 }
0x1871   : > { %v2774_v28 = vmul.f32 %v2766_v15, %v5055_v53 }
0x1873   : > { %v2768_v38 = vpop.permute.xlu1 %2767  ;;  %2780 = vrot.lane.b32.xlu0 %v2774_v28, %s4735_s30 }
0x1874   : > { %v2770_v24 = vsel %vm2769_vm0, %v2766_v15, %v2768_v38  ;;  %v2776_v36 = vmul.f32 %v2768_v38, %v5136_v54  ;;  %v2832_v38 = vstv %s4331_s6  ;;  %s4335_s6 = sld [smem:[#allocation6 + $0x23]] }
0x1875   : > { %v2775_v32 = vmul.f32 %v2770_v24, %v5171_v11 }
0x1877   : > { %2784 = vrot.lane.b32.xlu0 %v2776_v36, %s4735_s30  ;;  %2782 = vrot.lane.b32.xlu1 %v2775_v32, %s4735_s30  ;;  %v2833_v36 = vmul.f32 %v6104_v30, %v2832_v38 }
0x187b   : > { %2806 = vrot.lane.b32.xlu0 %v2803_v60, %s4734_s11  ;;  %2804 = vrot.lane.b32.xlu1 %v2799_v12, %s4734_s11  ;;  %v2838_v60 = vrot.slane %v2833_v36, %v4971_v9  ;;  %s4334_s11 = sld [smem:[#allocation6 + $0x53]] }
0x18e5   : > { %v6098_v28 = vpop.permute.xlu0 %2780 }
0x18e6   : > { %7464 = vst [vmem:[#allocation162_spill] sm:$0xff] %v6098_v28  ;;  %v2842_v28 = vrot.slane %v2833_v36, %v4973_v10 }
0x18e9   : > { %v6100_v29 = vpop.permute.xlu0 %2784  ;;  %v6102_v15 = vpop.permute.xlu1 %2782 }
0x18ea   : > { %7465 = vst [vmem:[#allocation163_spill] sm:$0xff] %v6100_v29  ;;  %7466 = vst [vmem:[#allocation164_spill] sm:$0xff] %v6102_v15 }
0x18ed   : > { %v2807_v62 = vpop.permute.xlu0 %2806  ;;  %v2805_v24 = vpop.permute.xlu1 %2804 }
0x18ee   : > { %v2808_v32 = vsel %vm2769_vm0, %v2805_v24, %v2807_v62  ;;  %v2812_v41 = vmul.f32 %v2805_v24, %v5051_v51  ;;  %v2814_v29 = vmul.f32 %v2807_v62, %v5124_v40  ;;  %vm590_vm0 = vcmask 1014784  }
0x18ef   : > { %v2813_v12 = vmul.f32 %v2808_v32, %v5067_v59 }
0x18f0   : > { %2818 = vrot.lane.b32.xlu1 %v2812_v41, %s4735_s30 }
0x18f1   : > { %2820 = vrot.lane.b32.xlu0 %v2813_v12, %s4735_s30  ;;  %v2871_v12 = vstv %s4332_s18  ;;  %s4336_s18 = sld [smem:[#allocation6 + $0x54]] }
0x18f4   : > { %2822 = vrot.lane.b32.xlu1 %v2814_v29, %s4735_s30  ;;  %v2872_v29 = vmul.f32 %v6104_v30, %v2871_v12 }
0x18f5   : > { %2843 = vrot.lane.b32.xlu0 %v2838_v60, %s4736_s22 }
0x18f8   : > { %2845 = vrot.lane.b32.xlu1 %v2842_v28, %s4736_s22 }
0x1962   : > { %v6116_v38 = vpop.permute.xlu1 %2818 }
0x1963   : > { %7467 = vst [vmem:[#allocation165_spill] sm:$0xff] %v6116_v38  ;;  %v6118_v24 = vpop.permute.xlu0 %2820  ;;  %v2877_v38 = vrot.slane %v2872_v29, %v4971_v9 }
0x1964   : > { %7468 = vst [vmem:[#allocation166_spill] sm:$0xff] %v6118_v24 }
0x1966   : > { %v6120_v32 = vpop.permute.xlu1 %2822 }
0x1967   : > { %7469 = vst [vmem:[#allocation167_spill] sm:$0xff] %v6120_v32  ;;  %v2844_v41 = vpop.permute.xlu0 %2843  ;;  %v2881_v32 = vrot.slane %v2872_v29, %v4973_v10 }
0x1968   : > { %v2852_v15 = vmul.f32 %v2844_v41, %v5055_v53 }
0x196a   : > { %v2846_v62 = vpop.permute.xlu1 %2845  ;;  %2858 = vrot.lane.b32.xlu0 %v2852_v15, %s4737_s27 }
0x196b   : > { %v2848_v28 = vsel %vm2847_vm2, %v2844_v41, %v2846_v62  ;;  %v2854_v36 = vmul.f32 %v2846_v62, %v5136_v54  ;;  %v2910_v62 = vstv %s4333_s21  ;;  %s4337_s21 = sld [smem:[#allocation6 + $0x24]] }
0x196c   : > { %v2853_v60 = vmul.f32 %v2848_v28, %v5171_v11 }
0x196e   : > { %2862 = vrot.lane.b32.xlu0 %v2854_v36, %s4737_s27  ;;  %2860 = vrot.lane.b32.xlu1 %v2853_v60, %s4737_s27  ;;  %v2911_v36 = vmul.f32 %v6138_v14, %v2910_v62 }
0x1972   : > { %2884 = vrot.lane.b32.xlu0 %v2881_v32, %s4736_s22  ;;  %2882 = vrot.lane.b32.xlu1 %v2877_v38, %s4736_s22  ;;  %v2916_v32 = vrot.slane %v2911_v36, %v4971_v9  ;;  %s4740_s22 = smov 80  }
0x19dc   : > { %v6132_v15 = vpop.permute.xlu0 %2858 }
0x19dd   : > { %7470 = vst [vmem:[#allocation168_spill] sm:$0xff] %v6132_v15  ;;  %v2920_v15 = vrot.slane %v2911_v36, %v4973_v10 }
0x19e0   : > { %v6134_v12 = vpop.permute.xlu0 %2862  ;;  %v6136_v41 = vpop.permute.xlu1 %2860 }
0x19e1   : > { %7471 = vst [vmem:[#allocation169_spill] sm:$0xff] %v6134_v12  ;;  %7472 = vst [vmem:[#allocation170_spill] sm:$0xff] %v6136_v41 }
0x19e4   : > { %v2885_v24 = vpop.permute.xlu0 %2884  ;;  %v2883_v28 = vpop.permute.xlu1 %2882 }
0x19e5   : > { %v2886_v60 = vsel %vm2847_vm2, %v2883_v28, %v2885_v24  ;;  %v2890_v29 = vmul.f32 %v2883_v28, %v5051_v51  ;;  %v2892_v12 = vmul.f32 %v2885_v24, %v5124_v40  ;;  %vm668_vm2 = vcmask 1006592  }
0x19e6   : > { %v2891_v38 = vmul.f32 %v2886_v60, %v5067_v59 }
0x19e7   : > { %2896 = vrot.lane.b32.xlu1 %v2890_v29, %s4737_s27 }
0x19e8   : > { %2898 = vrot.lane.b32.xlu0 %v2891_v38, %s4737_s27  ;;  %v2949_v38 = vstv %s4334_s11  ;;  %s4338_s11 = sld [smem:[#allocation6 + $0x55]] }
0x19eb   : > { %2900 = vrot.lane.b32.xlu1 %v2892_v12, %s4737_s27  ;;  %v2950_v12 = vmul.f32 %v6138_v14, %v2949_v38 }
0x19ec   : > { %2921 = vrot.lane.b32.xlu0 %v2916_v32, %s4738_s23 }
0x19ef   : > { %2923 = vrot.lane.b32.xlu1 %v2920_v15, %s4738_s23 }
0x1a59   : > { %v6150_v62 = vpop.permute.xlu1 %2896 }
0x1a5a   : > { %7473 = vst [vmem:[#allocation171_spill] sm:$0xff] %v6150_v62  ;;  %v6152_v28 = vpop.permute.xlu0 %2898  ;;  %v2955_v62 = vrot.slane %v2950_v12, %v4971_v9 }
0x1a5b   : > { %7474 = vst [vmem:[#allocation172_spill] sm:$0xff] %v6152_v28 }
0x1a5d   : > { %v6154_v60 = vpop.permute.xlu1 %2900 }
0x1a5e   : > { %7475 = vst [vmem:[#allocation173_spill] sm:$0xff] %v6154_v60  ;;  %v2922_v29 = vpop.permute.xlu0 %2921  ;;  %v2959_v60 = vrot.slane %v2950_v12, %v4973_v10 }
0x1a5f   : > { %v2930_v41 = vmul.f32 %v2922_v29, %v5055_v53 }
0x1a61   : > { %v2924_v24 = vpop.permute.xlu1 %2923  ;;  %2936 = vrot.lane.b32.xlu0 %v2930_v41, %s4739_s5 }
0x1a62   : > { %v2926_v15 = vsel %vm2925_vm3, %v2922_v29, %v2924_v24  ;;  %v2932_v36 = vmul.f32 %v2924_v24, %v5136_v54  ;;  %v2988_v24 = vstv %s4335_s6  ;;  %s4742_s6 = smov 82  }
0x1a63   : > { %v2931_v32 = vmul.f32 %v2926_v15, %v5171_v11 }
0x1a65   : > { %2940 = vrot.lane.b32.xlu0 %v2932_v36, %s4739_s5  ;;  %2938 = vrot.lane.b32.xlu1 %v2931_v32, %s4739_s5  ;;  %v2989_v36 = vmul.f32 %v6172_v20, %v2988_v24 }
0x1a69   : > { %2962 = vrot.lane.b32.xlu0 %v2959_v60, %s4738_s23  ;;  %2960 = vrot.lane.b32.xlu1 %v2955_v62, %s4738_s23  ;;  %v2994_v60 = vrot.slane %v2989_v36, %v4971_v9  ;;  %s4741_s23 = smov 81  }
0x1ad3   : > { %v6166_v41 = vpop.permute.xlu0 %2936 }
0x1ad4   : > { %7476 = vst [vmem:[#allocation174_spill] sm:$0xff] %v6166_v41  ;;  %v2998_v41 = vrot.slane %v2989_v36, %v4973_v10 }
0x1ad7   : > { %v6168_v38 = vpop.permute.xlu0 %2940  ;;  %v6170_v29 = vpop.permute.xlu1 %2938 }
0x1ad8   : > { %7477 = vst [vmem:[#allocation175_spill] sm:$0xff] %v6168_v38  ;;  %7478 = vst [vmem:[#allocation176_spill] sm:$0xff] %v6170_v29 }
0x1adb   : > { %v2963_v28 = vpop.permute.xlu0 %2962  ;;  %v2961_v15 = vpop.permute.xlu1 %2960 }
0x1adc   : > { %v2964_v32 = vsel %vm2925_vm3, %v2961_v15, %v2963_v28  ;;  %v2968_v12 = vmul.f32 %v2961_v15, %v5051_v51  ;;  %v2970_v38 = vmul.f32 %v2963_v28, %v5124_v40  ;;  %vm746_vm3 = vcmask 998400  }
0x1add   : > { %v2969_v62 = vmul.f32 %v2964_v32, %v5067_v59 }
0x1ade   : > { %2974 = vrot.lane.b32.xlu1 %v2968_v12, %s4739_s5 }
0x1adf   : > { %2976 = vrot.lane.b32.xlu0 %v2969_v62, %s4739_s5  ;;  %v3028_v62 = vstv %s4336_s18  ;;  %s4342_s18 = sld [smem:[#allocation6 + $0x57]] }
0x1ae2   : > { %2978 = vrot.lane.b32.xlu1 %v2970_v38, %s4739_s5  ;;  %v3029_v38 = vmul.f32 %v6172_v20, %v3028_v62 }
0x1ae3   : > { %2999 = vrot.lane.b32.xlu0 %v2994_v60, %s4740_s22 }
0x1ae6   : > { %3001 = vrot.lane.b32.xlu1 %v2998_v41, %s4740_s22 }
0x1b50   : > { %v6184_v24 = vpop.permute.xlu1 %2974 }
0x1b51   : > { %7479 = vst [vmem:[#allocation177_spill] sm:$0xff] %v6184_v24  ;;  %v6186_v15 = vpop.permute.xlu0 %2976  ;;  %v3034_v24 = vrot.slane %v3029_v38, %v4971_v9 }
0x1b52   : > { %7480 = vst [vmem:[#allocation178_spill] sm:$0xff] %v6186_v15 }
0x1b54   : > { %v6188_v32 = vpop.permute.xlu1 %2978 }
0x1b55   : > { %7481 = vst [vmem:[#allocation179_spill] sm:$0xff] %v6188_v32  ;;  %v3000_v12 = vpop.permute.xlu0 %2999  ;;  %v3038_v32 = vrot.slane %v3029_v38, %v4973_v10 }
0x1b56   : > { %v3008_v29 = vmul.f32 %v3000_v12, %v5055_v53 }
0x1b58   : > { %v3002_v28 = vpop.permute.xlu1 %3001  ;;  %3014 = vrot.lane.b32.xlu0 %v3008_v29, %s4727_s9 }
0x1b59   : > { %v3004_v36 = vsel %vm3003_vm4, %v3000_v12, %v3002_v28  ;;  %v3010_v41 = vmul.f32 %v3002_v28, %v5136_v54  ;;  %v3069_v28 = vstv %s4337_s21  ;;  %s4343_s21 = sld [smem:[#allocation6 + $0x27]] }
0x1b5a   : > { %v3009_v60 = vmul.f32 %v3004_v36, %v5171_v11 }
0x1b5c   : > { %3018 = vrot.lane.b32.xlu0 %v3010_v41, %s4727_s9  ;;  %3016 = vrot.lane.b32.xlu1 %v3009_v60, %s4727_s9  ;;  %v3070_v41 = vmul.f32 %v5968_v21, %v3069_v28 }
0x1b60   : > { %3041 = vrot.lane.b32.xlu0 %v3038_v32, %s4740_s22  ;;  %3039 = vrot.lane.b32.xlu1 %v3034_v24, %s4740_s22  ;;  %v3075_v24 = vrot.slane %v3070_v41, %v4971_v9  ;;  %s4340_s22 = sld [smem:[#allocation6 + $0x56]] }
0x1bca   : > { %v6200_v29 = vpop.permute.xlu0 %3014 }
0x1bcb   : > { %7482 = vst [vmem:[#allocation180_spill] sm:$0xff] %v6200_v29 }
0x1bce   : > { %v6202_v62 = vpop.permute.xlu0 %3018  ;;  %v6204_v12 = vpop.permute.xlu1 %3016 }
0x1bcf   : > { %7483 = vst [vmem:[#allocation181_spill] sm:$0xff] %v6202_v62  ;;  %7484 = vst [vmem:[#allocation182_spill] sm:$0xff] %v6204_v12  ;;  %v3079_v62 = vrot.slane %v3070_v41, %v4973_v10 }
0x1bd2   : > { %v3042_v15 = vpop.permute.xlu0 %3041  ;;  %v3040_v36 = vpop.permute.xlu1 %3039 }
0x1bd3   : > { %v3043_v60 = vsel %vm3003_vm4, %v3040_v36, %v3042_v15  ;;  %v3047_v1 = vmul.f32 %v3040_v36, %v5051_v51  ;;  %v3049_v32 = vmul.f32 %v3042_v15, %v5124_v40  ;;  %vm1363_vm4 = vcmask 785408  }
0x1bd4   : > { %v3048_v38 = vmul.f32 %v3043_v60, %v5067_v59 }
0x1bd5   : > { %3053 = vrot.lane.b32.xlu1 %v3047_v1, %s4727_s9 }
0x1bd6   : > { %3055 = vrot.lane.b32.xlu0 %v3048_v38, %s4727_s9  ;;  %v3109_v38 = vstv %s4338_s11  ;;  %s4345_s11 = sld [smem:[#allocation6 + $0x28]] }
0x1bd7   : > { %v3110_v41 = vmul.f32 %v5968_v21, %v3109_v38 }
0x1bd9   : > { %3057 = vrot.lane.b32.xlu1 %v3049_v32, %s4727_s9  ;;  %s4339_s9 = sld [smem:[#allocation6 + $0x25]] }
0x1bda   : > { %3080 = vrot.lane.b32.xlu0 %v3075_v24, %s4741_s23 }
0x1bdc   : > { %v3393_v42 = vstv %s4345_s11  ;;  %s4350_s11 = sld [smem:[#allocation6 + $0x5b]] }
0x1bdd   : > { %3082 = vrot.lane.b32.xlu1 %v3079_v62, %s4741_s23 }
0x1c47   : > { %v6216_v28 = vpop.permute.xlu1 %3053 }
0x1c48   : > { %7485 = vst [vmem:[#allocation183_spill] sm:$0xff] %v6216_v28  ;;  %v6218_v36 = vpop.permute.xlu0 %3055  ;;  %v3115_v28 = vrot.slane %v3110_v41, %v4971_v9 }
0x1c49   : > { %7486 = vst [vmem:[#allocation184_spill] sm:$0xff] %v6218_v36 }
0x1c4b   : > { %v6220_v60 = vpop.permute.xlu1 %3057 }
0x1c4c   : > { %7487 = vst [vmem:[#allocation185_spill] sm:$0xff] %v6220_v60  ;;  %v3081_v1 = vpop.permute.xlu0 %3080  ;;  %v3119_v60 = vrot.slane %v3110_v41, %v4973_v10 }
0x1c4d   : > { %v3089_v29 = vmul.f32 %v3081_v1, %v5055_v53 }
0x1c4f   : > { %v3083_v15 = vpop.permute.xlu1 %3082  ;;  %3095 = vrot.lane.b32.xlu0 %v3089_v29, %s4729_s4 }
0x1c50   : > { %v3085_v24 = vsel %vm3084_vm5, %v3081_v1, %v3083_v15  ;;  %v3091_v62 = vmul.f32 %v3083_v15, %v5136_v54  ;;  %v3150_v15 = vstv %s4339_s9  ;;  %s4743_s9 = smov 83  }
0x1c51   : > { %v3090_v32 = vmul.f32 %v3085_v24, %v5171_v11 }
0x1c53   : > { %3099 = vrot.lane.b32.xlu0 %v3091_v62, %s4729_s4  ;;  %3097 = vrot.lane.b32.xlu1 %v3090_v32, %s4729_s4  ;;  %v3151_v62 = vmul.f32 %v6002_v43, %v3150_v15 }
0x1c57   : > { %3122 = vrot.lane.b32.xlu0 %v3119_v60, %s4741_s23  ;;  %3120 = vrot.lane.b32.xlu1 %v3115_v28, %s4741_s23  ;;  %v3156_v28 = vrot.slane %v3151_v62, %v4971_v9  ;;  %s4344_s23 = sld [smem:[#allocation6 + $0x58]] }
0x1cc1   : > { %v6232_v29 = vpop.permute.xlu0 %3095 }
0x1cc2   : > { %7488 = vst [vmem:[#allocation186_spill] sm:$0xff] %v6232_v29 }
0x1cc5   : > { %v6234_v38 = vpop.permute.xlu0 %3099  ;;  %v6236_v1 = vpop.permute.xlu1 %3097 }
0x1cc6   : > { %7489 = vst [vmem:[#allocation187_spill] sm:$0xff] %v6234_v38  ;;  %7490 = vst [vmem:[#allocation188_spill] sm:$0xff] %v6236_v1  ;;  %v3160_v38 = vrot.slane %v3151_v62, %v4973_v10  ;;  %v3312_v1 = vstv %s4343_s21  ;;  %s4746_s21 = smov 86  }
0x1cc9   : > { %v3123_v36 = vpop.permute.xlu0 %3122  ;;  %v3121_v24 = vpop.permute.xlu1 %3120 }
0x1cca   : > { %v3124_v32 = vsel %vm3084_vm5, %v3121_v24, %v3123_v36  ;;  %v3128_v12 = vmul.f32 %v3121_v24, %v5051_v51  ;;  %v3130_v60 = vmul.f32 %v3123_v36, %v5124_v40  ;;  %vm1441_vm5 = vcmask 777216  }
0x1ccb   : > { %v3129_v41 = vmul.f32 %v3124_v32, %v5067_v59 }
0x1ccc   : > { %3134 = vrot.lane.b32.xlu1 %v3128_v12, %s4729_s4 }
0x1ccd   : > { %3136 = vrot.lane.b32.xlu0 %v3129_v41, %s4729_s4  ;;  %v3190_v41 = vstv %s4340_s22  ;;  %s4744_s22 = smov 84  }
0x1cce   : > { %v3191_v62 = vmul.f32 %v6002_v43, %v3190_v41 }
0x1cd0   : > { %3138 = vrot.lane.b32.xlu1 %v3130_v60, %s4729_s4  ;;  %s4341_s4 = sld [smem:[#allocation6 + $0x26]] }
0x1cd1   : > { %3161 = vrot.lane.b32.xlu0 %v3156_v28, %s4742_s6 }
0x1cd4   : > { %3163 = vrot.lane.b32.xlu1 %v3160_v38, %s4742_s6 }
0x1d3e   : > { %v6248_v15 = vpop.permute.xlu1 %3134 }
0x1d3f   : > { %7491 = vst [vmem:[#allocation189_spill] sm:$0xff] %v6248_v15  ;;  %v6250_v24 = vpop.permute.xlu0 %3136  ;;  %v3196_v15 = vrot.slane %v3191_v62, %v4971_v9 }
0x1d40   : > { %7492 = vst [vmem:[#allocation190_spill] sm:$0xff] %v6250_v24 }
0x1d42   : > { %v6252_v32 = vpop.permute.xlu1 %3138 }
0x1d43   : > { %7493 = vst [vmem:[#allocation191_spill] sm:$0xff] %v6252_v32  ;;  %v3162_v12 = vpop.permute.xlu0 %3161  ;;  %v3200_v32 = vrot.slane %v3191_v62, %v4973_v10 }
0x1d44   : > { %v3170_v29 = vmul.f32 %v3162_v12, %v5055_v53 }
0x1d46   : > { %v3164_v36 = vpop.permute.xlu1 %3163  ;;  %3176 = vrot.lane.b32.xlu0 %v3170_v29, %s4731_s10 }
0x1d47   : > { %v3166_v28 = vsel %vm3165_vm6, %v3162_v12, %v3164_v36  ;;  %v3172_v38 = vmul.f32 %v3164_v36, %v5136_v54  ;;  %v3231_v36 = vstv %s4341_s4  ;;  %s4348_s4 = sld [smem:[#allocation6 + $0x5a]] }
0x1d48   : > { %v3171_v60 = vmul.f32 %v3166_v28, %v5171_v11 }
0x1d4a   : > { %3180 = vrot.lane.b32.xlu0 %v3172_v38, %s4731_s10  ;;  %3178 = vrot.lane.b32.xlu1 %v3171_v60, %s4731_s10  ;;  %v3232_v60 = vmul.f32 %v6036_v31, %v3231_v36 }
0x1d4c   : > { %v3241_v36 = vrot.slane %v3232_v60, %v4973_v10 }
0x1d4e   : > { %3203 = vrot.lane.b32.xlu0 %v3200_v32, %s4742_s6  ;;  %3201 = vrot.lane.b32.xlu1 %v3196_v15, %s4742_s6  ;;  %v3271_v32 = vstv %s4342_s18  ;;  %s4346_s6 = sld [smem:[#allocation6 + $0x59]]  ;;  %s4745_s18 = smov 85  }
0x1db8   : > { %v6264_v29 = vpop.permute.xlu0 %3176 }
0x1db9   : > { %7494 = vst [vmem:[#allocation192_spill] sm:$0xff] %v6264_v29  ;;  %v3272_v29 = vmul.f32 %v6036_v31, %v3271_v32 }
0x1dbc   : > { %v6266_v41 = vpop.permute.xlu0 %3180  ;;  %v6268_v12 = vpop.permute.xlu1 %3178 }
0x1dbd   : > { %7495 = vst [vmem:[#allocation193_spill] sm:$0xff] %v6266_v41  ;;  %7496 = vst [vmem:[#allocation194_spill] sm:$0xff] %v6268_v12  ;;  %v3237_v41 = vrot.slane %v3232_v60, %v4971_v9  ;;  %v3433_v60 = vstv %s4346_s6  ;;  %s4353_s6 = sld [smem:[#allocation6 + $0x2c]] }
0x1dc0   : > { %v3204_v28 = vpop.permute.xlu0 %3203  ;;  %v3202_v38 = vpop.permute.xlu1 %3201 }
0x1dc1   : > { %v3205_v24 = vsel %vm3165_vm6, %v3202_v38, %v3204_v28  ;;  %v3209_v62 = vmul.f32 %v3202_v38, %v5051_v51  ;;  %v3211_v12 = vmul.f32 %v3204_v28, %v5124_v40  ;;  %v3313_v38 = vmul.f32 %v6070_v33, %v3312_v1 }
0x1dc2   : > { %v3210_v15 = vmul.f32 %v3205_v24, %v5067_v59  ;;  %v3277_v24 = vrot.slane %v3272_v29, %v4971_v9  ;;  %v3394_v1 = vmul.f32 %v6104_v30, %v3393_v42  ;;  %vm7300_vm6 = vcmask 769024  }
0x1dc3   : > { %3215 = vrot.lane.b32.xlu1 %v3209_v62, %s4731_s10  ;;  %v3352_v62 = vstv %s4344_s23  ;;  %v3318_v28 = vrot.slane %v3313_v38, %v4971_v9  ;;  %s4349_s23 = sld [smem:[#allocation6 + $0x2a]] }
0x1dc4   : > { %3217 = vrot.lane.b32.xlu0 %v3210_v15, %s4731_s10  ;;  %v3281_v15 = vrot.slane %v3272_v29, %v4973_v10  ;;  %v3353_v32 = vmul.f32 %v6070_v33, %v3352_v62 }
0x1dc6   : > { %v3362_v29 = vrot.slane %v3353_v32, %v4973_v10 }
0x1dc7   : > { %3219 = vrot.lane.b32.xlu1 %v3211_v12, %s4731_s10  ;;  %s4347_s10 = sld [smem:[#allocation6 + $0x29]]  ;;  %v3322_v12 = vrot.slane %v3313_v38, %v4973_v10  ;;  %v3403_v38 = vrot.slane %v3394_v1, %v4973_v10 }
0x1dc8   : > { %3242 = vrot.lane.b32.xlu0 %v3237_v41, %s4743_s9  ;;  %v3358_v41 = vrot.slane %v3353_v32, %v4971_v9 }
0x1dcb   : > { %3244 = vrot.lane.b32.xlu1 %v3241_v36, %s4743_s9  ;;  %v3399_v36 = vrot.slane %v3394_v1, %v4971_v9 }
0x1dcc   : > { %3282 = vrot.lane.b32.xlu0 %v3277_v24, %s4743_s9  ;;  %v3434_v24 = vmul.f32 %v6104_v30, %v3433_v60 }
0x1dcd   : > { %v3474_v62 = vstv %s4347_s10  ;;  %s4354_s10 = sld [smem:[#allocation6 + $0x5d]] }
0x1dce   : > { %v3475_v42 = vmul.f32 %v6138_v14, %v3474_v62 }
0x1dcf   : > { %3284 = vrot.lane.b32.xlu1 %v3281_v15, %s4743_s9  ;;  %v3439_v15 = vrot.slane %v3434_v24, %v4971_v9  ;;  %s4351_s9 = sld [smem:[#allocation6 + $0x2b]] }
0x1dd0   : > { %3323 = vrot.lane.b32.xlu0 %v3318_v28, %s4744_s22  ;;  %v3514_v28 = vstv %s4348_s4  ;;  %v3480_v32 = vrot.slane %v3475_v42, %v4971_v9  ;;  %v3484_v60 = vrot.slane %v3475_v42, %v4973_v10  ;;  %s4747_s4 = smov 97  }
0x1dd3   : > { %3325 = vrot.lane.b32.xlu1 %v3322_v12, %s4744_s22  ;;  %v3443_v12 = vrot.slane %v3434_v24, %v4973_v10 }
0x1dd4   : > { %3363 = vrot.lane.b32.xlu0 %v3358_v41, %s4744_s22  ;;  %v3515_v41 = vmul.f32 %v6138_v14, %v3514_v28 }
0x1dd6   : > { %v3520_v1 = vrot.slane %v3515_v41, %v4971_v9 }
0x1dd7   : > { %3365 = vrot.lane.b32.xlu1 %v3362_v29, %s4744_s22  ;;  %v3524_v29 = vrot.slane %v3515_v41, %v4973_v10  ;;  %s4355_s22 = sld [smem:[#allocation6 + $0x2d]] }
0x1dd8   : > { %3404 = vrot.lane.b32.xlu0 %v3399_v36, %s4745_s18 }
0x1ddb   : > { %3406 = vrot.lane.b32.xlu1 %v3403_v38, %s4745_s18 }
0x1ddc   : > { %3444 = vrot.lane.b32.xlu0 %v3439_v15, %s4745_s18 }
0x1ddf   : > { %3446 = vrot.lane.b32.xlu1 %v3443_v12, %s4745_s18  ;;  %s4356_s18 = sld [smem:[#allocation6 + $0x5e]] }
0x1de0   : > { %3485 = vrot.lane.b32.xlu0 %v3480_v32, %s4746_s21 }
0x1de3   : > { %3487 = vrot.lane.b32.xlu1 %v3484_v60, %s4746_s21 }
0x1de4   : > { %3525 = vrot.lane.b32.xlu0 %v3520_v1, %s4746_s21 }
0x1de7   : > { %3527 = vrot.lane.b32.xlu1 %v3524_v29, %s4746_s21  ;;  %s4748_s21 = smov 98  }
0x1e35   : > { %v6301_v36 = vpop.permute.xlu1 %3215 }
0x1e36   : > { %7497 = vst [vmem:[#allocation195_spill] sm:$0xff] %v6301_v36  ;;  %v6303_v24 = vpop.permute.xlu0 %3217 }
0x1e37   : > { %7498 = vst [vmem:[#allocation196_spill] sm:$0xff] %v6303_v24  ;;  %v3631_v24 = vstv %s4351_s9  ;;  %s4749_s9 = smov 99  }
0x1e39   : > { %v6305_v62 = vpop.permute.xlu1 %3219 }
0x1e3a   : > { %7499 = vst [vmem:[#allocation197_spill] sm:$0xff] %v6305_v62  ;;  %v3243_v38 = vpop.permute.xlu0 %3242 }
0x1e3b   : > { %v3251_v15 = vmul.f32 %v3243_v38, %v5055_v53 }
0x1e3d   : > { %v3245_v42 = vpop.permute.xlu1 %3244  ;;  %3257 = vrot.lane.b32.xlu0 %v3251_v15, %s4733_s28 }
0x1e3e   : > { %v3247_v28 = vsel %vm3246_vm7, %v3243_v38, %v3245_v42  ;;  %v3253_v12 = vmul.f32 %v3245_v42, %v5136_v54  ;;  %v3283_v32 = vpop.permute.xlu0 %3282 }
0x1e3f   : > { %v3252_v41 = vmul.f32 %v3247_v28, %v5171_v11  ;;  %v3290_v29 = vmul.f32 %v3283_v32, %v5051_v51 }
0x1e41   : > { %v3285_v60 = vpop.permute.xlu1 %3284  ;;  %3261 = vrot.lane.b32.xlu0 %v3253_v12, %s4733_s28  ;;  %3259 = vrot.lane.b32.xlu1 %v3252_v41, %s4733_s28 }
0x1e42   : > { %v3286_v1 = vsel %vm3246_vm7, %v3283_v32, %v3285_v60  ;;  %v3324_v36 = vpop.permute.xlu0 %3323  ;;  %v3292_v38 = vmul.f32 %v3285_v60, %v5124_v40  ;;  %v3555_v32 = vstv %s4349_s23  ;;  %s4358_s23 = sld [smem:[#allocation6 + $0x5f]]  ;;  %vm1597_vm7 = vcmask 760832  }
0x1e43   : > { %v3291_v62 = vmul.f32 %v3286_v1, %v5067_v59  ;;  %v3332_v42 = vmul.f32 %v3324_v36, %v5055_v53 }
0x1e45   : > { %v3326_v15 = vpop.permute.xlu1 %3325  ;;  %3296 = vrot.lane.b32.xlu1 %v3290_v29, %s4733_s28  ;;  %3298 = vrot.lane.b32.xlu0 %v3291_v62, %s4733_s28  ;;  %v3592_v29 = vstv %s4350_s11  ;;  %s4359_s11 = sld [smem:[#allocation6 + $0x2f]] }
0x1e46   : > { %v3328_v28 = vsel %vm3327_vm8, %v3324_v36, %v3326_v15  ;;  %v3334_v1 = vmul.f32 %v3326_v15, %v5136_v54  ;;  %v3364_v62 = vpop.permute.xlu0 %3363  ;;  %v3556_v36 = vmul.f32 %v6172_v20, %v3555_v32 }
0x1e47   : > { %v3333_v41 = vmul.f32 %v3328_v28, %v5171_v11 }
0x1e48   : > { %v3561_v15 = vrot.slane %v3556_v36, %v4971_v9  ;;  %v3565_v28 = vrot.slane %v3556_v36, %v4973_v10 }
0x1e49   : > { %v6320_v12 = vpop.permute.xlu1 %3365  ;;  %3300 = vrot.lane.b32.xlu1 %v3292_v38, %s4733_s28  ;;  %3338 = vrot.lane.b32.xlu0 %v3332_v42, %s4735_s30  ;;  %s4352_s28 = sld [smem:[#allocation6 + $0x5c]]  ;;  %v3371_v38 = vmul.f32 %v3364_v62, %v5051_v51 }
0x1e4a   : > { %v3367_v60 = vsel %vm3327_vm8, %v3364_v62, %v6320_v12  ;;  %v3632_v62 = vmul.f32 %v5968_v21, %v3631_v24  ;;  %vm7296_vm8 = vcmask 752640  }
0x1e4b   : > { %v3372_v42 = vmul.f32 %v3367_v60, %v5067_v59 }
0x1e4c   : > { %v3641_v36 = vrot.slane %v3632_v62, %v4973_v10 }
0x1e4d   : > { %3342 = vrot.lane.b32.xlu0 %v3334_v1, %s4735_s30  ;;  %3340 = vrot.lane.b32.xlu1 %v3333_v41, %s4735_s30  ;;  %v3593_v1 = vmul.f32 %v6172_v20, %v3592_v29  ;;  %v3637_v20 = vrot.slane %v3632_v62, %v4971_v9 }
0x1e4f   : > { %v3598_v32 = vrot.slane %v3593_v1, %v4971_v9  ;;  %v3602_v41 = vrot.slane %v3593_v1, %v4973_v10  ;;  %v3670_v60 = vstv %s4352_s28  ;;  %s4360_s28 = sld [smem:[#allocation6 + $0x60]] }
0x1e50   : > { %v3671_v29 = vmul.f32 %v5968_v21, %v3670_v60 }
0x1e51   : > { %3377 = vrot.lane.b32.xlu1 %v3371_v38, %s4735_s30  ;;  %3379 = vrot.lane.b32.xlu0 %v3372_v42, %s4735_s30  ;;  %v3709_v38 = vstv %s4353_s6  ;;  %s4750_s6 = smov 100  }
0x1e52   : > { %v3676_v42 = vrot.slane %v3671_v29, %v4971_v9  ;;  %v3680_v24 = vrot.slane %v3671_v29, %v4973_v10 }
0x1e55   : > { %3566 = vrot.lane.b32.xlu1 %v3561_v15, %s4708_s20  ;;  %3568 = vrot.lane.b32.xlu0 %v3565_v28, %s4708_s20  ;;  %v3710_v15 = vmul.f32 %v6002_v43, %v3709_v38  ;;  %v3748_v28 = vstv %s4354_s10  ;;  %s4751_s10 = smov 101  }
0x1e56   : > { %v3749_v21 = vmul.f32 %v6002_v43, %v3748_v28 }
0x1e57   : > { %v3715_v1 = vrot.slane %v3710_v15, %v4971_v9 }
0x1e58   : > { %v3754_v62 = vrot.slane %v3749_v21, %v4971_v9  ;;  %v3758_v60 = vrot.slane %v3749_v21, %v4973_v10 }
0x1e59   : > { %3603 = vrot.lane.b32.xlu1 %v3598_v32, %s4708_s20  ;;  %3605 = vrot.lane.b32.xlu0 %v3602_v41, %s4708_s20  ;;  %v3719_v32 = vrot.slane %v3710_v15, %v4973_v10  ;;  %v3787_v41 = vstv %s4355_s22  ;;  %s4357_s20 = sld [smem:[#allocation6 + $0x2e]]  ;;  %s4361_s22 = sld [smem:[#allocation6 + $0x30]] }
0x1e5d   : > { %3642 = vrot.lane.b32.xlu1 %v3637_v20, %s4747_s4  ;;  %3644 = vrot.lane.b32.xlu0 %v3641_v36, %s4747_s4  ;;  %v3788_v20 = vmul.f32 %v6036_v31, %v3787_v41  ;;  %v3826_v36 = vstv %s4356_s18  ;;  %v3943_v41 = vstv %s4359_s11  ;;  %s4756_s18 = smov 28   ;;  %s4266_s11 = sld [smem:[#allocation6 + $0x31]] }
0x1e5e   : > { %v3827_v43 = vmul.f32 %v6036_v31, %v3826_v36  ;;  %v3982_v36 = vstv %s4360_s28  ;;  %s4371_s28 = sshll.u32 %s4802_s16, 7  ;;  %s4760_s16 = smov [#allocation9]  }
0x1e5f   : > { %v3793_v29 = vrot.slane %v3788_v20, %v4971_v9  ;;  %v3797_v38 = vrot.slane %v3788_v20, %v4973_v10  ;;  %v3944_v20 = vmul.f32 %v6104_v30, %v3943_v41 }
0x1e60   : > { %v3836_v15 = vrot.slane %v3827_v43, %v4973_v10 }
0x1e61   : > { %3681 = vrot.lane.b32.xlu1 %v3676_v42, %s4747_s4  ;;  %3683 = vrot.lane.b32.xlu0 %v3680_v24, %s4747_s4  ;;  %v3865_v42 = vstv %s4357_s20  ;;  %v3832_v24 = vrot.slane %v3827_v43, %v4971_v9  ;;  %v3953_v43 = vrot.slane %v3944_v20, %v4973_v10  ;;  %s4362_s4 = sld [smem:[#allocation6 + $0x61]]  ;;  %s4757_s20 = smov 27  }
0x1e62   : > { %v3866_v28 = vmul.f32 %v6070_v33, %v3865_v42 }
0x1e64   : > { %v3875_v21 = vrot.slane %v3866_v28, %v4973_v10 }
0x1e65   : > { %3720 = vrot.lane.b32.xlu1 %v3715_v1, %s4748_s21  ;;  %3722 = vrot.lane.b32.xlu0 %v3719_v32, %s4748_s21  ;;  %v3904_v1 = vstv %s4358_s23  ;;  %v3871_v32 = vrot.slane %v3866_v28, %v4971_v9  ;;  %s4759_s23 = smov 112  }
0x1e66   : > { %v3905_v31 = vmul.f32 %v6070_v33, %v3904_v1  ;;  %v3373_v33 = vmul.f32 %v6320_v12, %v5124_v40 }
0x1e69   : > { %3759 = vrot.lane.b32.xlu1 %v3754_v62, %s4748_s21  ;;  %3761 = vrot.lane.b32.xlu0 %v3758_v60, %s4748_s21  ;;  %v3910_v62 = vrot.slane %v3905_v31, %v4971_v9  ;;  %v3914_v60 = vrot.slane %v3905_v31, %v4973_v10  ;;  %s4758_s21 = smov 26  }
0x1e6d   : > { %3798 = vrot.lane.b32.xlu1 %v3793_v29, %s4749_s9  ;;  %3800 = vrot.lane.b32.xlu0 %v3797_v38, %s4749_s9  ;;  %v3949_v29 = vrot.slane %v3944_v20, %v4971_v9  ;;  %v3983_v38 = vmul.f32 %v6104_v30, %v3982_v36  ;;  %v4060_v20 = vstv %s4362_s4 }
0x1e6f   : > { %v3988_v42 = vrot.slane %v3983_v38, %v4971_v9  ;;  %v3992_v28 = vrot.slane %v3983_v38, %v4973_v10 }
0x1e71   : > { %3837 = vrot.lane.b32.xlu1 %v3832_v24, %s4749_s9  ;;  %3839 = vrot.lane.b32.xlu0 %v3836_v15, %s4749_s9  ;;  %v3407_v24 = vpop.permute.xlu1 %3406  ;;  %v3405_v15 = vpop.permute.xlu0 %3404  ;;  %s286_s9 = sld [smem:[#allocation6]] }
0x1e72   : > { %v3413_v30 = vmul.f32 %v3405_v15, %v5055_v53  ;;  %v3409_v12 = vsel %vm3408_vm1, %v3405_v15, %v3407_v24  ;;  %v3415_v31 = vmul.f32 %v3407_v24, %v5136_v54 }
0x1e75   : > { %3876 = vrot.lane.b32.xlu1 %v3871_v32, %s4750_s6  ;;  %3878 = vrot.lane.b32.xlu0 %v3875_v21, %s4750_s6  ;;  %v3447_v1 = vpop.permute.xlu1 %3446  ;;  %v4021_v32 = vstv %s4361_s22  ;;  %v3414_v21 = vmul.f32 %v3409_v12, %v5171_v11  ;;  %v3445_v41 = vpop.permute.xlu0 %3444 }
0x1e76   : > { %v3452_v36 = vmul.f32 %v3445_v41, %v5051_v51 }
0x1e79   : > { %3915 = vrot.lane.b32.xlu1 %v3910_v62, %s4750_s6  ;;  %3917 = vrot.lane.b32.xlu0 %v3914_v60, %s4750_s6  ;;  %v3448_v62 = vsel %vm3408_vm1, %v3445_v41, %v3447_v1  ;;  %v4022_v60 = vmul.f32 %v6138_v14, %v4021_v32  ;;  %v3488_v15 = vpop.permute.xlu1 %3487  ;;  %v877_v41 = vsel %vm356_vm12, %v5292_v47, %v5300_v4  ;;  %vm7297_vm1 = vcmask 744448   ;;  %s211_s6 = scalar_lea.vmem [#allocation9], %s4262_s26  ;;  %s4612_s26 = sshll.u32 %s4760_s16, 4  ;;  %s4613_s26 = int_to_ptr.vmem [resolvable:$false] %s4612_s26 }
0x1e7a   : > { %v916_v47 = vsel %vm356_vm12, %v5312_v6, %v5314_v16  ;;  %v997_v6 = vsel %vm434_vm13, %v5344_v26, %v5346_v23  ;;  %v1078_v26 = vsel %vm512_vm15, %v5376_v58, %v5378_v46  ;;  %v1159_v58 = vsel %vm590_vm0, %v5408_v27, %v5410_v55 }
0x1e7b   : > { %v4027_v38 = vrot.slane %v4022_v60, %v4971_v9  ;;  %v1240_v27 = vsel %vm668_vm2, %v5440_v49, %v5442_v13 }
0x1e7d   : > { %3381 = vrot.lane.b32.xlu1 %v3373_v33, %s4735_s30  ;;  %3954 = vrot.lane.b32.xlu0 %v3949_v29, %s4751_s10  ;;  %v3453_v29 = vmul.f32 %v3448_v62, %v5067_v59  ;;  %v4061_v33 = vmul.f32 %v6138_v14, %v4060_v20  ;;  %s4752_s30 = smov 102   ;;  %v3528_v32 = vpop.permute.xlu1 %3527  ;;  %v878_v62 = vsel %vm356_vm12, %v5300_v4, %v5298_v3 }
0x1e7e   : > { %v3496_v20 = vmul.f32 %v3488_v15, %v5136_v54  ;;  %v958_v4 = vsel %vm434_vm13, %v5328_v50, %v5332_v25  ;;  %v1039_v50 = vsel %vm512_vm15, %v5360_v48, %v5364_v44  ;;  %v1120_v48 = vsel %vm590_vm0, %v5392_v39, %v5396_v56 }
0x1e7f   : > { %v4066_v24 = vrot.slane %v4061_v33, %v4971_v9  ;;  %v1201_v39 = vsel %vm668_vm2, %v5424_v17, %v5428_v45  ;;  %v1282_v17 = vsel %vm746_vm3, %v5456_v37, %v5460_v5  ;;  %v1909_v37 = vsel %vm1363_vm4, %v5730_v0, %v5734_v22 }
0x1e81   : > { %3956 = vrot.lane.b32.xlu1 %v3953_v43, %s4751_s10  ;;  %3993 = vrot.lane.b32.xlu0 %v3988_v42, %s4751_s10  ;;  %v3454_v43 = vmul.f32 %v3447_v1, %v5124_v40  ;;  %v4031_v42 = vrot.slane %v4022_v60, %v4973_v10  ;;  %v808_v1 = vsel %vm807_vm10, %v5154_v63, %v5161_v2 }
0x1e85   : > { %3995 = vrot.lane.b32.xlu1 %v3992_v28, %s4751_s10  ;;  %3419 = vrot.lane.b32.xlu0 %v3413_v30, %s4737_s27  ;;  %v3486_v28 = vpop.permute.xlu0 %3485  ;;  %v4070_v30 = vrot.slane %v4061_v33, %v4973_v10  ;;  %v959_v33 = vsel %vm434_vm13, %v5332_v25, %v5330_v19  ;;  %v1040_v25 = vsel %vm512_vm15, %v5364_v44, %v5362_v52  ;;  %s4161_s10 = sshll.u32 %s211_s6, 4  ;;  %s7161_s10 = int_to_ptr.vmem [resolvable:$true] %s4161_s10 }
0x1e86   : > { %v3494_v14 = vmul.f32 %v3486_v28, %v5055_v53  ;;  %v3490_v12 = vsel %vm3489_vm9, %v3486_v28, %v3488_v15  ;;  %p4615_p12 = scmp.lt.s32.totalorder %s7161_s10, %s4613_s26 }
0x1e87   : > { %v3495_v60 = vmul.f32 %v3490_v12, %v5171_v11 }
0x1e89   : > { %3423 = vrot.lane.b32.xlu0 %v3415_v31, %s4737_s27  ;;  %3421 = vrot.lane.b32.xlu1 %v3414_v21, %s4737_s27  ;;  %v814_v21 = vmul.f32 %v5161_v2, %v5136_v54  ;;  %v812_v31 = vmul.f32 %v5154_v63, %v5055_v53  ;;  %v813_v2 = vmul.f32 %v808_v1, %v5171_v11 }
0x1e8a   : > { %v837_v63 = vmul.f32 %v5166_v8, %v5051_v51 }
0x1e8c   : > { %v921_v28 = vadd.f32 %v916_v47, %v837_v63  ;;  %v7501_v47 = vld [vmem:[#allocation99_spill] sm:$0xff] }
0x1e8d   : > { %3458 = vrot.lane.b32.xlu1 %v3452_v36, %s4737_s27  ;;  %3460 = vrot.lane.b32.xlu0 %v3453_v29, %s4737_s27  ;;  %v3526_v36 = vpop.permute.xlu0 %3525  ;;  %v884_v29 = vadd.f32 %v5298_v3, %v814_v21  ;;  %v882_v3 = vadd.f32 %v877_v41, %v812_v31  ;;  %v1121_v21 = vsel %vm590_vm0, %v5396_v56, %v5394_v61 }
0x1e8e   : > { %v1002_v44 = vadd.f32 %v997_v6, %v921_v28  ;;  %v3535_v31 = vmul.f32 %v3528_v32, %v5124_v40  ;;  %v7507_v28 = vld [vmem:[#allocation110_spill] sm:$0xff] }
0x1e90   : > { %v1083_v41 = vadd.f32 %v1078_v26, %v1002_v44 }
0x1e91   : > { %3462 = vrot.lane.b32.xlu1 %v3454_v43, %s4737_s27  ;;  %4032 = vrot.lane.b32.xlu0 %v4027_v38, %s4752_s30  ;;  %v3529_v38 = vsel %vm3489_vm9, %v3526_v36, %v3528_v32  ;;  %v883_v43 = vadd.f32 %v878_v62, %v813_v2  ;;  %vm1831_vm9 = vcmask 736256   ;;  %s4753_s27 = smov 31  }
0x1e92   : > { %v3534_v15 = vmul.f32 %v3529_v38, %v5067_v59  ;;  %v1164_v32 = vadd.f32 %v1159_v58, %v1083_v41 }
0x1e94   : > { %v1245_v49 = vadd.f32 %v1240_v27, %v1164_v32  ;;  %v7516_v32 = vld [vmem:[#allocation117_spill] sm:$0xff] }
0x1e95   : > { %4034 = vrot.lane.b32.xlu1 %v4031_v42, %s4752_s30  ;;  %4071 = vrot.lane.b32.xlu0 %v4066_v24, %s4752_s30  ;;  %v965_v42 = vadd.f32 %v5330_v19, %v884_v29  ;;  %v3533_v24 = vmul.f32 %v3526_v36, %v5051_v51  ;;  %v964_v19 = vadd.f32 %v959_v33, %v883_v43  ;;  %v7502_v33 = vld [vmem:[#allocation104_spill] sm:$0xff] }
0x1e96   : > { %v1283_v36 = vsel %vm746_vm3, %v5460_v5, %v5458_v18  ;;  %v1910_v29 = vsel %vm1363_vm4, %v5734_v22, %v5732_v34 }
0x1e97   : > { %v1045_v1 = vadd.f32 %v1040_v25, %v964_v19  ;;  %v7505_v25 = vld [vmem:[#allocation106_spill] sm:$0xff] }
0x1e99   : > { %4073 = vrot.lane.b32.xlu1 %v4070_v30, %s4752_s30  ;;  %3500 = vrot.lane.b32.xlu0 %v3494_v14, %s4739_s5  ;;  %v963_v30 = vadd.f32 %v958_v4, %v882_v3  ;;  %v1046_v14 = vadd.f32 %v5362_v52, %v965_v42  ;;  %v1126_v56 = vadd.f32 %v1121_v21, %v1045_v1  ;;  %v7503_v3 = vld [vmem:[#allocation102_spill] sm:$0xff]  ;;  %v7504_v42 = vld [vmem:[#allocation103_spill] sm:$0xff]  ;;  %v7510_v1 = vld [vmem:[#allocation112_spill] sm:$0xff]  ;;  %s7159_s30 = scalar_lea.hbm %s7206_s3, %s4371_s28 }
0x1e9a   : > { %v1990_v43 = vsel %vm1441_vm5, %v7503_v3, %v7502_v33  ;;  %v1991_v0 = vsel %vm1441_vm5, %v7502_v33, %v7504_v42  ;;  %v7511_v21 = vld [vmem:[#allocation111_spill] sm:$0xff]  ;;  %v7522_v3 = vld [vmem:[#allocation128_spill] sm:$0xff] }
0x1e9b   : > { %v1044_v12 = vadd.f32 %v1039_v50, %v963_v30  ;;  %v1127_v52 = vadd.f32 %v5394_v61, %v1046_v14  ;;  %v7508_v30 = vld [vmem:[#allocation108_spill] sm:$0xff]  ;;  %v7509_v14 = vld [vmem:[#allocation109_spill] sm:$0xff] }
0x1e9c   : > { %v2071_v19 = vsel %vm7300_vm6, %v7508_v30, %v7507_v28  ;;  %v2072_v26 = vsel %vm7300_vm6, %v7507_v28, %v7509_v14  ;;  %v7525_v28 = vld [vmem:[#allocation134_spill] sm:$0xff]  ;;  %v7526_v30 = vld [vmem:[#allocation132_spill] sm:$0xff] }
0x1e9d   : > { %3504 = vrot.lane.b32.xlu0 %v3496_v20, %s4739_s5  ;;  %3502 = vrot.lane.b32.xlu1 %v3495_v60, %s4739_s5  ;;  %v1125_v62 = vadd.f32 %v1120_v48, %v1044_v12  ;;  %v1202_v60 = vsel %vm668_vm2, %v5428_v45, %v5426_v7  ;;  %v1208_v61 = vadd.f32 %v5426_v7, %v1127_v52 }
0x1e9e   : > { %v1207_v45 = vadd.f32 %v1202_v60, %v1126_v56  ;;  %v1321_v7 = vsel %vm746_vm3, %v5474_v57, %v5476_v35  ;;  %v2110_v52 = vsel %vm7300_vm6, %v7511_v21, %v7510_v1 }
0x1e9f   : > { %v1206_v20 = vadd.f32 %v1201_v39, %v1125_v62  ;;  %v1289_v2 = vadd.f32 %v5458_v18, %v1208_v61  ;;  %v7500_v18 = vld [vmem:[#allocation100_spill] sm:$0xff]  ;;  %v1326_v57 = vadd.f32 %v1321_v7, %v1245_v49  ;;  %v7514_v62 = vld [vmem:[#allocation115_spill] sm:$0xff] }
0x1ea0   : > { %v1288_v38 = vadd.f32 %v1283_v36, %v1207_v45  ;;  %v1948_v4 = vsel %vm1363_vm4, %v7501_v47, %v7500_v18  ;;  %v7512_v39 = vld [vmem:[#allocation116_spill] sm:$0xff] }
0x1ea1   : > { %3539 = vrot.lane.b32.xlu1 %v3533_v24, %s4739_s5  ;;  %3541 = vrot.lane.b32.xlu0 %v3534_v15, %s4739_s5  ;;  %v1287_v63 = vadd.f32 %v1282_v17, %v1206_v20  ;;  %v1916_v5 = vadd.f32 %v5732_v34, %v1289_v2  ;;  %v7506_v34 = vld [vmem:[#allocation105_spill] sm:$0xff]  ;;  %v1953_v15 = vadd.f32 %v1948_v4, %v1326_v57  ;;  %v7515_v17 = vld [vmem:[#allocation118_spill] sm:$0xff]  ;;  %v7518_v7 = vld [vmem:[#allocation120_spill] sm:$0xff] }
0x1ea2   : > { %v1915_v22 = vadd.f32 %v1910_v29, %v1288_v38  ;;  %v2029_v24 = vsel %vm1441_vm5, %v7506_v34, %v7505_v25  ;;  %v2152_v60 = vsel %vm1597_vm7, %v7512_v39, %v7514_v62  ;;  %v2190_v20 = vsel %vm1597_vm7, %v7516_v32, %v7515_v17  ;;  %v7517_v2 = vld [vmem:[#allocation122_spill] sm:$0xff]  ;;  %v7520_v4 = vld [vmem:[#allocation124_spill] sm:$0xff]  ;;  %v7521_v57 = vld [vmem:[#allocation123_spill] sm:$0xff] }
0x1ea3   : > { %v1914_v6 = vadd.f32 %v1909_v37, %v1287_v63  ;;  %v1997_v50 = vadd.f32 %v7504_v42, %v1916_v5  ;;  %v2034_v58 = vadd.f32 %v2029_v24, %v1953_v15  ;;  %v2232_v49 = vsel %vm7296_vm8, %v7518_v7, %v7517_v2  ;;  %v7519_v63 = vld [vmem:[#allocation121_spill] sm:$0xff] }
0x1ea4   : > { %v1996_v44 = vadd.f32 %v1991_v0, %v1915_v22  ;;  %v2233_v37 = vsel %vm7296_vm8, %v7517_v2, %v7519_v63  ;;  %v2271_v33 = vsel %vm7296_vm8, %v7521_v57, %v7520_v4  ;;  %v7524_v0 = vld [vmem:[#allocation127_spill] sm:$0xff]  ;;  %vm2552_vm8 = vcmask 515072  }
0x1ea5   : > { %3543 = vrot.lane.b32.xlu1 %v3535_v31, %s4739_s5  ;;  %v1995_v48 = vadd.f32 %v1990_v43, %v1914_v6  ;;  %v2078_v12 = vadd.f32 %v7509_v14, %v1997_v50  ;;  %v7513_v31 = vld [vmem:[#allocation114_spill] sm:$0xff]  ;;  %v2115_v45 = vadd.f32 %v2110_v52, %v2034_v58  ;;  %v2314_v6 = vsel %vm7297_vm1, %v7522_v3, %v7524_v0  ;;  %v7527_v14 = vld [vmem:[#allocation133_spill] sm:$0xff]  ;;  %s4755_s5 = smov 29  }
0x1ea6   : > { %v2151_v41 = vsel %vm1597_vm7, %v7513_v31, %v7512_v39  ;;  %v2077_v61 = vadd.f32 %v2072_v26, %v1996_v44  ;;  %v7523_v43 = vld [vmem:[#allocation126_spill] sm:$0xff]  ;;  %v2395_v26 = vsel %vm1831_vm9, %v7525_v28, %v7527_v14  ;;  %v7529_v39 = vld [vmem:[#allocation129_spill] sm:$0xff] }
0x1ea7   : > { %v2076_v56 = vadd.f32 %v2071_v19, %v1995_v48  ;;  %v2158_v27 = vadd.f32 %v7514_v62, %v2078_v12  ;;  %v2195_v47 = vadd.f32 %v2190_v20, %v2115_v45  ;;  %v2313_v42 = vsel %vm7297_vm1, %v7523_v43, %v7522_v3  ;;  %v7528_v58 = vld [vmem:[#allocation130_spill] sm:$0xff]  ;;  %v7534_v45 = vld [vmem:[#allocation135_spill] sm:$0xff] }
0x1ea8   : > { %v2157_v38 = vadd.f32 %v2152_v60, %v2077_v61  ;;  %v2394_v19 = vsel %vm1831_vm9, %v7526_v30, %v7525_v28  ;;  %v2352_v31 = vsel %vm7297_vm1, %v7529_v39, %v7528_v58  ;;  %v7530_v62 = vld [vmem:[#allocation182_spill] sm:$0xff]  ;;  %v7531_v60 = vld [vmem:[#allocation180_spill] sm:$0xff]  ;;  %v7532_v61 = vld [vmem:[#allocation181_spill] sm:$0xff]  ;;  %vm2630_vm1 = vcmask 506880  }
0x1ea9   : > { %v2156_v29 = vadd.f32 %v2151_v41, %v2076_v56  ;;  %v2239_v5 = vadd.f32 %v7519_v63, %v2158_v27  ;;  %v2276_v12 = vadd.f32 %v2271_v33, %v2195_v47  ;;  %v3020_v56 = vsel %vm7298_vm11, %v7531_v60, %v7530_v62  ;;  %v7542_v28 = vld [vmem:[#allocation193_spill] sm:$0xff] }
0x1eaa   : > { %v2238_v50 = vadd.f32 %v2233_v37, %v2157_v38  ;;  %v3021_v27 = vsel %vm7298_vm11, %v7530_v62, %v7532_v61  ;;  %v7535_v37 = vld [vmem:[#allocation188_spill] sm:$0xff]  ;;  %v7544_v39 = vld [vmem:[#allocation189_spill] sm:$0xff] }
0x1eab   : > { %v2237_v22 = vadd.f32 %v2232_v49, %v2156_v29  ;;  %v2320_v34 = vadd.f32 %v7524_v0, %v2239_v5  ;;  %v7536_v29 = vld [vmem:[#allocation186_spill] sm:$0xff]  ;;  %v7537_v5 = vld [vmem:[#allocation187_spill] sm:$0xff]  ;;  %v2357_v33 = vadd.f32 %v2352_v31, %v2276_v12 }
0x1eac   : > { %v2319_v52 = vadd.f32 %v2314_v6, %v2238_v50  ;;  %v3101_v38 = vsel %vm2552_vm8, %v7536_v29, %v7535_v37  ;;  %v3102_v47 = vsel %vm2552_vm8, %v7535_v37, %v7537_v5  ;;  %v7539_v0 = vld [vmem:[#allocation183_spill] sm:$0xff]  ;;  %v7540_v50 = vld [vmem:[#allocation194_spill] sm:$0xff] }
0x1ead   : > { %v2318_v21 = vadd.f32 %v2313_v42, %v2237_v22  ;;  %v2401_v41 = vadd.f32 %v7527_v14, %v2320_v34  ;;  %v7538_v42 = vld [vmem:[#allocation184_spill] sm:$0xff]  ;;  %v3183_v30 = vsel %vm2630_vm1, %v7540_v50, %v7542_v28 }
0x1eae   : > { %v2400_v20 = vadd.f32 %v2395_v26, %v2319_v52  ;;  %v3059_v6 = vsel %vm7298_vm11, %v7539_v0, %v7538_v42  ;;  %v7541_v34 = vld [vmem:[#allocation192_spill] sm:$0xff]  ;;  %v7543_v52 = vld [vmem:[#allocation190_spill] sm:$0xff]  ;;  %vm2786_vm11 = vcmask 490496  }
0x1eaf   : > { %v3258_v36 = vpop.permute.xlu0 %3257  ;;  %v2399_v32 = vadd.f32 %v2394_v19, %v2318_v21  ;;  %v3027_v63 = vadd.f32 %v7532_v61, %v2401_v41  ;;  %v3140_v31 = vsel %vm2552_vm8, %v7544_v39, %v7543_v52 }
0x1eb0   : > { %v3026_v43 = vadd.f32 %v3021_v27, %v2400_v20  ;;  %v7545_v27 = vld [vmem:[#allocation196_spill] sm:$0xff] }
0x1eb1   : > { %v3025_v3 = vadd.f32 %v3020_v56, %v2399_v32  ;;  %v3108_v22 = vadd.f32 %v7537_v5, %v3027_v63  ;;  %v7546_v32 = vld [vmem:[#allocation195_spill] sm:$0xff] }
0x1eb2   : > { %v3107_v26 = vadd.f32 %v3102_v47, %v3026_v43  ;;  %v3221_v20 = vsel %vm2630_vm1, %v7546_v32, %v7545_v27  ;;  %v7550_v32 = vld [vmem:[#allocation53_spill] sm:$0xff] }
0x1eb3   : > { %v3260_v24 = vpop.permute.xlu1 %3259  ;;  %v3262_v15 = vpop.permute.xlu0 %3261  ;;  %v3106_v14 = vadd.f32 %v3101_v38, %v3025_v3  ;;  %v3189_v41 = vadd.f32 %v7542_v28, %v3108_v22  ;;  %v7547_v28 = vld [vmem:[#allocation14_spill] sm:$0xff] }
0x1eb4   : > { %v3263_v48 = vsel %vm7299_vm14, %v3258_v36, %v3260_v24  ;;  %v3264_v44 = vsel %vm7299_vm14, %v3260_v24, %v3262_v15  ;;  %v7533_v36 = vld [vmem:[#allocation136_spill] sm:$0xff]  ;;  %v3182_v24 = vsel %vm2630_vm1, %v7541_v34, %v7540_v50  ;;  %v3188_v61 = vadd.f32 %v3183_v30, %v3107_v26 }
0x1eb5   : > { %v2433_v2 = vsel %vm1831_vm9, %v7534_v45, %v7533_v36  ;;  %v3187_v56 = vadd.f32 %v3182_v24, %v3106_v14  ;;  %v3270_v45 = vadd.f32 %v3262_v15, %v3189_v41  ;;  %v7548_v14 = vld [vmem:[#allocation51_spill] sm:$0xff] }
0x1eb6   : > { %v2438_v19 = vadd.f32 %v2433_v2, %v2357_v33  ;;  %v3269_v63 = vadd.f32 %v3264_v44, %v3188_v61  ;;  %v917_v26 = vsel %vm356_vm12, %v5314_v16, %v7548_v14 }
0x1eb7   : > { %v3297_v7 = vpop.permute.xlu1 %3296  ;;  %v3299_v49 = vpop.permute.xlu0 %3298 }
0x1eb8   : > { %v3302_v57 = vsel %vm7299_vm14, %v3297_v7, %v3299_v49  ;;  %v3064_v60 = vadd.f32 %v3059_v6, %v2438_v19  ;;  %v3268_v7 = vadd.f32 %v3263_v48, %v3187_v56 }
0x1eba   : > { %v3145_v2 = vadd.f32 %v3140_v31, %v3064_v60  ;;  %v7549_v60 = vld [vmem:[#allocation52_spill] sm:$0xff] }
0x1ebb   : > { %v6575_v12 = vpop.permute.xlu1 %3300  ;;  %v3339_v21 = vpop.permute.xlu0 %3338 }
0x1ebc   : > { %v6583_v62 = vsel %vm7299_vm14, %v3299_v49, %v6575_v12  ;;  %v3226_v47 = vadd.f32 %v3221_v20, %v3145_v2  ;;  %v1079_v20 = vsel %vm512_vm15, %v5378_v46, %v7550_v32  ;;  %vm3724_vm14 = vcmask 801792  }
0x1ebe   : > { %v3307_v43 = vadd.f32 %v3302_v57, %v3226_v47  ;;  %v833_v57 = vsel %vm807_vm10, %v5166_v8, %v7547_v28  ;;  %v998_v8 = vsel %vm434_vm13, %v5346_v23, %v7549_v60  ;;  %vm3646_vm10 = vcmask 793600   ;;  %v7552_v47 = vld [vmem:[#allocation55_spill] sm:$0xff] }
0x1ebf   : > { %v3341_v37 = vpop.permute.xlu1 %3340  ;;  %v3343_v29 = vpop.permute.xlu0 %3342  ;;  %v838_v31 = vmul.f32 %v833_v57, %v5067_v59  ;;  %v1241_v46 = vsel %vm668_vm2, %v5442_v13, %v7552_v47 }
0x1ec0   : > { %v3344_v38 = vsel %vm2786_vm11, %v3339_v21, %v3341_v37  ;;  %v3345_v5 = vsel %vm2786_vm11, %v3341_v37, %v3343_v29  ;;  %v6590_v49 = vadd.f32 %v3343_v29, %v3270_v45 }
0x1ec1   : > { %v6592_v33 = vadd.f32 %v3344_v38, %v3268_v7  ;;  %v6594_v3 = vadd.f32 %v3345_v5, %v3269_v63  ;;  %v922_v56 = vadd.f32 %v917_v26, %v838_v31  ;;  %v7551_v63 = vld [vmem:[#allocation54_spill] sm:$0xff] }
0x1ec2   : > { %v1160_v23 = vsel %vm590_vm0, %v5410_v55, %v7551_v63 }
0x1ec3   : > { %v3378_v0 = vpop.permute.xlu1 %3377  ;;  %v6596_v15 = vpop.permute.xlu0 %3379  ;;  %v1003_v2 = vadd.f32 %v998_v8, %v922_v56  ;;  %v7556_v8 = vld [vmem:[#allocation113_spill] sm:$0xff] }
0x1ec4   : > { %v3383_v48 = vsel %vm2786_vm11, %v3378_v0, %v6596_v15 }
0x1ec5   : > { %v6600_v44 = vadd.f32 %v3383_v48, %v3307_v43  ;;  %v1084_v29 = vadd.f32 %v1079_v20, %v1003_v2  ;;  %v7557_v20 = vld [vmem:[#allocation119_spill] sm:$0xff] }
0x1ec7   : > { %v3567_v6 = vpop.permute.xlu1 %3566  ;;  %v3569_v22 = vpop.permute.xlu0 %3568  ;;  %v1165_v0 = vadd.f32 %v1160_v23, %v1084_v29 }
0x1ec8   : > { %v3574_v50 = vmul.f32 %v3567_v6, %v5055_v53  ;;  %v3570_v34 = vsel %vm1363_vm4, %v3567_v6, %v3569_v22  ;;  %v3576_v21 = vmul.f32 %v3569_v22, %v5136_v54  ;;  %v7553_v6 = vld [vmem:[#allocation56_spill] sm:$0xff] }
0x1ec9   : > { %v3575_v24 = vmul.f32 %v3570_v34, %v5171_v11  ;;  %v1322_v55 = vsel %vm746_vm3, %v5476_v35, %v7553_v6  ;;  %v1246_v22 = vadd.f32 %v1241_v46, %v1165_v0  ;;  %v7560_v46 = vld [vmem:[#allocation131_spill] sm:$0xff] }
0x1eca   : > { %3580 = vrot.lane.b32.xlu0 %v3574_v50, %s4707_s25 }
0x1ecb   : > { %v3604_v30 = vpop.permute.xlu1 %3603  ;;  %3582 = vrot.lane.b32.xlu1 %v3575_v24, %s4707_s25  ;;  %v3606_v19 = vpop.permute.xlu0 %3605  ;;  %v7554_v24 = vld [vmem:[#allocation101_spill] sm:$0xff] }
0x1ecc   : > { %v3611_v39 = vmul.f32 %v3604_v30, %v5051_v51  ;;  %v3607_v41 = vsel %vm1363_vm4, %v3604_v30, %v3606_v19  ;;  %v3613_v7 = vmul.f32 %v3606_v19, %v5124_v40  ;;  %v1949_v57 = vsel %vm1363_vm4, %v7500_v18, %v7554_v24 }
0x1ecd   : > { %v3612_v45 = vmul.f32 %v3607_v41, %v5067_v59  ;;  %v1327_v30 = vadd.f32 %v1322_v55, %v1246_v22  ;;  %v2111_v18 = vsel %vm7300_vm6, %v7510_v1, %v7556_v8  ;;  %vm7561_vm6 = vcmask 744448   ;;  %v7562_v55 = vld [vmem:[#allocation137_spill] sm:$0xff] }
0x1ece   : > { %3584 = vrot.lane.b32.xlu0 %v3576_v21, %s4707_s25  ;;  %v7555_v21 = vld [vmem:[#allocation107_spill] sm:$0xff]  ;;  %v2434_v22 = vsel %vm1831_vm9, %v7533_v36, %v7562_v55 }
0x1ecf   : > { %v3643_v61 = vpop.permute.xlu1 %3642  ;;  %3617 = vrot.lane.b32.xlu1 %v3611_v39, %s4707_s25  ;;  %v3645_v16 = vpop.permute.xlu0 %3644  ;;  %v2030_v35 = vsel %vm1441_vm5, %v7505_v25, %v7555_v21  ;;  %v1954_v39 = vadd.f32 %v1949_v57, %v1327_v30  ;;  %v7563_v30 = vld [vmem:[#allocation185_spill] sm:$0xff] }
0x1ed0   : > { %v3647_v37 = vsel %vm3646_vm10, %v3643_v61, %v3645_v16  ;;  %v3651_v43 = vmul.f32 %v3643_v61, %v5055_v53  ;;  %v3653_v13 = vmul.f32 %v3645_v16, %v5136_v54 }
0x1ed1   : > { %v3652_v48 = vmul.f32 %v3647_v37, %v5171_v11  ;;  %v2035_v61 = vadd.f32 %v2030_v35, %v1954_v39  ;;  %v7558_v37 = vld [vmem:[#allocation125_spill] sm:$0xff]  ;;  %v7565_v39 = vld [vmem:[#allocation191_spill] sm:$0xff] }
0x1ed2   : > { %3619 = vrot.lane.b32.xlu0 %v3612_v45, %s4707_s25  ;;  %v2191_v45 = vsel %vm1597_vm7, %v7515_v17, %v7557_v20  ;;  %v2353_v17 = vsel %vm7561_vm6, %v7528_v58, %v7560_v46  ;;  %vm7564_vm6 = vcmask 523264   ;;  %v3141_v36 = vsel %vm2552_vm8, %v7543_v52, %v7565_v39 }
0x1ed3   : > { %v3682_v38 = vpop.permute.xlu1 %3681  ;;  %3621 = vrot.lane.b32.xlu1 %v3613_v7, %s4707_s25  ;;  %v3684_v5 = vpop.permute.xlu0 %3683  ;;  %v2116_v2 = vadd.f32 %v2111_v18, %v2035_v61  ;;  %s4754_s25 = smov 30   ;;  %v3060_v58 = vsel %vm7564_vm6, %v7538_v42, %v7563_v30  ;;  %vm3958_vm6 = vcmask 826368  }
0x1ed4   : > { %v3689_v19 = vmul.f32 %v3682_v38, %v5051_v51  ;;  %v3685_v26 = vsel %vm3646_vm10, %v3682_v38, %v3684_v5  ;;  %v3691_v16 = vmul.f32 %v3684_v5, %v5124_v40  ;;  %vm7559_vm10 = vcmask 752640  }
0x1ed5   : > { %v3690_v56 = vmul.f32 %v3685_v26, %v5067_v59  ;;  %v2272_v1 = vsel %vm7559_vm10, %v7520_v4, %v7558_v37  ;;  %v2196_v38 = vadd.f32 %v2191_v45, %v2116_v2  ;;  %vm3802_vm10 = vcmask 809984  }
0x1ed6   : > { %3657 = vrot.lane.b32.xlu0 %v3651_v43, %s4753_s27 }
0x1ed7   : > { %v3721_v50 = vpop.permute.xlu1 %3720  ;;  %3659 = vrot.lane.b32.xlu1 %v3652_v48, %s4753_s27  ;;  %v3723_v34 = vpop.permute.xlu0 %3722  ;;  %v2277_v43 = vadd.f32 %v2272_v1, %v2196_v38 }
0x1ed8   : > { %v3725_v25 = vsel %vm3724_vm14, %v3721_v50, %v3723_v34  ;;  %v3729_v29 = vmul.f32 %v3721_v50, %v5055_v53  ;;  %v3731_v4 = vmul.f32 %v3723_v34, %v5136_v54 }
0x1ed9   : > { %v3730_v5 = vmul.f32 %v3725_v25, %v5171_v11  ;;  %v2358_v50 = vadd.f32 %v2353_v17, %v2277_v43 }
0x1eda   : > { %3661 = vrot.lane.b32.xlu0 %v3653_v13, %s4753_s27 }
0x1edb   : > { %v3760_v31 = vpop.permute.xlu1 %3759  ;;  %3695 = vrot.lane.b32.xlu1 %v3689_v19, %s4753_s27  ;;  %v3762_v41 = vpop.permute.xlu0 %3761  ;;  %v2439_v19 = vadd.f32 %v2434_v22, %v2358_v50 }
0x1edc   : > { %v3767_v57 = vmul.f32 %v3760_v31, %v5051_v51  ;;  %v3763_v13 = vsel %vm3724_vm14, %v3760_v31, %v3762_v41  ;;  %v7566_v31 = vld [vmem:[#allocation197_spill] sm:$0xff]  ;;  %vm3880_vm14 = vcmask 818176  }
0x1edd   : > { %v3768_v34 = vmul.f32 %v3763_v13, %v5067_v59  ;;  %v3065_v18 = vadd.f32 %v3060_v58, %v2439_v19  ;;  %v3222_v61 = vsel %vm2630_vm1, %v7545_v27, %v7566_v31 }
0x1ede   : > { %3697 = vrot.lane.b32.xlu0 %v3690_v56, %s4753_s27  ;;  %v3769_v56 = vmul.f32 %v3762_v41, %v5124_v40  ;;  %v839_v41 = vmul.f32 %v7547_v28, %v5124_v40 }
0x1edf   : > { %v3799_v7 = vpop.permute.xlu1 %3798  ;;  %3699 = vrot.lane.b32.xlu1 %v3691_v16, %s4753_s27  ;;  %v3801_v23 = vpop.permute.xlu0 %3800  ;;  %v3146_v16 = vadd.f32 %v3141_v36, %v3065_v18  ;;  %s4147_s27 = scalar_lea.sflag [#allocation4], %s4948_s17 }
0x1ee0   : > { %v3803_v42 = vsel %vm3802_vm10, %v3799_v7, %v3801_v23  ;;  %v3807_v2 = vmul.f32 %v3799_v7, %v5055_v53  ;;  %v923_v17 = vadd.f32 %v7548_v14, %v839_v41 }
0x1ee1   : > { %v3227_v1 = vadd.f32 %v3222_v61, %v3146_v16  ;;  %v3808_v52 = vmul.f32 %v3803_v42, %v5171_v11 }
0x1ee2   : > { %3735 = vrot.lane.b32.xlu0 %v3729_v29, %s4754_s25 }
0x1ee3   : > { %v3838_v0 = vpop.permute.xlu1 %3837  ;;  %3737 = vrot.lane.b32.xlu1 %v3730_v5, %s4754_s25  ;;  %v3840_v48 = vpop.permute.xlu0 %3839  ;;  %v3308_v29 = vadd.f32 %v6583_v62, %v3227_v1  ;;  %v3809_v5 = vmul.f32 %v3801_v23, %v5136_v54  ;;  %v1004_v62 = vadd.f32 %v7549_v60, %v923_v17 }
0x1ee4   : > { %v3845_v43 = vmul.f32 %v3838_v0, %v5051_v51  ;;  %v3841_v22 = vsel %vm3802_vm10, %v3838_v0, %v3840_v48  ;;  %vm4036_vm10 = vcmask 834560  }
0x1ee5   : > { %v3846_v23 = vmul.f32 %v3841_v22, %v5067_v59 }
0x1ee6   : > { %3739 = vrot.lane.b32.xlu0 %v3731_v4, %s4754_s25 }
0x1ee7   : > { %v3877_v26 = vpop.permute.xlu1 %3876  ;;  %3773 = vrot.lane.b32.xlu1 %v3767_v57, %s4754_s25  ;;  %v3879_v35 = vpop.permute.xlu0 %3878  ;;  %v1085_v57 = vadd.f32 %v7550_v32, %v1004_v62 }
0x1ee8   : > { %v3881_v14 = vsel %vm3880_vm14, %v3877_v26, %v3879_v35  ;;  %v3885_v60 = vmul.f32 %v3877_v26, %v5055_v53 }
0x1ee9   : > { %v1166_v0 = vadd.f32 %v7551_v63, %v1085_v57  ;;  %v3886_v36 = vmul.f32 %v3881_v14, %v5171_v11  ;;  %v3887_v63 = vmul.f32 %v3879_v35, %v5136_v54 }
0x1eea   : > { %3775 = vrot.lane.b32.xlu0 %v3768_v34, %s4754_s25 }
0x1eeb   : > { %v3916_v45 = vpop.permute.xlu1 %3915  ;;  %3777 = vrot.lane.b32.xlu1 %v3769_v56, %s4754_s25  ;;  %v3918_v25 = vpop.permute.xlu0 %3917  ;;  %v1247_v19 = vadd.f32 %v7552_v47, %v1166_v0  ;;  %s4608_s25 = scalar_lea.vmem %s7161_s10, 128 }
0x1eec   : > { %v3923_v56 = vmul.f32 %v3916_v45, %v5051_v51  ;;  %v3919_v26 = vsel %vm3880_vm14, %v3916_v45, %v3918_v25  ;;  %vm7302_vm14 = vcmask 482304   ;;  %p4609_p2 = scmp.ne.s32.totalorder %s7161_s10, %s4608_s25 }
0x1eed   : > { %v1328_v32 = vadd.f32 %v7553_v6, %v1247_v19  ;;  %v3924_v42 = vmul.f32 %v3919_v26, %v5067_v59 }
0x1eee   : > { %3813 = vrot.lane.b32.xlu0 %v3807_v2, %s4755_s5  ;;  %v3925_v2 = vmul.f32 %v3918_v25, %v5124_v40  ;;  %p4610_p6 = pnand %p4609_p2, %p7719_p4 }
0x1eef   : > { %v6690_v27 = vpop.permute.xlu1 %3381  ;;  %3815 = vrot.lane.b32.xlu1 %v3808_v52, %s4755_s5  ;;  %v3955_v38 = vpop.permute.xlu0 %3954  ;;  %v1955_v18 = vadd.f32 %v7554_v24, %v1328_v32 }
0x1ef0   : > { %v3384_v7 = vsel %vm2786_vm11, %v6596_v15, %v6690_v27  ;;  %v3847_v15 = vmul.f32 %v3840_v48, %v5124_v40  ;;  %p4611_p9 = pneg %p4610_p6 }
0x1ef1   : > { %v6699_v4 = vadd.f32 %v3384_v7, %v3308_v29  ;;  %v2036_v47 = vadd.f32 %v7555_v21, %v1955_v18  ;;  %v3963_v21 = vmul.f32 %v3955_v38, %v5055_v53 }
0x1ef2   : > { %3817 = vrot.lane.b32.xlu0 %v3809_v5, %s4755_s5 }
0x1ef3   : > { %v3957_v28 = vpop.permute.xlu1 %3956  ;;  %3851 = vrot.lane.b32.xlu1 %v3845_v43, %s4755_s5  ;;  %v3994_v50 = vpop.permute.xlu0 %3993  ;;  %v2117_v16 = vadd.f32 %v7556_v8, %v2036_v47 }
0x1ef4   : > { %v3959_v35 = vsel %vm3958_vm6, %v3955_v38, %v3957_v28  ;;  %v3965_v5 = vmul.f32 %v3957_v28, %v5136_v54  ;;  %v4001_v7 = vmul.f32 %v3994_v50, %v5051_v51 }
0x1ef5   : > { %v2197_v24 = vadd.f32 %v7557_v20, %v2117_v16  ;;  %v3964_v41 = vmul.f32 %v3959_v35, %v5171_v11 }
0x1ef6   : > { %3853 = vrot.lane.b32.xlu0 %v3846_v23, %s4755_s5 }
0x1ef7   : > { %v3996_v13 = vpop.permute.xlu1 %3995  ;;  %3855 = vrot.lane.b32.xlu1 %v3847_v15, %s4755_s5  ;;  %v3420_v58 = vpop.permute.xlu0 %3419  ;;  %v2278_v52 = vadd.f32 %v7558_v37, %v2197_v24 }
0x1ef8   : > { %v3997_v17 = vsel %vm3958_vm6, %v3994_v50, %v3996_v13  ;;  %v4003_v62 = vmul.f32 %v3996_v13, %v5124_v40  ;;  %vm7301_vm6 = vcmask 474112  }
0x1ef9   : > { %v2359_v8 = vadd.f32 %v7560_v46, %v2278_v52  ;;  %v4002_v46 = vmul.f32 %v3997_v17, %v5067_v59  ;;  %v288_v17 = vstv %s286_s9 }
0x1efa   : > { %3891 = vrot.lane.b32.xlu0 %v3885_v60, %s4756_s18 }
0x1efb   : > { %v6711_v34 = vpop.permute.xlu1 %3421  ;;  %3893 = vrot.lane.b32.xlu1 %v3886_v36, %s4756_s18  ;;  %v6713_v48 = vpop.permute.xlu0 %3423  ;;  %v2440_v20 = vadd.f32 %v7562_v55, %v2359_v8 }
0x1efd   : > { %v3066_v37 = vadd.f32 %v7563_v30, %v2440_v20  ;;  %v3425_v30 = vsel %vm7302_vm14, %v3420_v58, %v6711_v34 }
0x1efe   : > { %3895 = vrot.lane.b32.xlu0 %v3887_v63, %s4756_s18  ;;  %v3430_v13 = vadd.f32 %v3425_v30, %v6592_v33 }
0x1eff   : > { %v3459_v61 = vpop.permute.xlu1 %3458  ;;  %3929 = vrot.lane.b32.xlu1 %v3923_v56, %s4756_s18  ;;  %v3461_v6 = vpop.permute.xlu0 %3460  ;;  %v3147_v22 = vadd.f32 %v7565_v39, %v3066_v37  ;;  %v3432_v56 = vadd.f32 %v6713_v48, %v6590_v49 }
0x1f00   : > { %v3464_v57 = vsel %vm7302_vm14, %v3459_v61, %v3461_v6 }
0x1f01   : > { %v3228_v55 = vadd.f32 %v7566_v31, %v3147_v22  ;;  %v3469_v58 = vadd.f32 %v3464_v57, %v6600_v44 }
0x1f02   : > { %3931 = vrot.lane.b32.xlu0 %v3924_v42, %s4756_s18 }
0x1f03   : > { %v3463_v1 = vpop.permute.xlu1 %3462  ;;  %3933 = vrot.lane.b32.xlu1 %v3925_v2, %s4756_s18  ;;  %v4033_v45 = vpop.permute.xlu0 %4032  ;;  %v3309_v39 = vadd.f32 %v6575_v12, %v3228_v55  ;;  %v3426_v12 = vsel %vm7302_vm14, %v6711_v34, %v6713_v48 }
0x1f04   : > { %v4041_v15 = vmul.f32 %v4033_v45, %v5055_v53  ;;  %v3465_v36 = vsel %vm7302_vm14, %v3461_v6, %v3463_v1  ;;  %v3431_v34 = vadd.f32 %v3426_v12, %v6594_v3  ;;  %v7575_v12 = vld [vmem:[#allocation35_spill] sm:$0xff] }
0x1f05   : > { %v3390_v31 = vadd.f32 %v6690_v27, %v3309_v39  ;;  %v7570_v39 = vld [vmem:[#allocation16_spill] sm:$0xff] }
0x1f06   : > { %3969 = vrot.lane.b32.xlu0 %v3963_v21, %s4757_s20 }
0x1f07   : > { %v4035_v29 = vpop.permute.xlu1 %4034  ;;  %3971 = vrot.lane.b32.xlu1 %v3964_v41, %s4757_s20  ;;  %v4072_v25 = vpop.permute.xlu0 %4071  ;;  %v3471_v26 = vadd.f32 %v3463_v1, %v3390_v31  ;;  %v7572_v31 = vld [vmem:[#allocation32_spill] sm:$0xff] }
0x1f08   : > { %v4037_v28 = vsel %vm4036_vm10, %v4033_v45, %v4035_v29  ;;  %v4043_v32 = vmul.f32 %v4035_v29, %v5136_v54  ;;  %v4079_v27 = vmul.f32 %v4072_v25, %v5051_v51  ;;  %v3470_v54 = vadd.f32 %v3465_v36, %v6699_v4 }
0x1f09   : > { %v4042_v14 = vmul.f32 %v4037_v28, %v5171_v11 }
0x1f0a   : > { %3973 = vrot.lane.b32.xlu0 %v3965_v5, %s4757_s20 }
0x1f0b   : > { %v4074_v38 = vpop.permute.xlu1 %4073  ;;  %4007 = vrot.lane.b32.xlu1 %v4001_v7, %s4757_s20  ;;  %v3501_v43 = vpop.permute.xlu0 %3500  ;;  %v305_v7 = vstv %s4266_s11 }
0x1f0c   : > { %v4075_v33 = vsel %vm4036_vm10, %v4072_v25, %v4074_v38  ;;  %v4081_v49 = vmul.f32 %v4074_v38, %v5124_v40  ;;  %vm7567_vm10 = vcmask 261120  }
0x1f0d   : > { %v4080_v42 = vmul.f32 %v4075_v33, %v5067_v59  ;;  %v7576_v33 = vld [vmem:[#allocation18_spill] sm:$0xff] }
0x1f0e   : > { %4009 = vrot.lane.b32.xlu0 %v4002_v46, %s4757_s20 }
0x1f0f   : > { %v3503_v50 = vpop.permute.xlu1 %3502  ;;  %4011 = vrot.lane.b32.xlu1 %v4003_v62, %s4757_s20  ;;  %v3505_v23 = vpop.permute.xlu0 %3504 }
0x1f10   : > { %v3506_v0 = vsel %vm7301_vm6, %v3501_v43, %v3503_v50  ;;  %v3507_v47 = vsel %vm7301_vm6, %v3503_v50, %v3505_v23  ;;  %v3513_v16 = vadd.f32 %v3505_v23, %v3432_v56  ;;  %v4535_v43 = vld [vmem:[#allocation7] ss:$8 sm:$0x3] }
0x1f11   : > { %v3511_v18 = vadd.f32 %v3506_v0, %v3430_v13  ;;  %v3512_v48 = vadd.f32 %v3507_v47, %v3431_v34  ;;  %v306_v46 = vmul.f32 %v4535_v43, %v305_v7  ;;  %v289_v22 = vmul.f32 %v4535_v43, %v288_v17  ;;  %v7578_v56 = vld [vmem:[#allocation34_spill] sm:$0xff]  ;;  %v7579_v47 = vld [vmem:[#allocation45_spill] sm:$0xff] }
0x1f12   : > { %4047 = vrot.lane.b32.xlu0 %v4041_v15, %s4758_s21  ;;  %v395_v13 = vsel %vm356_vm12, %v7570_v39, %v7572_v31  ;;  %v7580_v34 = vld [vmem:[#allocation17_spill] sm:$0xff] }
0x1f13   : > { %v3540_v60 = vpop.permute.xlu1 %3539  ;;  %4049 = vrot.lane.b32.xlu1 %v4042_v14, %s4758_s21  ;;  %v3542_v19 = vpop.permute.xlu0 %3541  ;;  %v311_v55 = vrot.slane %v306_v46, %v4971_v9  ;;  %v315_v50 = vrot.slane %v306_v46, %v4973_v10  ;;  %v294_v23 = vrot.slane %v289_v22, %v4971_v9  ;;  %v298_v30 = vrot.slane %v289_v22, %v4973_v10  ;;  %v7571_v14 = vld [vmem:[#allocation20_spill] sm:$0xff]  ;;  %v7588_v46 = vld [vmem:[#allocation25_spill] sm:$0xff]  ;;  %v7589_v22 = vld [vmem:[#allocation26_spill] sm:$0xff] }
0x1f14   : > { %v3545_v63 = vsel %vm7301_vm6, %v3540_v60, %v3542_v19  ;;  %v394_v0 = vsel %vm356_vm12, %v7571_v14, %v7570_v39  ;;  %v7574_v60 = vld [vmem:[#allocation15_spill] sm:$0xff] }
0x1f15   : > { %v3550_v44 = vadd.f32 %v3545_v63, %v3469_v58  ;;  %v7573_v58 = vld [vmem:[#allocation43_spill] sm:$0xff]  ;;  %v318_v36 = vmul.f32 %v311_v55, %v5051_v51  ;;  %v301_v63 = vmul.f32 %v294_v23, %v5055_v53  ;;  %v628_v55 = vsel %vm590_vm0, %v7589_v22, %v7588_v46  ;;  %v7608_v22 = vld [vmem:[#allocation58_spill] sm:$0xff] }
0x1f16   : > { %4051 = vrot.lane.b32.xlu0 %v4043_v32, %s4758_s21  ;;  %v358_v10 = vsel %vm356_vm12, %v7573_v58, %v7575_v12  ;;  %v319_v32 = vmul.f32 %v315_v50, %v5067_v59  ;;  %v7590_v50 = vld [vmem:[#allocation38_spill] sm:$0xff]  ;;  %v7592_v39 = vld [vmem:[#allocation23_spill] sm:$0xff] }
0x1f17   : > { %v4099_v61 = vadd.f32 %v3550_v44, %v3511_v18  ;;  %v3544_v6 = vpop.permute.xlu1 %3543  ;;  %4085 = vrot.lane.b32.xlu1 %v4079_v27, %s4758_s21  ;;  %v302_v27 = vmul.f32 %v298_v30, %v5171_v11  ;;  %v7577_v18 = vld [vmem:[#allocation22_spill] sm:$0xff]  ;;  %v398_v53 = vadd.f32 %v394_v0, %v318_v36  ;;  %v629_v23 = vsel %vm590_vm0, %v7588_v46, %v7590_v50  ;;  %v7591_v30 = vld [vmem:[#allocation48_spill] sm:$0xff]  ;;  %v7594_v36 = vld [vmem:[#allocation29_spill] sm:$0xff] }
0x1f18   : > { %v3546_v2 = vsel %vm7301_vm6, %v3542_v19, %v3544_v6  ;;  %v3552_v35 = vadd.f32 %v3544_v6, %v3471_v26  ;;  %vm7568_vm6 = vmmov %vm7567_vm10  ;;  %v357_v19 = vsel %vm356_vm12, %v7574_v60, %v7573_v58  ;;  %v472_v44 = vsel %vm434_vm13, %v7577_v18, %v7576_v33  ;;  %v7593_v0 = vld [vmem:[#allocation42_spill] sm:$0xff]  ;;  %v7597_v18 = vld [vmem:[#allocation49_spill] sm:$0xff] }
0x1f19   : > { %v3551_v24 = vadd.f32 %v3546_v2, %v3470_v54  ;;  %vm7569_vm14 = vmmov %vm7568_vm6  ;;  %v473_v26 = vsel %vm434_vm13, %v7576_v33, %v7578_v56  ;;  %v435_v54 = vsel %vm434_vm13, %v7580_v34, %v7579_v47  ;;  %v399_v11 = vadd.f32 %v395_v13, %v319_v32  ;;  %v7582_v2 = vld [vmem:[#allocation21_spill] sm:$0xff]  ;;  %v7595_v32 = vld [vmem:[#allocation28_spill] sm:$0xff] }
0x1f1a   : > { %v4101_v1 = vadd.f32 %v3552_v35, %v3513_v16  ;;  %4087 = vrot.lane.b32.xlu0 %v4080_v42, %s4758_s21  ;;  %v361_v6 = vadd.f32 %v357_v19, %v301_v63  ;;  %v362_v42 = vadd.f32 %v358_v10, %v302_v27  ;;  %v7583_v35 = vld [vmem:[#allocation24_spill] sm:$0xff]  ;;  %v591_v14 = vsel %vm590_vm0, %v7592_v39, %v7591_v30  ;;  %v7609_v50 = vld [vmem:[#allocation61_spill] sm:$0xff]  ;;  %v7611_v39 = vld [vmem:[#allocation62_spill] sm:$0xff] }
0x1f1b   : > { %v4100_v3 = vadd.f32 %v3551_v24, %v3512_v48  ;;  %4089 = vrot.lane.b32.xlu1 %v4081_v49, %s4758_s21  ;;  %v550_v49 = vsel %vm512_vm15, %v7583_v35, %v7582_v2  ;;  %v7584_v48 = vld [vmem:[#allocation36_spill] sm:$0xff]  ;;  %v477_v7 = vadd.f32 %v473_v26, %v399_v11  ;;  %v592_v31 = vsel %vm590_vm0, %v7591_v30, %v7593_v0  ;;  %v7601_v11 = vld [vmem:[#allocation30_spill] sm:$0xff] }
0x1f1c   : > { %v551_v24 = vsel %vm512_vm15, %v7582_v2, %v7584_v48  ;;  %v439_v17 = vadd.f32 %v435_v54, %v361_v6  ;;  %v706_v63 = vsel %vm668_vm2, %v7595_v32, %v7594_v36  ;;  %v7596_v27 = vld [vmem:[#allocation40_spill] sm:$0xff]  ;;  %v7603_v35 = vld [vmem:[#allocation50_spill] sm:$0xff]  ;;  %vm7620_vm12 = vcmask 769024  }
0x1f1d   : > { %v555_v60 = vadd.f32 %v551_v24, %v477_v7  ;;  %v707_v33 = vsel %vm668_vm2, %v7594_v36, %v7596_v27  ;;  %v7599_v26 = vld [vmem:[#allocation44_spill] sm:$0xff]  ;;  %v7605_v24 = vld [vmem:[#allocation47_spill] sm:$0xff]  ;;  %vm7627_vm0 = vmmov %vm7620_vm12 }
0x1f1e   : > { %4105 = vrot.lane.b32.xlu0 %v4099_v61, %s4759_s23  ;;  %v7581_v61 = vld [vmem:[#allocation37_spill] sm:$0xff]  ;;  %v7614_v32 = vld [vmem:[#allocation64_spill] sm:$0xff]  ;;  %v7615_v27 = vld [vmem:[#allocation67_spill] sm:$0xff] }
0x1f1f   : > { %4107 = vrot.lane.b32.xlu1 %v4100_v3, %s4759_s23  ;;  %v436_v51 = vsel %vm434_vm13, %v7579_v47, %v7581_v61  ;;  %v7586_v3 = vld [vmem:[#allocation19_spill] sm:$0xff]  ;;  %v670_v47 = vsel %vm668_vm2, %v7597_v18, %v7599_v26  ;;  %v633_v54 = vadd.f32 %v629_v23, %v555_v60  ;;  %v7610_v23 = vld [vmem:[#allocation60_spill] sm:$0xff]  ;;  %vm7622_vm13 = vmmov %vm7620_vm12 }
0x1f20   : > { %v440_v43 = vadd.f32 %v436_v51, %v362_v42  ;;  %v7602_v42 = vld [vmem:[#allocation41_spill] sm:$0xff]  ;;  %v1401_v30 = vsel %vm1363_vm4, %v7610_v23, %v7609_v50  ;;  %v7632_v23 = vld [vmem:[#allocation78_spill] sm:$0xff] }
0x1f22   : > { %4109 = vrot.lane.b32.xlu0 %v4101_v1, %s4759_s23  ;;  %v7585_v1 = vld [vmem:[#allocation46_spill] sm:$0xff] }
0x1f3c   : > { %v3581_v4 = vpop.permute.xlu0 %3580 }
0x1f3d   : > { %v3583_v45 = vpop.permute.xlu1 %3582 }
0x1f3e   : > { %v6772_v21 = vsel %vm7567_vm10, %v3581_v4, %v3583_v45  ;;  %v513_v4 = vsel %vm512_vm15, %v7586_v3, %v7585_v1 }
0x1f3f   : > { %v517_v19 = vadd.f32 %v513_v4, %v439_v17  ;;  %v7606_v17 = vld [vmem:[#allocation59_spill] sm:$0xff] }
0x1f40   : > { %v3585_v52 = vpop.permute.xlu0 %3584 }
0x1f41   : > { %v6775_v40 = vsel %vm7568_vm6, %v3583_v45, %v3585_v52  ;;  %v3618_v41 = vpop.permute.xlu1 %3617  ;;  %v7587_v45 = vld [vmem:[#allocation39_spill] sm:$0xff]  ;;  %v595_v61 = vadd.f32 %v591_v14, %v517_v19  ;;  %v1402_v14 = vsel %vm1363_vm4, %v7609_v50, %v7611_v39  ;;  %v7612_v19 = vld [vmem:[#allocation65_spill] sm:$0xff]  ;;  %v7633_v39 = vld [vmem:[#allocation80_spill] sm:$0xff] }
0x1f42   : > { %v514_v52 = vsel %vm512_vm15, %v7585_v1, %v7587_v45  ;;  %v748_v1 = vsel %vm746_vm3, %v7603_v35, %v7605_v24  ;;  %v711_v45 = vadd.f32 %v707_v33, %v633_v54  ;;  %v7616_v33 = vld [vmem:[#allocation66_spill] sm:$0xff]  ;;  %vm7625_vm15 = vmmov %vm7620_vm12  ;;  %v7631_v50 = vld [vmem:[#allocation79_spill] sm:$0xff] }
0x1f43   : > { %v518_v12 = vadd.f32 %v514_v52, %v440_v43  ;;  %v7607_v43 = vld [vmem:[#allocation57_spill] sm:$0xff]  ;;  %v7626_v24 = vld [vmem:[#allocation74_spill] sm:$0xff] }
0x1f44   : > { %v6777_v8 = vpop.permute.xlu0 %3619  ;;  %v1364_v46 = vsel %vm1363_vm4, %v7607_v43, %v7606_v17  ;;  %v7629_v43 = vld [vmem:[#allocation75_spill] sm:$0xff] }
0x1f45   : > { %v6781_v29 = vsel %vm7569_vm14, %v3618_v41, %v6777_v8  ;;  %v6783_v25 = vpop.permute.xlu1 %3621  ;;  %v476_v41 = vadd.f32 %v472_v44, %v398_v53  ;;  %v7598_v44 = vld [vmem:[#allocation27_spill] sm:$0xff]  ;;  %v596_v51 = vadd.f32 %v592_v31, %v518_v12  ;;  %v7600_v53 = vld [vmem:[#allocation33_spill] sm:$0xff] }
0x1f46   : > { %v669_v56 = vsel %vm668_vm2, %v7598_v44, %v7597_v18  ;;  %v784_v6 = vsel %vm746_vm3, %v7601_v11, %v7600_v53  ;;  %v785_v2 = vsel %vm746_vm3, %v7600_v53, %v7602_v42  ;;  %v7613_v12 = vld [vmem:[#allocation63_spill] sm:$0xff]  ;;  %v1479_v18 = vsel %vm1441_vm5, %v7616_v33, %v7615_v27  ;;  %v7617_v44 = vld [vmem:[#allocation68_spill] sm:$0xff]  ;;  %v7619_v11 = vld [vmem:[#allocation69_spill] sm:$0xff] }
0x1f47   : > { %v554_v58 = vadd.f32 %v550_v49, %v476_v41  ;;  %v7604_v49 = vld [vmem:[#allocation31_spill] sm:$0xff]  ;;  %v673_v52 = vadd.f32 %v669_v56, %v595_v61  ;;  %v674_v41 = vadd.f32 %v670_v47, %v596_v51  ;;  %v789_v31 = vadd.f32 %v785_v2, %v711_v45  ;;  %v7621_v42 = vld [vmem:[#allocation70_spill] sm:$0xff] }
0x1f48   : > { %v6785_v5 = vpop.permute.xlu0 %3657  ;;  %v747_v48 = vsel %vm746_vm3, %v7604_v49, %v7603_v35  ;;  %v1442_v36 = vsel %vm1441_vm5, %v7613_v12, %v7612_v19  ;;  %v1480_v56 = vsel %vm1441_vm5, %v7615_v27, %v7617_v44  ;;  %v7618_v53 = vld [vmem:[#allocation71_spill] sm:$0xff]  ;;  %v7623_v35 = vld [vmem:[#allocation73_spill] sm:$0xff]  ;;  %v7624_v49 = vld [vmem:[#allocation72_spill] sm:$0xff]  ;;  %vm7636_vm2 = vcmask 752640  }
0x1f49   : > { %v6787_v20 = vpop.permute.xlu1 %3659  ;;  %v632_v34 = vadd.f32 %v628_v55, %v554_v58  ;;  %v1365_v55 = vsel %vm1363_vm4, %v7606_v17, %v7608_v22  ;;  %v751_v58 = vadd.f32 %v747_v48, %v673_v52  ;;  %v752_v60 = vadd.f32 %v748_v1, %v674_v41  ;;  %v7628_v17 = vld [vmem:[#allocation77_spill] sm:$0xff]  ;;  %v7630_v22 = vld [vmem:[#allocation76_spill] sm:$0xff]  ;;  %v7637_v27 = vld [vmem:[#allocation82_spill] sm:$0xff] }
0x1f4a   : > { %v1406_v61 = vadd.f32 %v1402_v14, %v789_v31  ;;  %v1521_v2 = vsel %vm7622_vm13, %v7618_v53, %v7621_v42  ;;  %v1557_v48 = vsel %vm7625_vm15, %v7624_v49, %v7623_v35  ;;  %v1558_v1 = vsel %vm7627_vm0, %v7623_v35, %v7626_v24  ;;  %vm7638_vm3 = vmmov %vm7636_vm2  ;;  %v7640_v44 = vld [vmem:[#allocation84_spill] sm:$0xff]  ;;  %v7645_v42 = vld [vmem:[#allocation87_spill] sm:$0xff] }
0x1f4b   : > { %v710_v4 = vadd.f32 %v706_v63, %v632_v34  ;;  %v1443_v63 = vsel %vm1441_vm5, %v7612_v19, %v7614_v32  ;;  %v1368_v47 = vadd.f32 %v1364_v46, %v751_v58  ;;  %v1369_v34 = vadd.f32 %v1365_v55, %v752_v60  ;;  %v7635_v32 = vld [vmem:[#allocation81_spill] sm:$0xff]  ;;  %vm7641_vm4 = vmmov %vm7636_vm2  ;;  %v7647_v35 = vld [vmem:[#allocation88_spill] sm:$0xff] }
0x1f4c   : > { %v6789_v37 = vpop.permute.xlu0 %3661  ;;  %v1484_v41 = vadd.f32 %v1480_v56, %v1406_v61  ;;  %v1598_v46 = vsel %vm1597_vm7, %v7629_v43, %v7628_v17  ;;  %v1599_v55 = vsel %vm1597_vm7, %v7628_v17, %v7630_v22  ;;  %v1636_v14 = vsel %vm1597_vm7, %v7631_v50, %v7633_v39  ;;  %vm7643_vm5 = vmmov %vm7636_vm2  ;;  %v7650_v24 = vld [vmem:[#allocation90_spill] sm:$0xff] }
0x1f4d   : > { %v6791_v38 = vpop.permute.xlu1 %3695  ;;  %v788_v0 = vadd.f32 %v784_v6, %v710_v4  ;;  %v1520_v6 = vsel %vm7620_vm12, %v7619_v11, %v7618_v53  ;;  %v1446_v4 = vadd.f32 %v1442_v36, %v1368_v47  ;;  %v1447_v45 = vadd.f32 %v1443_v63, %v1369_v34  ;;  %v7634_v36 = vld [vmem:[#allocation83_spill] sm:$0xff]  ;;  %v7642_v47 = vld [vmem:[#allocation86_spill] sm:$0xff] }
0x1f4e   : > { %v1562_v19 = vadd.f32 %v1558_v1, %v1484_v41  ;;  %v1676_v63 = vsel %vm7636_vm2, %v7635_v32, %v7634_v36  ;;  %v1677_v33 = vsel %vm7638_vm3, %v7634_v36, %v7637_v27  ;;  %vm7662_vm12 = vcmask 523264  }
0x1f4f   : > { %v1405_v54 = vadd.f32 %v1401_v30, %v788_v0  ;;  %v1635_v30 = vsel %vm1597_vm7, %v7632_v23, %v7631_v50  ;;  %v1524_v31 = vadd.f32 %v1520_v6, %v1446_v4  ;;  %v1525_v58 = vadd.f32 %v1521_v2, %v1447_v45  ;;  %v7644_v6 = vld [vmem:[#allocation89_spill] sm:$0xff]  ;;  %v7652_v4 = vld [vmem:[#allocation92_spill] sm:$0xff]  ;;  %vm7664_vm13 = vmmov %vm7662_vm12 }
0x1f50   : > { %v6793_v62 = vpop.permute.xlu0 %3697  ;;  %v1640_v11 = vadd.f32 %v1636_v14, %v1562_v19  ;;  %vm7646_vm7 = vcmask 744448   ;;  %v7655_v50 = vld [vmem:[#allocation93_spill] sm:$0xff]  ;;  %vm7667_vm15 = vmmov %vm7662_vm12  ;;  %vm7700_vm3 = vcmask 482304  }
0x1f51   : > { %v6795_v28 = vpop.permute.xlu1 %3699  ;;  %v1483_v52 = vadd.f32 %v1479_v18, %v1405_v54  ;;  %v7639_v18 = vld [vmem:[#allocation85_spill] sm:$0xff]  ;;  %v1602_v54 = vadd.f32 %v1598_v46, %v1524_v31  ;;  %v1603_v61 = vadd.f32 %v1599_v55, %v1525_v58  ;;  %v1754_v2 = vsel %vm7646_vm7, %v7645_v42, %v7644_v6  ;;  %vm7648_vm14 = vmmov %vm7646_vm7  ;;  %v7654_v55 = vld [vmem:[#allocation95_spill] sm:$0xff] }
0x1f52   : > { %v1713_v56 = vsel %vm7641_vm4, %v7640_v44, %v7639_v18  ;;  %v1714_v34 = vsel %vm7643_vm5, %v7639_v18, %v7642_v47  ;;  %v1755_v49 = vsel %vm7648_vm14, %v7644_v6, %v7647_v35  ;;  %vm7651_vm6 = vmmov %vm7646_vm7  ;;  %v1832_v23 = vsel %vm1831_vm9, %v7655_v50, %v7654_v55  ;;  %v7657_v14 = vld [vmem:[#allocation97_spill] sm:$0xff]  ;;  %v7658_v31 = vld [vmem:[#allocation96_spill] sm:$0xff] }
0x1f53   : > { %v1561_v60 = vadd.f32 %v1557_v48, %v1483_v52  ;;  %v7649_v48 = vld [vmem:[#allocation91_spill] sm:$0xff]  ;;  %vm7653_vm10 = vmmov %vm7651_vm6  ;;  %v1680_v41 = vadd.f32 %v1676_v63, %v1602_v54  ;;  %v1681_v17 = vadd.f32 %v1677_v33, %v1603_v61  ;;  %v1718_v46 = vadd.f32 %v1714_v34, %v1640_v11  ;;  %v7660_v33 = vld [vmem:[#allocation140_spill] sm:$0xff] }
0x1f54   : > { %v6801_v57 = vpop.permute.xlu0 %3735  ;;  %v1791_v1 = vsel %vm7651_vm6, %v7650_v24, %v7649_v48  ;;  %v1792_v45 = vsel %vm7653_vm10, %v7649_v48, %v7652_v4  ;;  %v1869_v58 = vsel %vm1831_vm9, %v7658_v31, %v7657_v14  ;;  %v7661_v18 = vld [vmem:[#allocation138_spill] sm:$0xff]  ;;  %v7666_v54 = vld [vmem:[#allocation141_spill] sm:$0xff]  ;;  %vm7669_vm0 = vmmov %vm7662_vm12  ;;  %vm7710_vm7 = vcmask 474112  }
0x1f55   : > { %v6803_v15 = vpop.permute.xlu1 %3737  ;;  %v1639_v53 = vadd.f32 %v1635_v30, %v1561_v60  ;;  %v7656_v30 = vld [vmem:[#allocation94_spill] sm:$0xff]  ;;  %v1758_v36 = vadd.f32 %v1754_v2, %v1680_v41  ;;  %v1759_v32 = vadd.f32 %v1755_v49, %v1681_v17  ;;  %v1796_v27 = vadd.f32 %v1792_v45, %v1718_v46  ;;  %v7672_v45 = vld [vmem:[#allocation145_spill] sm:$0xff]  ;;  %v7673_v17 = vld [vmem:[#allocation148_spill] sm:$0xff] }
0x1f56   : > { %v1833_v39 = vsel %vm1831_vm9, %v7654_v55, %v7656_v30  ;;  %v7659_v60 = vld [vmem:[#allocation98_spill] sm:$0xff]  ;;  %v2475_v44 = vsel %vm7662_vm12, %v7661_v18, %v7660_v33  ;;  %v7675_v55 = vld [vmem:[#allocation149_spill] sm:$0xff]  ;;  %v7676_v31 = vld [vmem:[#allocation152_spill] sm:$0xff]  ;;  %vm3663_vm12 = vcmask 252928  }
0x1f57   : > { %v1717_v43 = vadd.f32 %v1713_v56, %v1639_v53  ;;  %v1870_v19 = vsel %vm1831_vm9, %v7657_v14, %v7659_v60  ;;  %v7663_v56 = vld [vmem:[#allocation139_spill] sm:$0xff]  ;;  %v7665_v34 = vld [vmem:[#allocation142_spill] sm:$0xff]  ;;  %v1836_v42 = vadd.f32 %v1832_v23, %v1758_v36  ;;  %v1837_v2 = vadd.f32 %v1833_v39, %v1759_v32  ;;  %vm7702_vm4 = vmmov %vm7700_vm3 }
0x1f58   : > { %v6833_v59 = vpop.permute.xlu0 %3739  ;;  %v2476_v47 = vsel %vm7664_vm13, %v7660_v33, %v7663_v56  ;;  %v2512_v61 = vsel %vm7667_vm15, %v7666_v54, %v7665_v34  ;;  %v7668_v53 = vld [vmem:[#allocation143_spill] sm:$0xff]  ;;  %v1874_v49 = vadd.f32 %v1870_v19, %v1796_v27  ;;  %v7670_v24 = vld [vmem:[#allocation146_spill] sm:$0xff]  ;;  %v2591_v50 = vsel %vm2552_vm8, %v7673_v17, %v7675_v55  ;;  %v7692_v55 = vld [vmem:[#allocation164_spill] sm:$0xff] }
0x1f59   : > { %v6835_v16 = vpop.permute.xlu1 %3773  ;;  %v1795_v63 = vadd.f32 %v1791_v1, %v1717_v43  ;;  %v2513_v11 = vsel %vm7669_vm0, %v7665_v34, %v7668_v53  ;;  %v7671_v1 = vld [vmem:[#allocation144_spill] sm:$0xff]  ;;  %v2554_v41 = vsel %vm2552_vm8, %v7670_v24, %v7672_v45  ;;  %v7674_v43 = vld [vmem:[#allocation147_spill] sm:$0xff]  ;;  %v2479_v23 = vadd.f32 %v2475_v44, %v1836_v42  ;;  %v7679_v32 = vld [vmem:[#allocation154_spill] sm:$0xff] }
0x1f5a   : > { %v2553_v4 = vsel %vm2552_vm8, %v7671_v1, %v7670_v24  ;;  %v2590_v46 = vsel %vm2552_vm8, %v7674_v43, %v7673_v17  ;;  %v2480_v30 = vadd.f32 %v2476_v47, %v1837_v2  ;;  %v2517_v14 = vadd.f32 %v2513_v11, %v1874_v49  ;;  %v7678_v19 = vld [vmem:[#allocation151_spill] sm:$0xff]  ;;  %v7682_v53 = vld [vmem:[#allocation158_spill] sm:$0xff]  ;;  %v7683_v11 = vld [vmem:[#allocation156_spill] sm:$0xff] }
0x1f5b   : > { %v1873_v35 = vadd.f32 %v1869_v58, %v1795_v63  ;;  %v7677_v58 = vld [vmem:[#allocation150_spill] sm:$0xff]  ;;  %v2632_v36 = vsel %vm2630_vm1, %v7676_v31, %v7678_v19  ;;  %v7680_v63 = vld [vmem:[#allocation153_spill] sm:$0xff]  ;;  %v7681_v33 = vld [vmem:[#allocation155_spill] sm:$0xff]  ;;  %v2557_v56 = vadd.f32 %v2553_v4, %v2479_v23  ;;  %vm7684_vm8 = vcmask 498688  }
0x1f5c   : > { %v6861_v13 = vpop.permute.xlu0 %3775  ;;  %v2631_v60 = vsel %vm2630_vm1, %v7677_v58, %v7676_v31  ;;  %v2668_v27 = vsel %vm2630_vm1, %v7680_v63, %v7679_v32  ;;  %v2669_v18 = vsel %vm2630_vm1, %v7679_v32, %v7681_v33  ;;  %v2558_v47 = vadd.f32 %v2554_v41, %v2480_v30  ;;  %v7685_v2 = vld [vmem:[#allocation157_spill] sm:$0xff]  ;;  %vm7686_vm9 = vmmov %vm7684_vm8  ;;  %v7687_v49 = vld [vmem:[#allocation160_spill] sm:$0xff] }
0x1f5d   : > { %v6863_v10 = vpop.permute.xlu1 %3777  ;;  %v2516_v39 = vadd.f32 %v2512_v61, %v1873_v35  ;;  %v2595_v54 = vadd.f32 %v2591_v50, %v2517_v14  ;;  %v2709_v42 = vsel %vm7684_vm8, %v7683_v11, %v7682_v53  ;;  %v2710_v35 = vsel %vm7686_vm9, %v7682_v53, %v7685_v2  ;;  %v7688_v24 = vld [vmem:[#allocation159_spill] sm:$0xff]  ;;  %vm7689_vm2 = vmmov %vm7684_vm8  ;;  %v7690_v45 = vld [vmem:[#allocation161_spill] sm:$0xff] }
0x1f5e   : > { %v2746_v1 = vsel %vm7689_vm2, %v7688_v24, %v7687_v49  ;;  %vm7691_vm1 = vmmov %vm7689_vm2  ;;  %v2635_v41 = vadd.f32 %v2631_v60, %v2557_v56  ;;  %v2636_v17 = vadd.f32 %v2632_v36, %v2558_v47  ;;  %v7693_v50 = vld [vmem:[#allocation162_spill] sm:$0xff]  ;;  %v7694_v30 = vld [vmem:[#allocation163_spill] sm:$0xff]  ;;  %vm7718_vm13 = vcmask 261120  }
0x1f5f   : > { %v2594_v34 = vadd.f32 %v2590_v46, %v2516_v39  ;;  %v2747_v4 = vsel %vm7691_vm1, %v7687_v49, %v7690_v45  ;;  %v2673_v46 = vadd.f32 %v2669_v18, %v2595_v54  ;;  %v2787_v23 = vsel %vm2786_vm11, %v7693_v50, %v7692_v55  ;;  %v7695_v14 = vld [vmem:[#allocation166_spill] sm:$0xff]  ;;  %v7696_v31 = vld [vmem:[#allocation165_spill] sm:$0xff]  ;;  %v7697_v19 = vld [vmem:[#allocation167_spill] sm:$0xff] }
0x1f60   : > { %v6889_v3 = vpop.permute.xlu0 %3813  ;;  %v2788_v39 = vsel %vm2786_vm11, %v7692_v55, %v7694_v30  ;;  %v2824_v58 = vsel %vm2786_vm11, %v7696_v31, %v7695_v14  ;;  %v2825_v32 = vsel %vm2786_vm11, %v7695_v14, %v7697_v19  ;;  %v2713_v36 = vadd.f32 %v2709_v42, %v2635_v41  ;;  %v7698_v56 = vld [vmem:[#allocation170_spill] sm:$0xff]  ;;  %v7699_v47 = vld [vmem:[#allocation168_spill] sm:$0xff]  ;;  %v7701_v54 = vld [vmem:[#allocation169_spill] sm:$0xff] }
0x1f61   : > { %v6891_v7 = vpop.permute.xlu1 %3815  ;;  %v2672_v43 = vadd.f32 %v2668_v27, %v2594_v34  ;;  %v2714_v63 = vadd.f32 %v2710_v35, %v2636_v17  ;;  %v2751_v33 = vadd.f32 %v2747_v4, %v2673_v46  ;;  %v2865_v34 = vsel %vm7700_vm3, %v7699_v47, %v7698_v56  ;;  %v7703_v11 = vld [vmem:[#allocation172_spill] sm:$0xff]  ;;  %v7704_v2 = vld [vmem:[#allocation171_spill] sm:$0xff]  ;;  %vm7705_vm5 = vmmov %vm7700_vm3 }
0x1f62   : > { %v2866_v53 = vsel %vm7702_vm4, %v7698_v56, %v7701_v54  ;;  %v2902_v49 = vsel %vm7705_vm5, %v7704_v2, %v7703_v11  ;;  %v7706_v24 = vld [vmem:[#allocation173_spill] sm:$0xff]  ;;  %vm7707_vm11 = vmmov %vm7700_vm3  ;;  %v2791_v35 = vadd.f32 %v2787_v23, %v2713_v36  ;;  %v7708_v41 = vld [vmem:[#allocation176_spill] sm:$0xff]  ;;  %v3624_v54 = vsel %vm7718_vm13, %v6777_v8, %v6783_v25 }
0x1f63   : > { %v2750_v27 = vadd.f32 %v2746_v1, %v2672_v43  ;;  %v2903_v42 = vsel %vm7707_vm11, %v7703_v11, %v7706_v24  ;;  %v2792_v1 = vadd.f32 %v2788_v39, %v2714_v63  ;;  %v2829_v4 = vadd.f32 %v2825_v32, %v2751_v33  ;;  %v7709_v17 = vld [vmem:[#allocation174_spill] sm:$0xff]  ;;  %v7711_v46 = vld [vmem:[#allocation175_spill] sm:$0xff]  ;;  %vm7712_vm14 = vmmov %vm7710_vm7 }
0x1f64   : > { %v6917_v26 = vpop.permute.xlu0 %3817  ;;  %v2943_v43 = vsel %vm7710_vm7, %v7709_v17, %v7708_v41  ;;  %v2944_v55 = vsel %vm7712_vm14, %v7708_v41, %v7711_v46  ;;  %v7713_v50 = vld [vmem:[#allocation178_spill] sm:$0xff]  ;;  %v7714_v30 = vld [vmem:[#allocation177_spill] sm:$0xff]  ;;  %vm7715_vm6 = vmmov %vm7710_vm7  ;;  %v2869_v39 = vadd.f32 %v2865_v34, %v2791_v35  ;;  %vm3741_vm15 = vcmask 244736  }
0x1f65   : > { %v6919_v51 = vpop.permute.xlu1 %3851  ;;  %v2828_v45 = vadd.f32 %v2824_v58, %v2750_v27  ;;  %v2980_v14 = vsel %vm7715_vm6, %v7714_v30, %v7713_v50  ;;  %v7716_v31 = vld [vmem:[#allocation179_spill] sm:$0xff]  ;;  %vm7717_vm10 = vmmov %vm7715_vm6  ;;  %v2870_v58 = vadd.f32 %v2866_v53, %v2792_v1  ;;  %v2907_v36 = vadd.f32 %v2903_v42, %v2829_v4 }
0x1f66   : > { %v2981_v19 = vsel %vm7717_vm10, %v7713_v50, %v7716_v31  ;;  %v2947_v27 = vadd.f32 %v2943_v43, %v2869_v39  ;;  %vm3819_vm0 = vcmask 236544   ;;  %vm3897_vm8 = vcmask 228352  }
0x1f67   : > { %v2906_v32 = vadd.f32 %v2902_v49, %v2828_v45  ;;  %v2948_v33 = vadd.f32 %v2944_v55, %v2870_v58  ;;  %v2985_v47 = vadd.f32 %v2981_v19, %v2907_v36  ;;  %v3664_v34 = vsel %vm3663_vm12, %v6785_v5, %v6787_v20 }
0x1f68   : > { %v6945_v0 = vpop.permute.xlu0 %3853  ;;  %v3701_v53 = vsel %vm3663_vm12, %v6791_v38, %v6793_v62  ;;  %vm3975_vm9 = vcmask 220160   ;;  %vm4053_vm2 = vcmask 211968   ;;  %v3590_v49 = vadd.f32 %v6772_v21, %v2947_v27 }
0x1f69   : > { %v6947_v12 = vpop.permute.xlu1 %3855  ;;  %v2984_v56 = vadd.f32 %v2980_v14, %v2906_v32  ;;  %v3665_v8 = vsel %vm3663_vm12, %v6787_v20, %v6789_v37  ;;  %v3702_v25 = vsel %vm3663_vm12, %v6793_v62, %v6795_v28  ;;  %v3591_v5 = vadd.f32 %v6775_v40, %v2948_v33 }
0x1f6a   : > { %v3628_v42 = vadd.f32 %v3624_v54, %v2985_v47  ;;  %v3742_v38 = vsel %vm3741_vm15, %v6801_v57, %v6803_v15  ;;  %v3779_v21 = vsel %vm3741_vm15, %v6835_v16, %v6861_v13  ;;  %v3743_v20 = vsel %vm3741_vm15, %v6803_v15, %v6833_v59 }
0x1f6b   : > { %v3627_v24 = vadd.f32 %v6781_v29, %v2984_v56  ;;  %v3668_v29 = vadd.f32 %v3664_v34, %v3590_v49  ;;  %v3780_v37 = vsel %vm3741_vm15, %v6861_v13, %v6863_v10  ;;  %v3669_v62 = vadd.f32 %v3665_v8, %v3591_v5 }
0x1f6c   : > { %v6973_v52 = vpop.permute.xlu0 %3891  ;;  %v3706_v28 = vadd.f32 %v3702_v25, %v3628_v42  ;;  %v3820_v57 = vsel %vm3819_vm0, %v6889_v3, %v6891_v7  ;;  %v3857_v16 = vsel %vm3819_vm0, %v6919_v51, %v6945_v0  ;;  %v3821_v15 = vsel %vm3819_vm0, %v6891_v7, %v6917_v26 }
0x1f6d   : > { %v6975_v22 = vpop.permute.xlu1 %3893  ;;  %v3705_v35 = vadd.f32 %v3701_v53, %v3627_v24  ;;  %v3746_v45 = vadd.f32 %v3742_v38, %v3668_v29  ;;  %v3858_v59 = vsel %vm3819_vm0, %v6945_v0, %v6947_v12  ;;  %v3747_v13 = vadd.f32 %v3743_v20, %v3669_v62 }
0x1f6e   : > { %v3784_v10 = vadd.f32 %v3780_v37, %v3706_v28  ;;  %v3898_v3 = vsel %vm3897_vm8, %v6973_v52, %v6975_v22  ;;  %vm4111_vm1 = vcmask 916480  }
0x1f6f   : > { %v3783_v4 = vadd.f32 %v3779_v21, %v3705_v35  ;;  %v3824_v41 = vadd.f32 %v3820_v57, %v3746_v45  ;;  %v3825_v12 = vadd.f32 %v3821_v15, %v3747_v13  ;;  %v4536_v57 = vld [vmem:[%s4954_s29] sm:$0xff]  ;;  %s4614_s29 = scalar_lea.vmem %s4613_s26, 256 }
0x1f70   : > { %v7001_v6 = vpop.permute.xlu0 %3895  ;;  %v3862_v43 = vadd.f32 %v3858_v59, %v3784_v10  ;;  %p4616_p7 = scmp.lt.s32.totalorder %s4614_s29, %s4608_s25 }
0x1f71   : > { %v7003_v48 = vpop.permute.xlu1 %3929  ;;  %v3861_v17 = vadd.f32 %v3857_v16, %v3783_v4  ;;  %v3899_v7 = vsel %vm3897_vm8, %v6975_v22, %v7001_v6  ;;  %v3902_v55 = vadd.f32 %v3898_v3, %v3824_v41 }
0x1f72   : > { %v3903_v6 = vadd.f32 %v3899_v7, %v3825_v12  ;;  %p4617_p13 = por %p4616_p7, %p4615_p12 }
0x1f74   : > { %v7029_v44 = vpop.permute.xlu0 %3931  ;;  %p4618_p3 = pnand %p4617_p13, %p4611_p9 }
0x1f75   : > { %v7031_v61 = vpop.permute.xlu1 %3933  ;;  %v3935_v51 = vsel %vm3897_vm8, %v7003_v48, %v7029_v44 }
0x1f76   : > { %v3936_v26 = vsel %vm3897_vm8, %v7029_v44, %v7031_v61  ;;  %v3939_v50 = vadd.f32 %v3935_v51, %v3861_v17 }
0x1f77   : > { %v3940_v14 = vadd.f32 %v3936_v26, %v3862_v43 }
0x1f78   : > { %v7057_v60 = vpop.permute.xlu0 %3969 }
0x1f79   : > { %v7059_v18 = vpop.permute.xlu1 %3971 }
0x1f7a   : > { %v3976_v52 = vsel %vm3975_vm9, %v7057_v60, %v7059_v18 }
0x1f7b   : > { %v3980_v61 = vadd.f32 %v3976_v52, %v3902_v55 }
0x1f7c   : > { %v3974_v23 = vpop.permute.xlu0 %3973 }
0x1f7d   : > { %v4008_v63 = vpop.permute.xlu1 %4007  ;;  %v3977_v30 = vsel %vm3975_vm9, %v7059_v18, %v3974_v23 }
0x1f7e   : > { %v3981_v60 = vadd.f32 %v3977_v30, %v3903_v6 }
0x1f80   : > { %v4010_v11 = vpop.permute.xlu0 %4009 }
0x1f81   : > { %v4012_v2 = vpop.permute.xlu1 %4011  ;;  %v4013_v46 = vsel %vm3975_vm9, %v4008_v63, %v4010_v11 }
0x1f82   : > { %v4014_v22 = vsel %vm3975_vm9, %v4010_v11, %v4012_v2  ;;  %v4017_v31 = vadd.f32 %v4013_v46, %v3939_v50 }
0x1f83   : > { %v4018_v58 = vadd.f32 %v4014_v22, %v3940_v14 }
0x1f84   : > { %v4048_v40 = vpop.permute.xlu0 %4047 }
0x1f85   : > { %v4050_v1 = vpop.permute.xlu1 %4049 }
0x1f86   : > { %v4054_v44 = vsel %vm4053_vm2, %v4048_v40, %v4050_v1 }
0x1f87   : > { %v4058_v63 = vadd.f32 %v4054_v44, %v3980_v61 }
0x1f88   : > { %v4052_v0 = vpop.permute.xlu0 %4051 }
0x1f89   : > { %v4086_v48 = vpop.permute.xlu1 %4085  ;;  %v4055_v19 = vsel %vm4053_vm2, %v4050_v1, %v4052_v0 }
0x1f8a   : > { %v4059_v23 = vadd.f32 %v4055_v19, %v3981_v60 }
0x1f8c   : > { %v4088_v39 = vpop.permute.xlu0 %4087 }
0x1f8d   : > { %v4091_v32 = vsel %vm4053_vm2, %v4086_v48, %v4088_v39  ;;  %v4090_v36 = vpop.permute.xlu1 %4089 }
0x1f8e   : > { %v4095_v27 = vadd.f32 %v4091_v32, %v4017_v31  ;;  %v4092_v18 = vsel %vm4053_vm2, %v4088_v39, %v4090_v36 }
0x1f8f   : > { %v4096_v33 = vadd.f32 %v4092_v18, %v4018_v58 }
0x1f90   : > { %v4106_v56 = vpop.permute.xlu0 %4105  ;;  %v4097_v47 = vadd.f32 %v4095_v27, %v4058_v63 }
0x1f91   : > { %v4108_v54 = vpop.permute.xlu1 %4107  ;;  %v4098_v11 = vadd.f32 %v4096_v33, %v4059_v23 }
0x1f92   : > { %v4112_v34 = vsel %vm4111_vm1, %v4106_v56, %v4108_v54 }
0x1f93   : > { %v4116_v53 = vadd.f32 %v4112_v34, %v4097_v47 }
0x1f94   : > { %v4110_v2 = vpop.permute.xlu0 %4109 }
0x1f95   : > { %v4363_v49 = vmul.f32 -1.442695, %v4116_v53  ;;  %v4113_v24 = vsel %vm4111_vm1, %v4108_v54, %v4110_v2 }
0x1f96   : > { %v4117_v8 = vadd.f32 %v4113_v24, %v4098_v11 }
0x1f97   : > { %4513 = vpow2.f32 %v4363_v49 }
0x1f98   : > { %v4364_v25 = vmul.f32 -1.442695, %v4117_v8 }
0x1f9a   : > { %4515 = vpow2.f32 %v4364_v25 }
0x1fa1   : > { %v4514_v5 = vpop.eup %4513 }
0x1fa2   : > { %v4124_v42 = vadd.f32 1.0, %v4514_v5 }
0x1fa4   : > { %v4516_v38 = vpop.eup %4515  ;;  %4517 = vrcp.f32 %v4124_v42 }
0x1fa5   : > { %v4125_v21 = vadd.f32 1.0, %v4516_v38 }
0x1fa7   : > { %4519 = vrcp.f32 %v4125_v21 }
0x1fae   : > { %v4518_v29 = vpop.eup %4517 }
0x1faf   : > { %v4130_v35 = vadd.f32 1.0, %v4518_v29 }
0x1fb1   : > { %v4520_v20 = vpop.eup %4519  ;;  %v4135_v40 = vrot.slane %v4130_v35, %v4971_v9 }
0x1fb2   : > { %v4131_v37 = vadd.f32 1.0, %v4520_v20 }
0x1fb4   : > { %v4139_v62 = vrot.slane %v4131_v37, %v4971_v9 }
0x1fb6   : > { %v4142_v28 = vcombine.low %v4135_v40, %v4139_v62 }
0x1fb8   : > { %v4144_v16 = vmul.f32 %v4536_v57, %v4142_v28 }
0x1fba   : > { %4145 = vst [vmem:[%s211_s6] sm:$0xff] %v4144_v16 }
0x1fbb   : > { %4621 = shalt.err (!%p4618_p3)
}
0x1fbc   : > { %s4622_s17 = scalar_lea.hbm %s7159_s30, 128  ;;  %s4626_s20 = scalar_lea.hbm %s7206_s3, 256 }
0x1fbd   : > { %p4623_p1 = scmp.ne.s32.totalorder %s7159_s30, %s4622_s17  ;;  %p4627_p8 = scmp.lt.u32.totalorder %s7159_s30, %s7206_s3 }
0x1fbe   : > { %p4628_p5 = scmp.lt.u32.totalorder %s4626_s20, %s4622_s17  ;;  %p4630_p2 = scmp.lt.u32.totalorder %s4622_s17, %s7159_s30 }
0x1fbf   : > { %p4624_p0 = pnand %p4623_p1, %p7719_p4 }
0x1fc0   : > { %p4629_p10 = por %p4628_p5, %p4627_p8 }
0x1fc1   : > { %p4625_p11 = pneg %p4624_p0 }
0x1fc2   : > { %p4631_p6 = por %p4630_p2, %p4629_p10 }
0x1fc4   : > { %p4632_p9 = pnand %p4631_p6, %p4625_p11 }
0x1fc6   : > { %4635 = shalt.err (!%p4632_p9)
}
0x1fc7   : > { %4382 = dma.vmem_to_hbm [thread:$0]  (%p7719_p4), %s7161_s10, 128, %s7159_s30, %s4147_s27  }
0x1fc8 PF: > { %s4173_s11 = sand.u32 1, %s4670_s12   ;;  %p7720_p12 = scmp.ne.s32.totalorder %s7304_s19, 0 }
0x1fc9   : > { %p7721_p7 = scmp.ge.s32.totalorder %s4682_s15, 2  ;;  %s4174_s9 = scalar_lea.sflag [#allocation4], %s4173_s11 }
0x1fcb   : > { %p4396_p13 = pnand %p7721_p7, %p7720_p12 }
0x1fcd   : > { %4665 = dma.done.wait (!%p4396_p13), %s4174_s9, 128  }
0x1fce   : > { %4667 = vsyncadd (!%p4396_p13), %s4174_s9, 4294967168  ;;  %p18_p3 = scmp.ge.s32.totalorder %s4837_s24, 4   ;;  %s7722_s12 = smov %s4674_s13 }
0x1fcf   : > { %s7723_s13 = smov %s4678_s14  ;;  %s7724_s14 = smov %s4895_s7 }
0x1fd0   : > { %s7725_s15 = smov %s4837_s24  ;;  %20 = sbr.rel (!%p18_p3) target bundleno = 7 (0x7), region = 92 }
0x1fd7   :  { %4179 = vsyncpa [#allocation3], 1 }
0x1fd8   :  { %4181 = vsyncpa [#allocation3 + $0x1], 1 }
0x1fd9   :  { %4182 = vsyncpa [#allocation8], 1 }
0x1fda   :  { %4183 = vsyncpa [#allocation4], 1 }
0x1fdb   :  { %4185 = vsyncpa [#allocation4 + $0x1], 1 }
0x1fdc   :  { %4186 = vsyncpa [#allocation5], 1 }
0x1fdd   :  { %4188 = vsyncpa [#allocation5 + $0x1], 1 }

</bundles_post_ra>
